<compile_context>
chip_gen: v7x
topology: tpu7x:2x2x1
jax: 0.10.0
libtpu: 0.0.40
codegen_flags: <defaults>
</compile_context>

<pallas_src>
import functools

import jax
import jax.numpy as jnp
from jax.experimental import pallas as pl
from jax.experimental.pallas import tpu as pltpu

BN_EPS = 1e-5
DEFAULT_TILE_M = 256  # multiple of 16 (bf16 sublane packing); fits easily in 32 MiB scoped VMEM


def _round_up(x, m):
    return (x + m - 1) // m * m


# ----------------------------------------------------------------------------
# Pallas kernel: fused conv-as-matmul + BN affine (+ fused 1x1-downsample conv)
#                (+ residual add) (+ ReLU)
# ----------------------------------------------------------------------------
def _conv_bn_kernel(*refs, relu, has_res, has_down):
    p_ref, w_ref, s_ref, b_ref = refs[:4]
    idx = 4
    if has_down:
        pd_ref, wd_ref, sd_ref, bd_ref = refs[idx:idx + 4]
        idx += 4
    if has_res:
        res_ref = refs[idx]
        idx += 1
    o_ref = refs[idx]

    # Single lane-dense MXU matmul per tile: taps folded into the K dim.
    acc = jnp.dot(p_ref[...], w_ref[...], preferred_element_type=jnp.float32)
    out = acc * s_ref[...] + b_ref[...]            # BatchNorm folded to affine (f32)

    if has_down:
        # Fused 1x1-conv + BN identity path (layer2 downsample).
        acc_d = jnp.dot(pd_ref[...], wd_ref[...], preferred_element_type=jnp.float32)
        out = out + acc_d * sd_ref[...] + bd_ref[...]

    if has_res:
        out = out + res_ref[...].astype(jnp.float32)   # identity residual

    if relu:
        out = jnp.maximum(out, 0.0)

    o_ref[...] = out.astype(o_ref.dtype)


# ----------------------------------------------------------------------------
# JAX glue: im2col that builds ONE fused (M, KH*KW*Cin) slab (taps in K dim)
# ----------------------------------------------------------------------------
def _im2col(x_nhwc, KH, KW, stride, padding):
    N, H, W, C = x_nhwc.shape
    OH = (H + 2 * padding - KH) // stride + 1
    OW = (W + 2 * padding - KW) // stride + 1
    xp = jnp.pad(x_nhwc, ((0, 0), (padding, padding), (padding, padding), (0, 0)))
    cols = []
    for kh in range(KH):
        for kw in range(KW):
            patch = xp[:, kh:kh + stride * (OH - 1) + 1:stride,
                          kw:kw + stride * (OW - 1) + 1:stride, :]
            cols.append(patch.reshape(N * OH * OW, C))
    # Column order (kh, kw, cin) matches w_hwio.reshape(KH*KW*Cin, Cout).
    return jnp.concatenate(cols, axis=1), OH, OW


# ----------------------------------------------------------------------------
# Wrapper: one fused pallas_call per conv (optionally with downsample/residual)
# ----------------------------------------------------------------------------
def conv_bn(x_nhwc, w_hwio, bn_scale, bn_shift, *, stride=1, padding=0,
            relu=True, residual=None, down=None, out_dtype=jnp.bfloat16,
            tile_m=DEFAULT_TILE_M):
    """conv2d (bias=False) + BatchNorm(eval) [+ fused 1x1 downsample path]
    [+ residual] [+ ReLU].  `down` = (x_down, w_1x1, bn_scale, bn_shift, stride)."""
    N, H, W, Cin = x_nhwc.shape
    KH, KW, _, Cout = w_hwio.shape
    K = KH * KW * Cin

    cols, OH, OW = _im2col(x_nhwc.astype(jnp.bfloat16), KH, KW, stride, padding)
    M = N * OH * OW

    TILE_M = min(tile_m, _round_up(M, 16))
    M_pad = _round_up(M, TILE_M)
    if M_pad != M:
        cols = jnp.pad(cols, ((0, M_pad - M), (0, 0)))

    w_flat = w_hwio.reshape(K, Cout).astype(jnp.bfloat16)
    scale2 = bn_scale.reshape(1, Cout).astype(jnp.float32)
    shift2 = bn_shift.reshape(1, Cout).astype(jnp.float32)

    args = [cols, w_flat, scale2, shift2]
    in_specs = [
        pl.BlockSpec((TILE_M, K), lambda i: (i, 0)),   # im2col slab: tiled over M
        pl.BlockSpec((K, Cout), lambda i: (0, 0)),     # weights: VMEM-resident
        pl.BlockSpec((1, Cout), lambda i: (0, 0)),     # BN scale: resident
        pl.BlockSpec((1, Cout), lambda i: (0, 0)),     # BN shift: resident
    ]

    has_down = down is not None
    if has_down:
        dx, dw, dscale, dshift, dstride = down
        dCin = dx.shape[-1]
        dcols, dOH, dOW = _im2col(dx.astype(jnp.bfloat16), 1, 1, dstride, 0)
        assert dOH == OH and dOW == OW
        if M_pad != M:
            dcols = jnp.pad(dcols, ((0, M_pad - M), (0, 0)))
        args += [dcols,
                 dw.reshape(dCin, Cout).astype(jnp.bfloat16),
                 dscale.reshape(1, Cout).astype(jnp.float32),
                 dshift.reshape(1, Cout).astype(jnp.float32)]
        in_specs += [
            pl.BlockSpec((TILE_M, dCin), lambda i: (i, 0)),
            pl.BlockSpec((dCin, Cout), lambda i: (0, 0)),
            pl.BlockSpec((1, Cout), lambda i: (0, 0)),
            pl.BlockSpec((1, Cout), lambda i: (0, 0)),
        ]

    has_res = residual is not None
    if has_res:
        res = residual.reshape(M, Cout).astype(jnp.bfloat16)
        if M_pad != M:
            res = jnp.pad(res, ((0, M_pad - M), (0, 0)))
        args.append(res)
        in_specs.append(pl.BlockSpec((TILE_M, Cout), lambda i: (i, 0)))

    kernel = functools.partial(_conv_bn_kernel, relu=relu,
                               has_res=has_res, has_down=has_down)

    out = pl.pallas_call(
        kernel,
        grid=(M_pad // TILE_M,),
        in_specs=in_specs,
        out_specs=pl.BlockSpec((TILE_M, Cout), lambda i: (i, 0)),
        out_shape=jax.ShapeDtypeStruct((M_pad, Cout), out_dtype),
        compiler_params=pltpu.CompilerParams(
            dimension_semantics=("parallel",)),
    )(*args)
    return out[:M].reshape(N, OH, OW, Cout)


# ----------------------------------------------------------------------------
# Deterministic parameter init (matches module __init__ semantics)
# ----------------------------------------------------------------------------
def _kaiming_fan_out(key, kh, kw, cin, cout):
    # nn.init.kaiming_normal_(mode='fan_out', nonlinearity='relu')
    fan_out = cout * kh * kw
    std = (2.0 / fan_out) ** 0.5
    return std * jax.random.normal(key, (kh, kw, cin, cout), jnp.float32)


def _bn_params(c):
    # BatchNorm2d: weight=1, bias=0, running_mean=0, running_var=1, eval mode.
    # Folded:  y = x * gamma/sqrt(var+eps) + (beta - mean*scale)
    # TODO(synk): train-mode BatchNorm (batch statistics) not implemented; eval-mode
    # running stats are used, which is the standard inference semantics.
    scale = jnp.full((c,), 1.0 / jnp.sqrt(1.0 + BN_EPS), jnp.float32)
    shift = jnp.zeros((c,), jnp.float32)
    return scale, shift


def make_params(key, input_dim, in_channels):
    """ResNet(BasicBlock, layers=[1,1,1,1], in_channels=in_channels, input_dim=input_dim)."""
    assert in_channels[2] == 0 and in_channels[3] == 0, "layer3/layer4 disabled"
    keys = jax.random.split(key, 8)
    p = {}
    inplanes = 64
    # stem: conv7x7(input_dim->64, stride=1, pad=3) + bn1
    p["conv1_w"] = _kaiming_fan_out(keys[0], 7, 7, input_dim, inplanes)
    p["bn1_s"], p["bn1_b"] = _bn_params(inplanes)

    # layer1: one BasicBlock(64 -> in_channels[0]=64), stride=1, no downsample
    c1 = in_channels[0]
    p["l1_conv1_w"] = _kaiming_fan_out(keys[1], 3, 3, inplanes, c1)
    p["l1_bn1_s"], p["l1_bn1_b"] = _bn_params(c1)
    p["l1_conv2_w"] = _kaiming_fan_out(keys[2], 3, 3, c1, c1)
    p["l1_bn2_s"], p["l1_bn2_b"] = _bn_params(c1)
    inplanes = c1

    # layer2: one BasicBlock(64 -> in_channels[1]=128), stride=2, downsample conv1x1+bn
    c2 = in_channels[1]
    p["l2_conv1_w"] = _kaiming_fan_out(keys[3], 3, 3, inplanes, c2)
    p["l2_bn1_s"], p["l2_bn1_b"] = _bn_params(c2)
    p["l2_conv2_w"] = _kaiming_fan_out(keys[4], 3, 3, c2, c2)
    p["l2_bn2_s"], p["l2_bn2_b"] = _bn_params(c2)
    p["l2_down_w"] = _kaiming_fan_out(keys[5], 1, 1, inplanes, c2)
    p["l2_down_s"], p["l2_down_b"] = _bn_params(c2)
    return p


# ----------------------------------------------------------------------------
# Forward (mirrors ResNet.forward with is_get_all_feat flag)
# ----------------------------------------------------------------------------
def resnet_forward(params, x_nchw, is_get_all_feat=False):
    x = jnp.transpose(x_nchw, (0, 2, 3, 1))  # NCHW -> NHWC for the kernels

    # stem: conv1 + bn1 + relu
    x0 = conv_bn(x, params["conv1_w"], params["bn1_s"], params["bn1_b"],
                 stride=1, padding=3, relu=True)

    # layer1 (BasicBlock, stride=1, identity residual fused into conv2 kernel)
    # TODO(synk): fusing conv1+conv2 of a block into a single pallas_call (intermediate
    # in VMEM scratch) needs an in-kernel spatial im2col with cross-tile halos; kept as
    # separate fused conv kernels here.
    out = conv_bn(x0, params["l1_conv1_w"], params["l1_bn1_s"], params["l1_bn1_b"],
                  stride=1, padding=1, relu=True)
    x1 = conv_bn(out, params["l1_conv2_w"], params["l1_bn2_s"], params["l1_bn2_b"],
                 stride=1, padding=1, relu=True, residual=x0)

    # layer2 (BasicBlock, stride=2): the 1x1 downsample conv+bn identity path is
    # fused into the conv2 kernel (second matmul), as is the residual add + relu.
    out = conv_bn(x1, params["l2_conv1_w"], params["l2_bn1_s"], params["l2_bn1_b"],
                  stride=2, padding=1, relu=True)
    x2 = conv_bn(out, params["l2_conv2_w"], params["l2_bn2_s"], params["l2_bn2_b"],
                 stride=1, padding=1, relu=True,
                 down=(x1, params["l2_down_w"], params["l2_down_s"],
                       params["l2_down_b"], 2))

    if is_get_all_feat:
        return [jnp.transpose(f.astype(jnp.float32), (0, 3, 1, 2))
                for f in (x0, x1, x2)]
    return jnp.transpose(x2.astype(jnp.float32), (0, 3, 1, 2))  # back to NCHW


if __name__ == "__main__":
    key = jax.random.PRNGKey(0)
    k_param, k_x = jax.random.split(key)

    input_dim = 4
    in_channels = [64, 128, 0, 0]      # layer3/layer4 disabled (in_channels[2:]==0)
    params = make_params(k_param, input_dim, in_channels)

    x = jax.random.normal(k_x, (2, input_dim, 16, 16), jnp.float32)  # NCHW

    fwd = jax.jit(functools.partial(resnet_forward, is_get_all_feat=False))
    out = fwd(params, x)
    out = jax.block_until_ready(out)

    assert out.shape == (2, 128, 8, 8), out.shape
    assert jnp.all(jnp.isfinite(out))
    print("KERNEL_OK")
</pallas_src>

<mosaic_0001>
module attributes {stable_mosaic.version = 11 : i64} {
  func.func @_conv_bn_kernel(%arg0: i32, %arg1: memref<256x196xbf16, #tpu.memory_space<vmem>>, %arg2: memref<196x64xbf16, #tpu.memory_space<vmem>>, %arg3: memref<1x64xf32, #tpu.memory_space<vmem>>, %arg4: memref<1x64xf32, #tpu.memory_space<vmem>>, %arg5: memref<256x64xbf16, #tpu.memory_space<vmem>>) attributes {dimension_semantics = [#tpu.dimension_semantics<parallel>], iteration_bounds = array<i64: 2>, scalar_prefetch = 0 : i64, scratch_operands = 0 : i64, tpu.core_type = #tpu.core_type<tc>, window_params = [{transform_indices = @transform_0, window_bounds = array<i64: 256, 196>}, {pipeline_mode = #tpu.pipeline_mode<synchronous>, transform_indices = @transform_1, window_bounds = array<i64: 196, 64>}, {pipeline_mode = #tpu.pipeline_mode<synchronous>, transform_indices = @transform_2, window_bounds = array<i64: 1, 64>}, {pipeline_mode = #tpu.pipeline_mode<synchronous>, transform_indices = @transform_3, window_bounds = array<i64: 1, 64>}, {transform_indices = @transform_4, window_bounds = array<i64: 256, 64>}]} {
    %c0 = arith.constant 0 : index
    %c0_0 = arith.constant 0 : index
    %0 = vector.load %arg1[%c0, %c0_0] : memref<256x196xbf16, #tpu.memory_space<vmem>>, vector<256x196xbf16>
    %c0_1 = arith.constant 0 : index
    %c0_2 = arith.constant 0 : index
    %1 = vector.load %arg2[%c0_1, %c0_2] : memref<196x64xbf16, #tpu.memory_space<vmem>>, vector<196x64xbf16>
    %cst = arith.constant dense<0.000000e+00> : vector<256x64xf32>
    %2 = tpu.matmul %0, %1, %cst {dimension_numbers = #tpu.dot_dimension_numbers<[1], [0], [0], [1], [0, 0, 1, 1], [], []>} : vector<256x196xbf16>, vector<196x64xbf16>, vector<256x64xf32> -> vector<256x64xf32>
    %c0_3 = arith.constant 0 : index
    %c0_4 = arith.constant 0 : index
    %3 = vector.load %arg3[%c0_3, %c0_4] : memref<1x64xf32, #tpu.memory_space<vmem>>, vector<1x64xf32>
    %4 = vector.broadcast %3 : vector<1x64xf32> to vector<256x64xf32>
    %5 = arith.mulf %2, %4 : vector<256x64xf32>
    %c0_5 = arith.constant 0 : index
    %c0_6 = arith.constant 0 : index
    %6 = vector.load %arg4[%c0_5, %c0_6] : memref<1x64xf32, #tpu.memory_space<vmem>>, vector<1x64xf32>
    %7 = vector.broadcast %6 : vector<1x64xf32> to vector<256x64xf32>
    %8 = arith.addf %5, %7 : vector<256x64xf32>
    %cst_7 = arith.constant 0.000000e+00 : f32
    %9 = vector.broadcast %cst_7 : f32 to vector<256x64xf32>
    %10 = arith.maximumf %8, %9 : vector<256x64xf32>
    %11 = arith.truncf %10 : vector<256x64xf32> to vector<256x64xbf16>
    %c0_8 = arith.constant 0 : index
    %c0_9 = arith.constant 0 : index
    %12 = vector.load %arg5[%c0_8, %c0_9] : memref<256x64xbf16, #tpu.memory_space<vmem>>, vector<256x64xbf16>
    tpu.vector_store %arg5[%c0_8, %c0_9], %11 {strides = array<i32>} : memref<256x64xbf16, #tpu.memory_space<vmem>>, vector<256x64xbf16>,
    return
  }
  func.func @transform_0(%arg0: i32) -> (i32, i32) {
    %c0_i32 = arith.constant 0 : i32
    %c0_i32_0 = arith.constant 0 : i32
    return %arg0, %c0_i32 : i32, i32
  }
  func.func @transform_1(%arg0: i32) -> (i32, i32) {
    %c0_i32 = arith.constant 0 : i32
    %c0_i32_0 = arith.constant 0 : i32
    %c0_i32_1 = arith.constant 0 : i32
    return %c0_i32, %c0_i32_0 : i32, i32
  }
  func.func @transform_2(%arg0: i32) -> (i32, i32) {
    %c0_i32 = arith.constant 0 : i32
    %c0_i32_0 = arith.constant 0 : i32
    %c0_i32_1 = arith.constant 0 : i32
    return %c0_i32, %c0_i32_0 : i32, i32
  }
  func.func @transform_3(%arg0: i32) -> (i32, i32) {
    %c0_i32 = arith.constant 0 : i32
    %c0_i32_0 = arith.constant 0 : i32
    %c0_i32_1 = arith.constant 0 : i32
    return %c0_i32, %c0_i32_0 : i32, i32
  }
  func.func @transform_4(%arg0: i32) -> (i32, i32) {
    %c0_i32 = arith.constant 0 : i32
    %c0_i32_0 = arith.constant 0 : i32
    return %arg0, %c0_i32 : i32, i32
  }
}

module attributes {stable_mosaic.version = 11 : i64} {
  func.func @_conv_bn_kernel(%arg0: i32, %arg1: memref<256x576xbf16, #tpu.memory_space<vmem>>, %arg2: memref<576x64xbf16, #tpu.memory_space<vmem>>, %arg3: memref<1x64xf32, #tpu.memory_space<vmem>>, %arg4: memref<1x64xf32, #tpu.memory_space<vmem>>, %arg5: memref<256x64xbf16, #tpu.memory_space<vmem>>) attributes {dimension_semantics = [#tpu.dimension_semantics<parallel>], iteration_bounds = array<i64: 2>, scalar_prefetch = 0 : i64, scratch_operands = 0 : i64, tpu.core_type = #tpu.core_type<tc>, window_params = [{transform_indices = @transform_0, window_bounds = array<i64: 256, 576>}, {pipeline_mode = #tpu.pipeline_mode<synchronous>, transform_indices = @transform_1, window_bounds = array<i64: 576, 64>}, {pipeline_mode = #tpu.pipeline_mode<synchronous>, transform_indices = @transform_2, window_bounds = array<i64: 1, 64>}, {pipeline_mode = #tpu.pipeline_mode<synchronous>, transform_indices = @transform_3, window_bounds = array<i64: 1, 64>}, {transform_indices = @transform_4, window_bounds = array<i64: 256, 64>}]} {
    %c0 = arith.constant 0 : index
    %c0_0 = arith.constant 0 : index
    %0 = vector.load %arg1[%c0, %c0_0] : memref<256x576xbf16, #tpu.memory_space<vmem>>, vector<256x576xbf16>
    %c0_1 = arith.constant 0 : index
    %c0_2 = arith.constant 0 : index
    %1 = vector.load %arg2[%c0_1, %c0_2] : memref<576x64xbf16, #tpu.memory_space<vmem>>, vector<576x64xbf16>
    %cst = arith.constant dense<0.000000e+00> : vector<256x64xf32>
    %2 = tpu.matmul %0, %1, %cst {dimension_numbers = #tpu.dot_dimension_numbers<[1], [0], [0], [1], [0, 0, 1, 1], [], []>} : vector<256x576xbf16>, vector<576x64xbf16>, vector<256x64xf32> -> vector<256x64xf32>
    %c0_3 = arith.constant 0 : index
    %c0_4 = arith.constant 0 : index
    %3 = vector.load %arg3[%c0_3, %c0_4] : memref<1x64xf32, #tpu.memory_space<vmem>>, vector<1x64xf32>
    %4 = vector.broadcast %3 : vector<1x64xf32> to vector<256x64xf32>
    %5 = arith.mulf %2, %4 : vector<256x64xf32>
    %c0_5 = arith.constant 0 : index
    %c0_6 = arith.constant 0 : index
    %6 = vector.load %arg4[%c0_5, %c0_6] : memref<1x64xf32, #tpu.memory_space<vmem>>, vector<1x64xf32>
    %7 = vector.broadcast %6 : vector<1x64xf32> to vector<256x64xf32>
    %8 = arith.addf %5, %7 : vector<256x64xf32>
    %cst_7 = arith.constant 0.000000e+00 : f32
    %9 = vector.broadcast %cst_7 : f32 to vector<256x64xf32>
    %10 = arith.maximumf %8, %9 : vector<256x64xf32>
    %11 = arith.truncf %10 : vector<256x64xf32> to vector<256x64xbf16>
    %c0_8 = arith.constant 0 : index
    %c0_9 = arith.constant 0 : index
    %12 = vector.load %arg5[%c0_8, %c0_9] : memref<256x64xbf16, #tpu.memory_space<vmem>>, vector<256x64xbf16>
    tpu.vector_store %arg5[%c0_8, %c0_9], %11 {strides = array<i32>} : memref<256x64xbf16, #tpu.memory_space<vmem>>, vector<256x64xbf16>,
    return
  }
  func.func @transform_0(%arg0: i32) -> (i32, i32) {
    %c0_i32 = arith.constant 0 : i32
    %c0_i32_0 = arith.constant 0 : i32
    return %arg0, %c0_i32 : i32, i32
  }
  func.func @transform_1(%arg0: i32) -> (i32, i32) {
    %c0_i32 = arith.constant 0 : i32
    %c0_i32_0 = arith.constant 0 : i32
    %c0_i32_1 = arith.constant 0 : i32
    return %c0_i32, %c0_i32_0 : i32, i32
  }
  func.func @transform_2(%arg0: i32) -> (i32, i32) {
    %c0_i32 = arith.constant 0 : i32
    %c0_i32_0 = arith.constant 0 : i32
    %c0_i32_1 = arith.constant 0 : i32
    return %c0_i32, %c0_i32_0 : i32, i32
  }
  func.func @transform_3(%arg0: i32) -> (i32, i32) {
    %c0_i32 = arith.constant 0 : i32
    %c0_i32_0 = arith.constant 0 : i32
    %c0_i32_1 = arith.constant 0 : i32
    return %c0_i32, %c0_i32_0 : i32, i32
  }
  func.func @transform_4(%arg0: i32) -> (i32, i32) {
    %c0_i32 = arith.constant 0 : i32
    %c0_i32_0 = arith.constant 0 : i32
    return %arg0, %c0_i32 : i32, i32
  }
}

module attributes {stable_mosaic.version = 11 : i64} {
  func.func @_conv_bn_kernel(%arg0: i32, %arg1: memref<256x576xbf16, #tpu.memory_space<vmem>>, %arg2: memref<576x64xbf16, #tpu.memory_space<vmem>>, %arg3: memref<1x64xf32, #tpu.memory_space<vmem>>, %arg4: memref<1x64xf32, #tpu.memory_space<vmem>>, %arg5: memref<256x64xbf16, #tpu.memory_space<vmem>>, %arg6: memref<256x64xbf16, #tpu.memory_space<vmem>>) attributes {dimension_semantics = [#tpu.dimension_semantics<parallel>], iteration_bounds = array<i64: 2>, scalar_prefetch = 0 : i64, scratch_operands = 0 : i64, tpu.core_type = #tpu.core_type<tc>, window_params = [{transform_indices = @transform_0, window_bounds = array<i64: 256, 576>}, {pipeline_mode = #tpu.pipeline_mode<synchronous>, transform_indices = @transform_1, window_bounds = array<i64: 576, 64>}, {pipeline_mode = #tpu.pipeline_mode<synchronous>, transform_indices = @transform_2, window_bounds = array<i64: 1, 64>}, {pipeline_mode = #tpu.pipeline_mode<synchronous>, transform_indices = @transform_3, window_bounds = array<i64: 1, 64>}, {transform_indices = @transform_4, window_bounds = array<i64: 256, 64>}, {transform_indices = @transform_5, window_bounds = array<i64: 256, 64>}]} {
    %c0 = arith.constant 0 : index
    %c0_0 = arith.constant 0 : index
    %0 = vector.load %arg1[%c0, %c0_0] : memref<256x576xbf16, #tpu.memory_space<vmem>>, vector<256x576xbf16>
    %c0_1 = arith.constant 0 : index
    %c0_2 = arith.constant 0 : index
    %1 = vector.load %arg2[%c0_1, %c0_2] : memref<576x64xbf16, #tpu.memory_space<vmem>>, vector<576x64xbf16>
    %cst = arith.constant dense<0.000000e+00> : vector<256x64xf32>
    %2 = tpu.matmul %0, %1, %cst {dimension_numbers = #tpu.dot_dimension_numbers<[1], [0], [0], [1], [0, 0, 1, 1], [], []>} : vector<256x576xbf16>, vector<576x64xbf16>, vector<256x64xf32> -> vector<256x64xf32>
    %c0_3 = arith.constant 0 : index
    %c0_4 = arith.constant 0 : index
    %3 = vector.load %arg3[%c0_3, %c0_4] : memref<1x64xf32, #tpu.memory_space<vmem>>, vector<1x64xf32>
    %4 = vector.broadcast %3 : vector<1x64xf32> to vector<256x64xf32>
    %5 = arith.mulf %2, %4 : vector<256x64xf32>
    %c0_5 = arith.constant 0 : index
    %c0_6 = arith.constant 0 : index
    %6 = vector.load %arg4[%c0_5, %c0_6] : memref<1x64xf32, #tpu.memory_space<vmem>>, vector<1x64xf32>
    %7 = vector.broadcast %6 : vector<1x64xf32> to vector<256x64xf32>
    %8 = arith.addf %5, %7 : vector<256x64xf32>
    %c0_7 = arith.constant 0 : index
    %c0_8 = arith.constant 0 : index
    %9 = vector.load %arg5[%c0_7, %c0_8] : memref<256x64xbf16, #tpu.memory_space<vmem>>, vector<256x64xbf16>
    %10 = arith.extf %9 : vector<256x64xbf16> to vector<256x64xf32>
    %11 = arith.addf %8, %10 : vector<256x64xf32>
    %cst_9 = arith.constant 0.000000e+00 : f32
    %12 = vector.broadcast %cst_9 : f32 to vector<256x64xf32>
    %13 = arith.maximumf %11, %12 : vector<256x64xf32>
    %14 = arith.truncf %13 : vector<256x64xf32> to vector<256x64xbf16>
    %c0_10 = arith.constant 0 : index
    %c0_11 = arith.constant 0 : index
    %15 = vector.load %arg6[%c0_10, %c0_11] : memref<256x64xbf16, #tpu.memory_space<vmem>>, vector<256x64xbf16>
    tpu.vector_store %arg6[%c0_10, %c0_11], %14 {strides = array<i32>} : memref<256x64xbf16, #tpu.memory_space<vmem>>, vector<256x64xbf16>,
    return
  }
  func.func @transform_0(%arg0: i32) -> (i32, i32) {
    %c0_i32 = arith.constant 0 : i32
    %c0_i32_0 = arith.constant 0 : i32
    return %arg0, %c0_i32 : i32, i32
  }
  func.func @transform_1(%arg0: i32) -> (i32, i32) {
    %c0_i32 = arith.constant 0 : i32
    %c0_i32_0 = arith.constant 0 : i32
    %c0_i32_1 = arith.constant 0 : i32
    return %c0_i32, %c0_i32_0 : i32, i32
  }
  func.func @transform_2(%arg0: i32) -> (i32, i32) {
    %c0_i32 = arith.constant 0 : i32
    %c0_i32_0 = arith.constant 0 : i32
    %c0_i32_1 = arith.constant 0 : i32
    return %c0_i32, %c0_i32_0 : i32, i32
  }
  func.func @transform_3(%arg0: i32) -> (i32, i32) {
    %c0_i32 = arith.constant 0 : i32
    %c0_i32_0 = arith.constant 0 : i32
    %c0_i32_1 = arith.constant 0 : i32
    return %c0_i32, %c0_i32_0 : i32, i32
  }
  func.func @transform_4(%arg0: i32) -> (i32, i32) {
    %c0_i32 = arith.constant 0 : i32
    %c0_i32_0 = arith.constant 0 : i32
    return %arg0, %c0_i32 : i32, i32
  }
  func.func @transform_5(%arg0: i32) -> (i32, i32) {
    %c0_i32 = arith.constant 0 : i32
    %c0_i32_0 = arith.constant 0 : i32
    return %arg0, %c0_i32 : i32, i32
  }
}

module attributes {stable_mosaic.version = 11 : i64} {
  func.func @_conv_bn_kernel(%arg0: i32, %arg1: memref<128x576xbf16, #tpu.memory_space<vmem>>, %arg2: memref<576x128xbf16, #tpu.memory_space<vmem>>, %arg3: memref<1x128xf32, #tpu.memory_space<vmem>>, %arg4: memref<1x128xf32, #tpu.memory_space<vmem>>, %arg5: memref<128x128xbf16, #tpu.memory_space<vmem>>) attributes {dimension_semantics = [#tpu.dimension_semantics<parallel>], iteration_bounds = array<i64: 1>, scalar_prefetch = 0 : i64, scratch_operands = 0 : i64, tpu.core_type = #tpu.core_type<tc>, window_params = [{transform_indices = @transform_0, window_bounds = array<i64: 128, 576>}, {pipeline_mode = #tpu.pipeline_mode<synchronous>, transform_indices = @transform_1, window_bounds = array<i64: 576, 128>}, {pipeline_mode = #tpu.pipeline_mode<synchronous>, transform_indices = @transform_2, window_bounds = array<i64: 1, 128>}, {pipeline_mode = #tpu.pipeline_mode<synchronous>, transform_indices = @transform_3, window_bounds = array<i64: 1, 128>}, {transform_indices = @transform_4, window_bounds = array<i64: 128, 128>}]} {
    %c0 = arith.constant 0 : index
    %c0_0 = arith.constant 0 : index
    %0 = vector.load %arg1[%c0, %c0_0] : memref<128x576xbf16, #tpu.memory_space<vmem>>, vector<128x576xbf16>
    %c0_1 = arith.constant 0 : index
    %c0_2 = arith.constant 0 : index
    %1 = vector.load %arg2[%c0_1, %c0_2] : memref<576x128xbf16, #tpu.memory_space<vmem>>, vector<576x128xbf16>
    %cst = arith.constant dense<0.000000e+00> : vector<128x128xf32>
    %2 = tpu.matmul %0, %1, %cst {dimension_numbers = #tpu.dot_dimension_numbers<[1], [0], [0], [1], [0, 0, 1, 1], [], []>} : vector<128x576xbf16>, vector<576x128xbf16>, vector<128x128xf32> -> vector<128x128xf32>
    %c0_3 = arith.constant 0 : index
    %c0_4 = arith.constant 0 : index
    %3 = vector.load %arg3[%c0_3, %c0_4] : memref<1x128xf32, #tpu.memory_space<vmem>>, vector<1x128xf32>
    %4 = vector.broadcast %3 : vector<1x128xf32> to vector<128x128xf32>
    %5 = arith.mulf %2, %4 : vector<128x128xf32>
    %c0_5 = arith.constant 0 : index
    %c0_6 = arith.constant 0 : index
    %6 = vector.load %arg4[%c0_5, %c0_6] : memref<1x128xf32, #tpu.memory_space<vmem>>, vector<1x128xf32>
    %7 = vector.broadcast %6 : vector<1x128xf32> to vector<128x128xf32>
    %8 = arith.addf %5, %7 : vector<128x128xf32>
    %cst_7 = arith.constant 0.000000e+00 : f32
    %9 = vector.broadcast %cst_7 : f32 to vector<128x128xf32>
    %10 = arith.maximumf %8, %9 : vector<128x128xf32>
    %11 = arith.truncf %10 : vector<128x128xf32> to vector<128x128xbf16>
    %c0_8 = arith.constant 0 : index
    %c0_9 = arith.constant 0 : index
    %12 = vector.load %arg5[%c0_8, %c0_9] : memref<128x128xbf16, #tpu.memory_space<vmem>>, vector<128x128xbf16>
    tpu.vector_store %arg5[%c0_8, %c0_9], %11 {strides = array<i32>} : memref<128x128xbf16, #tpu.memory_space<vmem>>, vector<128x128xbf16>,
    return
  }
  func.func @transform_0(%arg0: i32) -> (i32, i32) {
    %c0_i32 = arith.constant 0 : i32
    %c0_i32_0 = arith.constant 0 : i32
    return %arg0, %c0_i32 : i32, i32
  }
  func.func @transform_1(%arg0: i32) -> (i32, i32) {
    %c0_i32 = arith.constant 0 : i32
    %c0_i32_0 = arith.constant 0 : i32
    %c0_i32_1 = arith.constant 0 : i32
    return %c0_i32, %c0_i32_0 : i32, i32
  }
  func.func @transform_2(%arg0: i32) -> (i32, i32) {
    %c0_i32 = arith.constant 0 : i32
    %c0_i32_0 = arith.constant 0 : i32
    %c0_i32_1 = arith.constant 0 : i32
    return %c0_i32, %c0_i32_0 : i32, i32
  }
  func.func @transform_3(%arg0: i32) -> (i32, i32) {
    %c0_i32 = arith.constant 0 : i32
    %c0_i32_0 = arith.constant 0 : i32
    %c0_i32_1 = arith.constant 0 : i32
    return %c0_i32, %c0_i32_0 : i32, i32
  }
  func.func @transform_4(%arg0: i32) -> (i32, i32) {
    %c0_i32 = arith.constant 0 : i32
    %c0_i32_0 = arith.constant 0 : i32
    return %arg0, %c0_i32 : i32, i32
  }
}

module attributes {stable_mosaic.version = 11 : i64} {
  func.func @_conv_bn_kernel(%arg0: i32, %arg1: memref<128x1152xbf16, #tpu.memory_space<vmem>>, %arg2: memref<1152x128xbf16, #tpu.memory_space<vmem>>, %arg3: memref<1x128xf32, #tpu.memory_space<vmem>>, %arg4: memref<1x128xf32, #tpu.memory_space<vmem>>, %arg5: memref<128x64xbf16, #tpu.memory_space<vmem>>, %arg6: memref<64x128xbf16, #tpu.memory_space<vmem>>, %arg7: memref<1x128xf32, #tpu.memory_space<vmem>>, %arg8: memref<1x128xf32, #tpu.memory_space<vmem>>, %arg9: memref<128x128xbf16, #tpu.memory_space<vmem>>) attributes {dimension_semantics = [#tpu.dimension_semantics<parallel>], iteration_bounds = array<i64: 1>, scalar_prefetch = 0 : i64, scratch_operands = 0 : i64, tpu.core_type = #tpu.core_type<tc>, window_params = [{transform_indices = @transform_0, window_bounds = array<i64: 128, 1152>}, {pipeline_mode = #tpu.pipeline_mode<synchronous>, transform_indices = @transform_1, window_bounds = array<i64: 1152, 128>}, {pipeline_mode = #tpu.pipeline_mode<synchronous>, transform_indices = @transform_2, window_bounds = array<i64: 1, 128>}, {pipeline_mode = #tpu.pipeline_mode<synchronous>, transform_indices = @transform_3, window_bounds = array<i64: 1, 128>}, {transform_indices = @transform_4, window_bounds = array<i64: 128, 64>}, {pipeline_mode = #tpu.pipeline_mode<synchronous>, transform_indices = @transform_5, window_bounds = array<i64: 64, 128>}, {pipeline_mode = #tpu.pipeline_mode<synchronous>, transform_indices = @transform_6, window_bounds = array<i64: 1, 128>}, {pipeline_mode = #tpu.pipeline_mode<synchronous>, transform_indices = @transform_7, window_bounds = array<i64: 1, 128>}, {transform_indices = @transform_8, window_bounds = array<i64: 128, 128>}]} {
    %c0 = arith.constant 0 : index
    %c0_0 = arith.constant 0 : index
    %0 = vector.load %arg1[%c0, %c0_0] : memref<128x1152xbf16, #tpu.memory_space<vmem>>, vector<128x1152xbf16>
    %c0_1 = arith.constant 0 : index
    %c0_2 = arith.constant 0 : index
    %1 = vector.load %arg2[%c0_1, %c0_2] : memref<1152x128xbf16, #tpu.memory_space<vmem>>, vector<1152x128xbf16>
    %cst = arith.constant dense<0.000000e+00> : vector<128x128xf32>
    %2 = tpu.matmul %0, %1, %cst {dimension_numbers = #tpu.dot_dimension_numbers<[1], [0], [0], [1], [0, 0, 1, 1], [], []>} : vector<128x1152xbf16>, vector<1152x128xbf16>, vector<128x128xf32> -> vector<128x128xf32>
    %c0_3 = arith.constant 0 : index
    %c0_4 = arith.constant 0 : index
    %3 = vector.load %arg3[%c0_3, %c0_4] : memref<1x128xf32, #tpu.memory_space<vmem>>, vector<1x128xf32>
    %4 = vector.broadcast %3 : vector<1x128xf32> to vector<128x128xf32>
    %5 = arith.mulf %2, %4 : vector<128x128xf32>
    %c0_5 = arith.constant 0 : index
    %c0_6 = arith.constant 0 : index
    %6 = vector.load %arg4[%c0_5, %c0_6] : memref<1x128xf32, #tpu.memory_space<vmem>>, vector<1x128xf32>
    %7 = vector.broadcast %6 : vector<1x128xf32> to vector<128x128xf32>
    %8 = arith.addf %5, %7 : vector<128x128xf32>
    %c0_7 = arith.constant 0 : index
    %c0_8 = arith.constant 0 : index
    %9 = vector.load %arg5[%c0_7, %c0_8] : memref<128x64xbf16, #tpu.memory_space<vmem>>, vector<128x64xbf16>
    %c0_9 = arith.constant 0 : index
    %c0_10 = arith.constant 0 : index
    %10 = vector.load %arg6[%c0_9, %c0_10] : memref<64x128xbf16, #tpu.memory_space<vmem>>, vector<64x128xbf16>
    %cst_11 = arith.constant dense<0.000000e+00> : vector<128x128xf32>
    %11 = tpu.matmul %9, %10, %cst_11 {dimension_numbers = #tpu.dot_dimension_numbers<[1], [0], [0], [1], [0, 0, 1, 1], [], []>} : vector<128x64xbf16>, vector<64x128xbf16>, vector<128x128xf32> -> vector<128x128xf32>
    %c0_12 = arith.constant 0 : index
    %c0_13 = arith.constant 0 : index
    %12 = vector.load %arg7[%c0_12, %c0_13] : memref<1x128xf32, #tpu.memory_space<vmem>>, vector<1x128xf32>
    %13 = vector.broadcast %12 : vector<1x128xf32> to vector<128x128xf32>
    %14 = arith.mulf %11, %13 : vector<128x128xf32>
    %15 = arith.addf %8, %14 : vector<128x128xf32>
    %c0_14 = arith.constant 0 : index
    %c0_15 = arith.constant 0 : index
    %16 = vector.load %arg8[%c0_14, %c0_15] : memref<1x128xf32, #tpu.memory_space<vmem>>, vector<1x128xf32>
    %17 = vector.broadcast %16 : vector<1x128xf32> to vector<128x128xf32>
    %18 = arith.addf %15, %17 : vector<128x128xf32>
    %cst_16 = arith.constant 0.000000e+00 : f32
    %19 = vector.broadcast %cst_16 : f32 to vector<128x128xf32>
    %20 = arith.maximumf %18, %19 : vector<128x128xf32>
    %21 = arith.truncf %20 : vector<128x128xf32> to vector<128x128xbf16>
    %c0_17 = arith.constant 0 : index
    %c0_18 = arith.constant 0 : index
    %22 = vector.load %arg9[%c0_17, %c0_18] : memref<128x128xbf16, #tpu.memory_space<vmem>>, vector<128x128xbf16>
    tpu.vector_store %arg9[%c0_17, %c0_18], %21 {strides = array<i32>} : memref<128x128xbf16, #tpu.memory_space<vmem>>, vector<128x128xbf16>,
    return
  }
  func.func @transform_0(%arg0: i32) -> (i32, i32) {
    %c0_i32 = arith.constant 0 : i32
    %c0_i32_0 = arith.constant 0 : i32
    return %arg0, %c0_i32 : i32, i32
  }
  func.func @transform_1(%arg0: i32) -> (i32, i32) {
    %c0_i32 = arith.constant 0 : i32
    %c0_i32_0 = arith.constant 0 : i32
    %c0_i32_1 = arith.constant 0 : i32
    return %c0_i32, %c0_i32_0 : i32, i32
  }
  func.func @transform_2(%arg0: i32) -> (i32, i32) {
    %c0_i32 = arith.constant 0 : i32
    %c0_i32_0 = arith.constant 0 : i32
    %c0_i32_1 = arith.constant 0 : i32
    return %c0_i32, %c0_i32_0 : i32, i32
  }
  func.func @transform_3(%arg0: i32) -> (i32, i32) {
    %c0_i32 = arith.constant 0 : i32
    %c0_i32_0 = arith.constant 0 : i32
    %c0_i32_1 = arith.constant 0 : i32
    return %c0_i32, %c0_i32_0 : i32, i32
  }
  func.func @transform_4(%arg0: i32) -> (i32, i32) {
    %c0_i32 = arith.constant 0 : i32
    %c0_i32_0 = arith.constant 0 : i32
    return %arg0, %c0_i32 : i32, i32
  }
  func.func @transform_5(%arg0: i32) -> (i32, i32) {
    %c0_i32 = arith.constant 0 : i32
    %c0_i32_0 = arith.constant 0 : i32
    %c0_i32_1 = arith.constant 0 : i32
    return %c0_i32, %c0_i32_0 : i32, i32
  }
  func.func @transform_6(%arg0: i32) -> (i32, i32) {
    %c0_i32 = arith.constant 0 : i32
    %c0_i32_0 = arith.constant 0 : i32
    %c0_i32_1 = arith.constant 0 : i32
    return %c0_i32, %c0_i32_0 : i32, i32
  }
  func.func @transform_7(%arg0: i32) -> (i32, i32) {
    %c0_i32 = arith.constant 0 : i32
    %c0_i32_0 = arith.constant 0 : i32
    %c0_i32_1 = arith.constant 0 : i32
    return %c0_i32, %c0_i32_0 : i32, i32
  }
  func.func @transform_8(%arg0: i32) -> (i32, i32) {
    %c0_i32 = arith.constant 0 : i32
    %c0_i32_0 = arith.constant 0 : i32
    return %arg0, %c0_i32 : i32, i32
  }
}

</mosaic_0001>

<bundles_post_ra>
// kernel: resnet_forward.5
= control target key start
LH: loop header
LB: loop body
LE: loop exit
PB: predicated region body
PF: predicated region fallthrough
CT: control target
= control target key end

     0   :  { %s1292_s15 = smov 0   ;;  %s1568_s0 = inlined_call_operand.vmem [shape: bf16[512,196], index: 0, kind: input, shape index: {}]   ;;  %s1569_s1 = inlined_call_operand.vmem [shape: bf16[196,64], index: 1, kind: input, shape index: {}]   ;;  %s1570_s2 = inlined_call_operand.vmem [shape: f32[1,64], index: 2, kind: input, shape index: {}]   ;;  %s1571_s3 = inlined_call_operand.vmem [shape: f32[1,64], index: 3, kind: input, shape index: {}]   ;;  %s1572_s4 = inlined_call_operand.vmem [shape: bf16[512,64], index: 4, kind: output, shape index: {}]  }
   0x1 LB: > { %s1022_s16 = sadd.s32 4294967295, %s1264_s15   ;;  %p1026_p0 = scmp.ge.s32.totalorder %s1264_s15, 1  ;;  %s1264_s15 = sphi %s1292_s15, %s14_s15  }
   0x2   : > { %p164_p1 = scmp.lt.s32.totalorder %s1264_s15, 3 }
   0x4   : > { %p165_p2 = pnand %p1026_p0, %p164_p1 }
   0x5   : > { %v1197_v0 = vld [vmem:[%s1569_s1] sm:$0xff] (!%p165_p2)   ;;  %v1266_v1 = vmov (!%p165_p2), 0   ;;  %v1198_v2 = vld [vmem:[%s1569_s1 + $0x8] sm:$0xff] (!%p165_p2)   ;;  %s1027_s21 = sshll.u32 (!%p165_p2), %s1022_s16, 5  ;;  %v1199_v3 = vld [vmem:[%s1569_s1 + $0x10] sm:$0xff] (!%p165_p2)   ;;  %vm481_vm0 = vcmask (!%p165_p2), 556032  }
   0x6   : > { %168 = sbr.rel (%p165_p2) target bundleno = 337 (0x151), region = 36  ;;  %534 = vmatprep.subr.bf16.mxu0 (!%p165_p2), %v1266_v1  ;;  %1162 = vmatprep.subr.bf16.mxu1 (!%p165_p2), %v1266_v1  ;;  %p192_p3 = scmp.lt.s32.totalorder (!%p165_p2), %s1027_s21, 63  ;;  %v1200_v4 = vld [vmem:[%s1569_s1 + $0x18] sm:$0xff] (!%p165_p2)   ;;  %v1201_v6 = vld [vmem:[%s1569_s1 + $0x20] sm:$0xff] (!%p165_p2)   ;;  %v1202_v8 = vld [vmem:[%s1569_s1 + $0x28] sm:$0xff] (!%p165_p2)   ;;  %vm530_vm1 = vcmask (!%p165_p2), 1041408  }
   0x7   : > { %535 = vmatpush1.bf16.msra.mxu0 (!%p165_p2), %v1197_v0  ;;  %1175 = vmatpush1.bf16.msra.mxu1 (!%p165_p2), %v1197_v0  ;;  %v1203_v9 = vld [vmem:[%s1569_s1 + $0x30] sm:$0xff] (!%p165_p2)   ;;  %v1204_v10 = vld [vmem:[%s1569_s1 + $0x38] sm:$0xff] (!%p165_p2)   ;;  %v1205_v11 = vld [vmem:[%s1569_s1 + $0x40] sm:$0xff] (!%p165_p2)   ;;  %vm933_vm2 = vcmask (!%p165_p2), 519168  }
   0x8   : > { %536 = vmatprep.subr.bf16.mxu0 (!%p165_p2), %v1266_v1  ;;  %1163 = vmatprep.subr.bf16.mxu1 (!%p165_p2), %v1266_v1  ;;  %v1206_v12 = vld [vmem:[%s1569_s1 + $0x48] sm:$0xff] (!%p165_p2)   ;;  %v1207_v13 = vld [vmem:[%s1569_s1 + $0x50] sm:$0xff] (!%p165_p2)   ;;  %v1208_v14 = vld [vmem:[%s1569_s1 + $0x58] sm:$0xff] (!%p165_p2)  }
   0x9   : > { %v1209_v15 = vld [vmem:[%s1569_s1 + $0x60] ss:$0 sps:$4 sm:$0x33] (!%p165_p2)  }
   0xa   : > { %v532_v16 = vsel (!%p165_p2), %vm530_vm1, %v1209_v15, 0  ;;  %v1424_v47 = vld [vmem:[%s1570_s2] ss:$0 sm:$0xff] (!%p165_p2) }
   0xb   : > { %537 = vmatpush1.bf16.msra.mxu0 (!%p165_p2), %v1198_v2  ;;  %1176 = vmatpush1.bf16.msra.mxu1 (!%p165_p2), %v1198_v2  ;;  %v1429_v49 = vld [vmem:[%s1571_s3] ss:$0 sm:$0xff] (!%p165_p2) }
   0xc   : > { %538 = vmatprep.subr.bf16.mxu0 (!%p165_p2), %v1266_v1  ;;  %1164 = vmatprep.subr.bf16.mxu1 (!%p165_p2), %v1266_v1 }
   0xd   : > { %s1574_s21 = smov (!%p192_p3, %s1027_s21), 63 }
   0xe   : > { %s1129_s24 = sshll.u32 %s1574_s21, 3  ;;  %s1031_s28 = sshll.u32 %s1574_s21, 2 }
   0xf   : > { %539 = vmatpush1.bf16.msra.mxu0 %v1199_v3  ;;  %1177 = vmatpush1.bf16.msra.mxu1 %v1199_v3  ;;  %s1324_s29 = scalar_lea.vmem %s1568_s0, %s1129_s24  ;;  %s1443_s21 = scalar_lea.vmem %s1572_s4, %s1031_s28 }
  0x10   : > { %540 = vmatprep.subr.bf16.mxu0 %v1266_v1  ;;  %1165 = vmatprep.subr.bf16.mxu1 %v1266_v1  ;;  %v1212_v5 = vld [vmem:[%s1324_s29 + $0x4] ss:$8 sps:$4 sm:$0xff]   ;;  %v1210_v17 = vld [vmem:[%s1324_s29] ss:$8 sps:$4 sm:$0xff]   ;;  %v1216_v19 = vld [vmem:[%s1324_s29 + $0x14] ss:$8 sps:$4 sm:$0xff]  }
  0x11   : > { %v1215_v7 = vld [vmem:[%s1324_s29 + $0x84] ss:$8 sps:$4 sm:$0xff]   ;;  %1077 = vmatprep.mubr.msk.bf16.mxu0 %vm481_vm0, %v1212_v5  ;;  %v1213_v18 = vld [vmem:[%s1324_s29 + $0x80] ss:$8 sps:$4 sm:$0xff]   ;;  %v1218_v20 = vld [vmem:[%s1324_s29 + $0x94] ss:$8 sps:$4 sm:$0xff]  }
  0x12   : > { %1085 = vmatprep.mubr.msk.bf16.mxu1 %vm481_vm0, %v1215_v7  ;;  %v1220_v21 = vld [vmem:[%s1324_s29 + $0x10] ss:$8 sps:$4 sm:$0xff]   ;;  %v1222_v23 = vld [vmem:[%s1324_s29 + $0x24] ss:$8 sps:$4 sm:$0xff]   ;;  %v1226_v25 = vld [vmem:[%s1324_s29 + $0x20] ss:$8 sps:$4 sm:$0xff]  }
  0x13   : > { %541 = vmatpush1.bf16.msra.mxu0 %v1200_v4  ;;  %1178 = vmatpush1.bf16.msra.mxu1 %v1200_v4  ;;  %v1221_v22 = vld [vmem:[%s1324_s29 + $0x90] ss:$8 sps:$4 sm:$0xff]   ;;  %v1224_v24 = vld [vmem:[%s1324_s29 + $0xa4] ss:$8 sps:$4 sm:$0xff]   ;;  %v1227_v26 = vld [vmem:[%s1324_s29 + $0xa0] ss:$8 sps:$4 sm:$0xff]  }
  0x14   : > { %542 = vmatprep.subr.bf16.mxu0 %v1266_v1  ;;  %1166 = vmatprep.subr.bf16.mxu1 %v1266_v1  ;;  %v1228_v27 = vld [vmem:[%s1324_s29 + $0x34] ss:$8 sps:$4 sm:$0xff]   ;;  %v1232_v29 = vld [vmem:[%s1324_s29 + $0x30] ss:$8 sps:$4 sm:$0xff]   ;;  %v1234_v31 = vld [vmem:[%s1324_s29 + $0x44] ss:$8 sps:$4 sm:$0xff]  }
  0x15   : > { %v1230_v28 = vld [vmem:[%s1324_s29 + $0xb4] ss:$8 sps:$4 sm:$0xff]   ;;  %v1233_v30 = vld [vmem:[%s1324_s29 + $0xb0] ss:$8 sps:$4 sm:$0xff]   ;;  %v1236_v32 = vld [vmem:[%s1324_s29 + $0xc4] ss:$8 sps:$4 sm:$0xff]  }
  0x16   : > { %v1238_v33 = vld [vmem:[%s1324_s29 + $0x40] ss:$8 sps:$4 sm:$0xff]   ;;  %v1240_v35 = vld [vmem:[%s1324_s29 + $0x54] ss:$8 sps:$4 sm:$0xff]   ;;  %v1244_v37 = vld [vmem:[%s1324_s29 + $0x50] ss:$8 sps:$4 sm:$0xff]  }
  0x17   : > { %543 = vmatpush1.bf16.msra.mxu0 %v1201_v6  ;;  %1179 = vmatpush1.bf16.msra.mxu1 %v1201_v6  ;;  %v1239_v34 = vld [vmem:[%s1324_s29 + $0xc0] ss:$8 sps:$4 sm:$0xff]   ;;  %v1242_v36 = vld [vmem:[%s1324_s29 + $0xd4] ss:$8 sps:$4 sm:$0xff]   ;;  %v1245_v38 = vld [vmem:[%s1324_s29 + $0xd0] ss:$8 sps:$4 sm:$0xff]  }
  0x18   : > { %544 = vmatprep.subr.bf16.mxu0 %v1266_v1  ;;  %1167 = vmatprep.subr.bf16.mxu1 %v1266_v1  ;;  %v1246_v39 = vld [vmem:[%s1324_s29 + $0x64] ss:$8 sps:$4 sm:$0xff]   ;;  %v1250_v41 = vld [vmem:[%s1324_s29 + $0x60] ss:$8 sps:$4 sm:$0xff]   ;;  %v1252_v43 = vld [vmem:[%s1324_s29 + $0x74] ss:$8 sps:$4 sm:$0xff]  }
  0x19   : > { %v1248_v40 = vld [vmem:[%s1324_s29 + $0xe4] ss:$8 sps:$4 sm:$0xff]   ;;  %v1251_v42 = vld [vmem:[%s1324_s29 + $0xe0] ss:$8 sps:$4 sm:$0xff]   ;;  %v1254_v44 = vld [vmem:[%s1324_s29 + $0xf4] ss:$8 sps:$4 sm:$0xff]  }
  0x1a   : > { %v1256_v45 = vld [vmem:[%s1324_s29 + $0x70] ss:$8 sps:$4 sm:$0xff]  }
  0x1b   : > { %545 = vmatpush1.bf16.msra.mxu0 %v1202_v8  ;;  %1180 = vmatpush1.bf16.msra.mxu1 %v1202_v8  ;;  %v1257_v46 = vld [vmem:[%s1324_s29 + $0xf0] ss:$8 sps:$4 sm:$0xff]  }
  0x1c   : > { %546 = vmatprep.subr.bf16.mxu0 %v1266_v1  ;;  %1168 = vmatprep.subr.bf16.mxu1 %v1266_v1 }
  0x1f   : > { %547 = vmatpush1.bf16.msra.mxu0 %v1203_v9  ;;  %1181 = vmatpush1.bf16.msra.mxu1 %v1203_v9 }
  0x20   : > { %548 = vmatprep.subr.bf16.mxu0 %v1266_v1  ;;  %1169 = vmatprep.subr.bf16.mxu1 %v1266_v1 }
  0x23   : > { %549 = vmatpush1.bf16.msra.mxu0 %v1204_v10  ;;  %1182 = vmatpush1.bf16.msra.mxu1 %v1204_v10 }
  0x24   : > { %550 = vmatprep.subr.bf16.mxu0 %v1266_v1  ;;  %1170 = vmatprep.subr.bf16.mxu1 %v1266_v1 }
  0x27   : > { %551 = vmatpush1.bf16.msra.mxu0 %v1205_v11  ;;  %1183 = vmatpush1.bf16.msra.mxu1 %v1205_v11 }
  0x28   : > { %552 = vmatprep.subr.bf16.mxu0 %v1266_v1  ;;  %1171 = vmatprep.subr.bf16.mxu1 %v1266_v1 }
  0x2b   : > { %553 = vmatpush1.bf16.msra.mxu0 %v1206_v12  ;;  %1184 = vmatpush1.bf16.msra.mxu1 %v1206_v12 }
  0x2c   : > { %554 = vmatprep.subr.bf16.mxu0 %v1266_v1  ;;  %1172 = vmatprep.subr.bf16.mxu1 %v1266_v1 }
  0x2f   : > { %555 = vmatpush1.bf16.msra.mxu0 %v1207_v13  ;;  %1185 = vmatpush1.bf16.msra.mxu1 %v1207_v13 }
  0x30   : > { %556 = vmatprep.subr.bf16.mxu0 %v1266_v1  ;;  %1173 = vmatprep.subr.bf16.mxu1 %v1266_v1 }
  0x33   : > { %557 = vmatpush1.bf16.msra.mxu0 %v1208_v14  ;;  %1186 = vmatpush1.bf16.msra.mxu1 %v1208_v14 }
  0x34   : > { %558 = vmatprep.subr.bf16.mxu0 %v1266_v1  ;;  %1174 = vmatprep.subr.bf16.mxu1 %v1266_v1 }
  0x37   : > { %559 = vmatpush1.bf16.msra.mxu0 %v532_v16  ;;  %1187 = vmatpush1.bf16.msra.mxu1 %v532_v16 }
  0x3a   : > { %567 = vmatmul.mubr.bf16.vlgmr.msra.gmra.mrb[0].mxu0 %v1210_v17  ;;  %631 = vmatmul.mubr.bf16.vlgmr.msra.gmra.mrb[0].mxu1 %v1213_v18 }
  0x3b   : > { %1078 = vmatprep.mubr.msk.bf16.mxu0 %vm481_vm0, %v1216_v19  ;;  %1086 = vmatprep.mubr.msk.bf16.mxu1 %vm481_vm0, %v1218_v20 }
  0x42   : > { %575 = vmatmul.mubr.bf16.gmra.mrb[4].mxu0 %v1220_v21  ;;  %639 = vmatmul.mubr.bf16.gmra.mrb[4].mxu1 %v1221_v22 }
  0x43   : > { %1079 = vmatprep.mubr.msk.bf16.mxu0 %vm481_vm0, %v1222_v23  ;;  %1087 = vmatprep.mubr.msk.bf16.mxu1 %vm481_vm0, %v1224_v24 }
  0x4a   : > { %583 = vmatmul.mubr.bf16.gmra.mrb[8].mxu0 %v1226_v25  ;;  %647 = vmatmul.mubr.bf16.gmra.mrb[8].mxu1 %v1227_v26 }
  0x4b   : > { %1080 = vmatprep.mubr.msk.bf16.mxu0 %vm481_vm0, %v1228_v27  ;;  %1088 = vmatprep.mubr.msk.bf16.mxu1 %vm481_vm0, %v1230_v28 }
  0x52   : > { %591 = vmatmul.mubr.bf16.gmra.mrb[12].mxu0 %v1232_v29  ;;  %655 = vmatmul.mubr.bf16.gmra.mrb[12].mxu1 %v1233_v30 }
  0x53   : > { %1081 = vmatprep.mubr.msk.bf16.mxu0 %vm481_vm0, %v1234_v31  ;;  %1089 = vmatprep.mubr.msk.bf16.mxu1 %vm481_vm0, %v1236_v32 }
  0x5a   : > { %599 = vmatmul.mubr.bf16.gmra.mrb[16].mxu0 %v1238_v33  ;;  %663 = vmatmul.mubr.bf16.gmra.mrb[16].mxu1 %v1239_v34 }
  0x5b   : > { %1082 = vmatprep.mubr.msk.bf16.mxu0 %vm481_vm0, %v1240_v35  ;;  %1090 = vmatprep.mubr.msk.bf16.mxu1 %vm481_vm0, %v1242_v36 }
  0x62   : > { %607 = vmatmul.mubr.bf16.gmra.mrb[20].mxu0 %v1244_v37  ;;  %671 = vmatmul.mubr.bf16.gmra.mrb[20].mxu1 %v1245_v38 }
  0x63   : > { %1083 = vmatprep.mubr.msk.bf16.mxu0 %vm481_vm0, %v1246_v39  ;;  %1091 = vmatprep.mubr.msk.bf16.mxu1 %vm481_vm0, %v1248_v40 }
  0x6a   : > { %615 = vmatmul.mubr.bf16.gmra.mrb[24].mxu0 %v1250_v41  ;;  %679 = vmatmul.mubr.bf16.gmra.mrb[24].mxu1 %v1251_v42 }
  0x6b   : > { %1084 = vmatprep.mubr.msk.bf16.mxu0 %vm481_vm0, %v1252_v43  ;;  %1092 = vmatprep.mubr.msk.bf16.mxu1 %vm481_vm0, %v1254_v44 }
  0x72   : > { %623 = vmatmul.mubr.bf16.gmra.mrb[28].mxu0 %v1256_v45  ;;  %687 = vmatmul.mubr.bf16.gmra.mrb[28].mxu1 %v1257_v46 }
 0x10d   : > { %v568_v48 = vpop.f32.mrb[0].mxu0  ;;  %v632_v50 = vpop.f32.mrb[0].mxu1 }
 0x10e   : > { %v702_v51 = vmul.f32 %v1424_v47, %v568_v48  ;;  %v718_v52 = vmul.f32 %v1424_v47, %v632_v50  ;;  %v570_v53 = vpop.f32.mrb[1].mxu0  ;;  %v634_v54 = vpop.f32.mrb[1].mxu1 }
 0x10f   : > { %v571_v55 = vpop.f32.mrb[2].mxu0  ;;  %v635_v56 = vpop.f32.mrb[2].mxu1 }
 0x110   : > { %v741_v57 = vadd.f32 %v1429_v49, %v702_v51  ;;  %v757_v58 = vadd.f32 %v1429_v49, %v718_v52  ;;  %v703_v59 = vmul.f32 %v1424_v47, %v571_v55  ;;  %v719_v60 = vmul.f32 %v1424_v47, %v635_v56  ;;  %v573_v61 = vpop.f32.mrb[3].mxu0  ;;  %v637_v62 = vpop.f32.mrb[3].mxu1 }
 0x112   : > { %v773_v63 = vmax.f32 %v741_v57, 0.0  ;;  %v789_v0 = vmax.f32 %v757_v58, 0.0  ;;  %v742_v1 = vadd.f32 %v1429_v49, %v703_v59  ;;  %v758_v2 = vadd.f32 %v1429_v49, %v719_v60 }
 0x114   : > { %v1130_v3 = vpack.c.bf16 %v773_v63, %v773_v63  ;;  %v1146_v4 = vpack.c.bf16 %v789_v0, %v789_v0  ;;  %v774_v5 = vmax.f32 %v742_v1, 0.0  ;;  %v790_v6 = vmax.f32 %v758_v2, 0.0 }
 0x115   : > { %v576_v7 = vpop.f32.mrb[4].mxu0  ;;  %v640_v8 = vpop.f32.mrb[4].mxu1 }
 0x116   : > { %934 = vst.msk [vmem:[%s1443_s21] sm:$0xf] %vm933_vm2, %v1130_v3  ;;  %950 = vst.msk [vmem:[%s1443_s21 + $0x40] sm:$0xf] %vm933_vm2, %v1146_v4  ;;  %v1131_v9 = vpack.c.bf16 %v774_v5, %v774_v5  ;;  %v1147_v10 = vpack.c.bf16 %v790_v6, %v790_v6  ;;  %v704_v11 = vmul.f32 %v1424_v47, %v576_v7  ;;  %v578_v13 = vpop.f32.mrb[5].mxu0  ;;  %v642_v14 = vpop.f32.mrb[5].mxu1 }
 0x117   : > { %v720_v12 = vmul.f32 %v1424_v47, %v640_v8  ;;  %v579_v15 = vpop.f32.mrb[6].mxu0  ;;  %v643_v16 = vpop.f32.mrb[6].mxu1 }
 0x118   : > { %935 = vst.msk [vmem:[%s1443_s21 + $0x4] sm:$0xf] %vm933_vm2, %v1131_v9  ;;  %951 = vst.msk [vmem:[%s1443_s21 + $0x44] sm:$0xf] %vm933_vm2, %v1147_v10  ;;  %v743_v17 = vadd.f32 %v1429_v49, %v704_v11  ;;  %v705_v19 = vmul.f32 %v1424_v47, %v579_v15  ;;  %v721_v20 = vmul.f32 %v1424_v47, %v643_v16  ;;  %v581_v21 = vpop.f32.mrb[7].mxu0  ;;  %v645_v22 = vpop.f32.mrb[7].mxu1 }
 0x119   : > { %v759_v18 = vadd.f32 %v1429_v49, %v720_v12 }
 0x11a   : > { %v775_v23 = vmax.f32 %v743_v17, 0.0  ;;  %v744_v25 = vadd.f32 %v1429_v49, %v705_v19  ;;  %v760_v26 = vadd.f32 %v1429_v49, %v721_v20 }
 0x11b   : > { %v791_v24 = vmax.f32 %v759_v18, 0.0 }
 0x11c   : > { %v1132_v27 = vpack.c.bf16 %v775_v23, %v775_v23  ;;  %v776_v29 = vmax.f32 %v744_v25, 0.0  ;;  %v792_v30 = vmax.f32 %v760_v26, 0.0 }
 0x11d   : > { %v1148_v28 = vpack.c.bf16 %v791_v24, %v791_v24  ;;  %v584_v31 = vpop.f32.mrb[8].mxu0  ;;  %v648_v32 = vpop.f32.mrb[8].mxu1 }
 0x11e   : > { %936 = vst.msk [vmem:[%s1443_s21 + $0x8] sm:$0xf] %vm933_vm2, %v1132_v27  ;;  %v1133_v33 = vpack.c.bf16 %v776_v29, %v776_v29  ;;  %v1149_v34 = vpack.c.bf16 %v792_v30, %v792_v30  ;;  %v706_v35 = vmul.f32 %v1424_v47, %v584_v31  ;;  %v722_v36 = vmul.f32 %v1424_v47, %v648_v32  ;;  %v586_v37 = vpop.f32.mrb[9].mxu0  ;;  %v650_v38 = vpop.f32.mrb[9].mxu1 }
 0x11f   : > { %952 = vst.msk [vmem:[%s1443_s21 + $0x48] sm:$0xf] %vm933_vm2, %v1148_v28  ;;  %v587_v39 = vpop.f32.mrb[10].mxu0  ;;  %v651_v40 = vpop.f32.mrb[10].mxu1 }
 0x120   : > { %937 = vst.msk [vmem:[%s1443_s21 + $0xc] sm:$0xf] %vm933_vm2, %v1133_v33  ;;  %953 = vst.msk [vmem:[%s1443_s21 + $0x4c] sm:$0xf] %vm933_vm2, %v1149_v34  ;;  %v745_v41 = vadd.f32 %v1429_v49, %v706_v35  ;;  %v761_v42 = vadd.f32 %v1429_v49, %v722_v36  ;;  %v707_v43 = vmul.f32 %v1424_v47, %v587_v39  ;;  %v589_v45 = vpop.f32.mrb[11].mxu0  ;;  %v653_v46 = vpop.f32.mrb[11].mxu1 }
 0x121   : > { %v723_v44 = vmul.f32 %v1424_v47, %v651_v40 }
 0x122   : > { %v777_v48 = vmax.f32 %v745_v41, 0.0  ;;  %v793_v50 = vmax.f32 %v761_v42, 0.0  ;;  %v746_v51 = vadd.f32 %v1429_v49, %v707_v43 }
 0x123   : > { %v762_v52 = vadd.f32 %v1429_v49, %v723_v44 }
 0x124   : > { %v1134_v53 = vpack.c.bf16 %v777_v48, %v777_v48  ;;  %v1150_v54 = vpack.c.bf16 %v793_v50, %v793_v50  ;;  %v778_v55 = vmax.f32 %v746_v51, 0.0 }
 0x125   : > { %v794_v56 = vmax.f32 %v762_v52, 0.0  ;;  %v592_v57 = vpop.f32.mrb[12].mxu0  ;;  %v656_v58 = vpop.f32.mrb[12].mxu1 }
 0x126   : > { %938 = vst.msk [vmem:[%s1443_s21 + $0x10] sm:$0xf] %vm933_vm2, %v1134_v53  ;;  %954 = vst.msk [vmem:[%s1443_s21 + $0x50] sm:$0xf] %vm933_vm2, %v1150_v54  ;;  %v1135_v59 = vpack.c.bf16 %v778_v55, %v778_v55  ;;  %v708_v61 = vmul.f32 %v1424_v47, %v592_v57  ;;  %v724_v62 = vmul.f32 %v1424_v47, %v656_v58  ;;  %v594_v63 = vpop.f32.mrb[13].mxu0  ;;  %v658_v0 = vpop.f32.mrb[13].mxu1 }
 0x127   : > { %v1151_v60 = vpack.c.bf16 %v794_v56, %v794_v56  ;;  %v595_v1 = vpop.f32.mrb[14].mxu0  ;;  %v659_v2 = vpop.f32.mrb[14].mxu1 }
 0x128   : > { %939 = vst.msk [vmem:[%s1443_s21 + $0x14] sm:$0xf] %vm933_vm2, %v1135_v59  ;;  %v747_v3 = vadd.f32 %v1429_v49, %v708_v61  ;;  %v763_v4 = vadd.f32 %v1429_v49, %v724_v62  ;;  %v709_v5 = vmul.f32 %v1424_v47, %v595_v1  ;;  %v725_v6 = vmul.f32 %v1424_v47, %v659_v2  ;;  %v597_v7 = vpop.f32.mrb[15].mxu0  ;;  %v661_v8 = vpop.f32.mrb[15].mxu1 }
 0x129   : > { %955 = vst.msk [vmem:[%s1443_s21 + $0x54] sm:$0xf] %vm933_vm2, %v1151_v60 }
 0x12a   : > { %v779_v9 = vmax.f32 %v747_v3, 0.0  ;;  %v795_v10 = vmax.f32 %v763_v4, 0.0  ;;  %v748_v11 = vadd.f32 %v1429_v49, %v709_v5  ;;  %v764_v12 = vadd.f32 %v1429_v49, %v725_v6 }
 0x12c   : > { %v1136_v13 = vpack.c.bf16 %v779_v9, %v779_v9  ;;  %v1152_v14 = vpack.c.bf16 %v795_v10, %v795_v10  ;;  %v780_v15 = vmax.f32 %v748_v11, 0.0  ;;  %v796_v16 = vmax.f32 %v764_v12, 0.0 }
 0x12d   : > { %v600_v17 = vpop.f32.mrb[16].mxu0  ;;  %v664_v18 = vpop.f32.mrb[16].mxu1 }
 0x12e   : > { %940 = vst.msk [vmem:[%s1443_s21 + $0x18] sm:$0xf] %vm933_vm2, %v1136_v13  ;;  %956 = vst.msk [vmem:[%s1443_s21 + $0x58] sm:$0xf] %vm933_vm2, %v1152_v14  ;;  %v1137_v19 = vpack.c.bf16 %v780_v15, %v780_v15  ;;  %v1153_v20 = vpack.c.bf16 %v796_v16, %v796_v16  ;;  %v710_v21 = vmul.f32 %v1424_v47, %v600_v17  ;;  %v602_v23 = vpop.f32.mrb[17].mxu0  ;;  %v666_v24 = vpop.f32.mrb[17].mxu1 }
 0x12f   : > { %v726_v22 = vmul.f32 %v1424_v47, %v664_v18  ;;  %v603_v25 = vpop.f32.mrb[18].mxu0  ;;  %v667_v26 = vpop.f32.mrb[18].mxu1 }
 0x130   : > { %941 = vst.msk [vmem:[%s1443_s21 + $0x1c] sm:$0xf] %vm933_vm2, %v1137_v19  ;;  %957 = vst.msk [vmem:[%s1443_s21 + $0x5c] sm:$0xf] %vm933_vm2, %v1153_v20  ;;  %v749_v27 = vadd.f32 %v1429_v49, %v710_v21  ;;  %v711_v29 = vmul.f32 %v1424_v47, %v603_v25  ;;  %v727_v30 = vmul.f32 %v1424_v47, %v667_v26  ;;  %v605_v31 = vpop.f32.mrb[19].mxu0  ;;  %v669_v32 = vpop.f32.mrb[19].mxu1 }
 0x131   : > { %v765_v28 = vadd.f32 %v1429_v49, %v726_v22 }
 0x132   : > { %v781_v33 = vmax.f32 %v749_v27, 0.0  ;;  %v750_v35 = vadd.f32 %v1429_v49, %v711_v29  ;;  %v766_v36 = vadd.f32 %v1429_v49, %v727_v30 }
 0x133   : > { %v797_v34 = vmax.f32 %v765_v28, 0.0 }
 0x134   : > { %v1138_v37 = vpack.c.bf16 %v781_v33, %v781_v33  ;;  %v782_v39 = vmax.f32 %v750_v35, 0.0  ;;  %v798_v40 = vmax.f32 %v766_v36, 0.0 }
 0x135   : > { %v1154_v38 = vpack.c.bf16 %v797_v34, %v797_v34  ;;  %v608_v41 = vpop.f32.mrb[20].mxu0  ;;  %v672_v42 = vpop.f32.mrb[20].mxu1 }
 0x136   : > { %942 = vst.msk [vmem:[%s1443_s21 + $0x20] sm:$0xf] %vm933_vm2, %v1138_v37  ;;  %v1139_v43 = vpack.c.bf16 %v782_v39, %v782_v39  ;;  %v1155_v44 = vpack.c.bf16 %v798_v40, %v798_v40  ;;  %v712_v45 = vmul.f32 %v1424_v47, %v608_v41  ;;  %v728_v46 = vmul.f32 %v1424_v47, %v672_v42  ;;  %v610_v48 = vpop.f32.mrb[21].mxu0  ;;  %v674_v50 = vpop.f32.mrb[21].mxu1 }
 0x137   : > { %958 = vst.msk [vmem:[%s1443_s21 + $0x60] sm:$0xf] %vm933_vm2, %v1154_v38  ;;  %v611_v51 = vpop.f32.mrb[22].mxu0  ;;  %v675_v52 = vpop.f32.mrb[22].mxu1 }
 0x138   : > { %943 = vst.msk [vmem:[%s1443_s21 + $0x24] sm:$0xf] %vm933_vm2, %v1139_v43  ;;  %959 = vst.msk [vmem:[%s1443_s21 + $0x64] sm:$0xf] %vm933_vm2, %v1155_v44  ;;  %v751_v53 = vadd.f32 %v1429_v49, %v712_v45  ;;  %v767_v54 = vadd.f32 %v1429_v49, %v728_v46  ;;  %v713_v55 = vmul.f32 %v1424_v47, %v611_v51  ;;  %v613_v57 = vpop.f32.mrb[23].mxu0  ;;  %v677_v58 = vpop.f32.mrb[23].mxu1 }
 0x139   : > { %v729_v56 = vmul.f32 %v1424_v47, %v675_v52 }
 0x13a   : > { %v783_v59 = vmax.f32 %v751_v53, 0.0  ;;  %v799_v60 = vmax.f32 %v767_v54, 0.0  ;;  %v752_v61 = vadd.f32 %v1429_v49, %v713_v55 }
 0x13b   : > { %v768_v62 = vadd.f32 %v1429_v49, %v729_v56 }
 0x13c   : > { %v1140_v63 = vpack.c.bf16 %v783_v59, %v783_v59  ;;  %v1156_v0 = vpack.c.bf16 %v799_v60, %v799_v60  ;;  %v784_v1 = vmax.f32 %v752_v61, 0.0 }
 0x13d   : > { %v800_v2 = vmax.f32 %v768_v62, 0.0  ;;  %v616_v3 = vpop.f32.mrb[24].mxu0  ;;  %v680_v4 = vpop.f32.mrb[24].mxu1 }
 0x13e   : > { %944 = vst.msk [vmem:[%s1443_s21 + $0x28] sm:$0xf] %vm933_vm2, %v1140_v63  ;;  %960 = vst.msk [vmem:[%s1443_s21 + $0x68] sm:$0xf] %vm933_vm2, %v1156_v0  ;;  %v1141_v5 = vpack.c.bf16 %v784_v1, %v784_v1  ;;  %v714_v7 = vmul.f32 %v1424_v47, %v616_v3  ;;  %v730_v8 = vmul.f32 %v1424_v47, %v680_v4  ;;  %v618_v9 = vpop.f32.mrb[25].mxu0  ;;  %v682_v10 = vpop.f32.mrb[25].mxu1 }
 0x13f   : > { %v1157_v6 = vpack.c.bf16 %v800_v2, %v800_v2  ;;  %v619_v11 = vpop.f32.mrb[26].mxu0  ;;  %v683_v12 = vpop.f32.mrb[26].mxu1 }
 0x140   : > { %945 = vst.msk [vmem:[%s1443_s21 + $0x2c] sm:$0xf] %vm933_vm2, %v1141_v5  ;;  %v753_v13 = vadd.f32 %v1429_v49, %v714_v7  ;;  %v769_v14 = vadd.f32 %v1429_v49, %v730_v8  ;;  %v715_v15 = vmul.f32 %v1424_v47, %v619_v11  ;;  %v731_v16 = vmul.f32 %v1424_v47, %v683_v12  ;;  %v621_v17 = vpop.f32.mrb[27].mxu0  ;;  %v685_v18 = vpop.f32.mrb[27].mxu1 }
 0x141   : > { %961 = vst.msk [vmem:[%s1443_s21 + $0x6c] sm:$0xf] %vm933_vm2, %v1157_v6 }
 0x142   : > { %v785_v19 = vmax.f32 %v753_v13, 0.0  ;;  %v801_v20 = vmax.f32 %v769_v14, 0.0  ;;  %v754_v21 = vadd.f32 %v1429_v49, %v715_v15  ;;  %v770_v22 = vadd.f32 %v1429_v49, %v731_v16 }
 0x144   : > { %v1142_v23 = vpack.c.bf16 %v785_v19, %v785_v19  ;;  %v1158_v24 = vpack.c.bf16 %v801_v20, %v801_v20  ;;  %v786_v25 = vmax.f32 %v754_v21, 0.0  ;;  %v802_v26 = vmax.f32 %v770_v22, 0.0 }
 0x145   : > { %v624_v27 = vpop.f32.mrb[28].mxu0  ;;  %v688_v28 = vpop.f32.mrb[28].mxu1 }
 0x146   : > { %946 = vst.msk [vmem:[%s1443_s21 + $0x30] sm:$0xf] %vm933_vm2, %v1142_v23  ;;  %962 = vst.msk [vmem:[%s1443_s21 + $0x70] sm:$0xf] %vm933_vm2, %v1158_v24  ;;  %v1143_v29 = vpack.c.bf16 %v786_v25, %v786_v25  ;;  %v1159_v30 = vpack.c.bf16 %v802_v26, %v802_v26  ;;  %v716_v31 = vmul.f32 %v1424_v47, %v624_v27  ;;  %v626_v33 = vpop.f32.mrb[29].mxu0  ;;  %v690_v34 = vpop.f32.mrb[29].mxu1 }
 0x147   : > { %v732_v32 = vmul.f32 %v1424_v47, %v688_v28  ;;  %v627_v35 = vpop.f32.mrb[30].mxu0  ;;  %v691_v36 = vpop.f32.mrb[30].mxu1 }
 0x148   : > { %947 = vst.msk [vmem:[%s1443_s21 + $0x34] sm:$0xf] %vm933_vm2, %v1143_v29  ;;  %963 = vst.msk [vmem:[%s1443_s21 + $0x74] sm:$0xf] %vm933_vm2, %v1159_v30  ;;  %v755_v37 = vadd.f32 %v1429_v49, %v716_v31  ;;  %v717_v39 = vmul.f32 %v1424_v47, %v627_v35  ;;  %v733_v40 = vmul.f32 %v1424_v47, %v691_v36  ;;  %v629_v41 = vpop.f32.mrb[31].mxu0  ;;  %v693_v42 = vpop.f32.mrb[31].mxu1 }
 0x149   : > { %v771_v38 = vadd.f32 %v1429_v49, %v732_v32 }
 0x14a   : > { %v787_v43 = vmax.f32 %v755_v37, 0.0  ;;  %v756_v45 = vadd.f32 %v1429_v49, %v717_v39  ;;  %v772_v46 = vadd.f32 %v1429_v49, %v733_v40 }
 0x14b   : > { %v803_v44 = vmax.f32 %v771_v38, 0.0 }
 0x14c   : > { %v1144_v48 = vpack.c.bf16 %v787_v43, %v787_v43  ;;  %v788_v51 = vmax.f32 %v756_v45, 0.0  ;;  %v804_v52 = vmax.f32 %v772_v46, 0.0 }
 0x14d   : > { %v1160_v50 = vpack.c.bf16 %v803_v44, %v803_v44 }
 0x14e   : > { %948 = vst.msk [vmem:[%s1443_s21 + $0x38] sm:$0xf] %vm933_vm2, %v1144_v48  ;;  %v1145_v53 = vpack.c.bf16 %v788_v51, %v788_v51  ;;  %v1161_v54 = vpack.c.bf16 %v804_v52, %v804_v52 }
 0x14f   : > { %964 = vst.msk [vmem:[%s1443_s21 + $0x78] sm:$0xf] %vm933_vm2, %v1160_v50 }
 0x150   : > { %949 = vst.msk [vmem:[%s1443_s21 + $0x3c] sm:$0xf] %vm933_vm2, %v1145_v53  ;;  %965 = vst.msk [vmem:[%s1443_s21 + $0x7c] sm:$0xf] %vm933_vm2, %v1161_v54 }
 0x151 PF: > { %s14_s15 = sadd.s32 1, %s1264_s15  }
 0x152   : > { %p11_p4 = scmp.ge.s32.totalorder %s14_s15, 4  }
 0x154   :  { %13 = sbr.rel (!%p11_p4) target bundleno = 1 (0x1), region = 66 }

// kernel: resnet_forward.6
= control target key start
LH: loop header
LB: loop body
LE: loop exit
PB: predicated region body
PF: predicated region fallthrough
CT: control target
= control target key end

     0   :  { %s2547_s15 = smov 0   ;;  %s3031_s0 = inlined_call_operand.vmem [shape: bf16[512,576], index: 0, kind: input, shape index: {}]   ;;  %s3032_s1 = inlined_call_operand.vmem [shape: bf16[576,64], index: 1, kind: input, shape index: {}]   ;;  %s3033_s2 = inlined_call_operand.vmem [shape: f32[1,64], index: 2, kind: input, shape index: {}]   ;;  %s3034_s3 = inlined_call_operand.vmem [shape: f32[1,64], index: 3, kind: input, shape index: {}]   ;;  %s3035_s4 = inlined_call_operand.vmem [shape: bf16[512,64], index: 4, kind: output, shape index: {}]  }
   0x1 LB: > { %s1848_s16 = sadd.s32 4294967295, %s2520_s15   ;;  %p1852_p0 = scmp.ge.s32.totalorder %s2520_s15, 1  ;;  %s2520_s15 = sphi %s2547_s15, %s14_s15  }
   0x2   : > { %p164_p1 = scmp.lt.s32.totalorder %s2520_s15, 3 }
   0x4   : > { %p165_p2 = pnand %p1852_p0, %p164_p1 }
   0x5   : > { %v2366_v0 = vld [vmem:[%s3032_s1 + $0x40] sm:$0xff] (!%p165_p2)   ;;  %s1853_s19 = sshll.u32 (!%p165_p2), %s1848_s16, 5  ;;  %v2368_v2 = vld [vmem:[%s3032_s1 + $0x48] sm:$0xff] (!%p165_p2)   ;;  %v2370_v4 = vld [vmem:[%s3032_s1 + $0x50] sm:$0xff] (!%p165_p2)   ;;  %vm989_vm0 = vcmask (!%p165_p2), 523264   ;;  %vm1759_vm1 = vcmask (!%p165_p2), 519168  }
   0x6   : > { %168 = sbr.rel (%p165_p2) target bundleno = 420 (0x1a4), region = 36  ;;  %v2367_v1 = vld [vmem:[%s3032_s1] sm:$0xff] (!%p165_p2)   ;;  %2057 = vmatprep.subr.bf16.mxu0 (!%p165_p2), %v2366_v0  ;;  %2341 = vmatprep.subr.bf16.mxu1 (!%p165_p2), %v2366_v0  ;;  %p192_p3 = scmp.lt.s32.totalorder (!%p165_p2), %s1853_s19, 63  ;;  %v2369_v3 = vld [vmem:[%s3032_s1 + $0x8] sm:$0xff] (!%p165_p2)   ;;  %v2371_v5 = vld [vmem:[%s3032_s1 + $0x10] sm:$0xff] (!%p165_p2)  }
   0x7   : > { %2058 = vmatpush3.bf16.msra.mxu0 (!%p165_p2), %v2367_v1  ;;  %2349 = vmatpush3.bf16.msra.mxu1 (!%p165_p2), %v2367_v1  ;;  %v2372_v6 = vld [vmem:[%s3032_s1 + $0x58] sm:$0xff] (!%p165_p2)   ;;  %v2374_v8 = vld [vmem:[%s3032_s1 + $0x60] sm:$0xff] (!%p165_p2)   ;;  %v2376_v10 = vld [vmem:[%s3032_s1 + $0x68] sm:$0xff] (!%p165_p2)  }
   0x8   : > { %2059 = vmatprep.subr.bf16.mxu0 (!%p165_p2), %v2368_v2  ;;  %2342 = vmatprep.subr.bf16.mxu1 (!%p165_p2), %v2368_v2  ;;  %v2373_v7 = vld [vmem:[%s3032_s1 + $0x18] sm:$0xff] (!%p165_p2)   ;;  %v2375_v9 = vld [vmem:[%s3032_s1 + $0x20] sm:$0xff] (!%p165_p2)   ;;  %v2377_v13 = vld [vmem:[%s3032_s1 + $0x28] sm:$0xff] (!%p165_p2)  }
   0x9   : > { %v2378_v14 = vld [vmem:[%s3032_s1 + $0x70] sm:$0xff] (!%p165_p2)   ;;  %v2380_v16 = vld [vmem:[%s3032_s1 + $0x78] sm:$0xff] (!%p165_p2)   ;;  %v2388_v18 = vld [vmem:[%s3032_s1 + $0xc0] sm:$0xff] (!%p165_p2)  }
   0xa   : > { %v2379_v15 = vld [vmem:[%s3032_s1 + $0x30] sm:$0xff] (!%p165_p2)   ;;  %v2381_v17 = vld [vmem:[%s3032_s1 + $0x38] sm:$0xff] (!%p165_p2)   ;;  %v2391_v19 = vld [vmem:[%s3032_s1 + $0x100] sm:$0xff] (!%p165_p2)  }
   0xb   : > { %2060 = vmatpush3.bf16.msra.mxu0 (!%p165_p2), %v2369_v3  ;;  %2350 = vmatpush3.bf16.msra.mxu1 (!%p165_p2), %v2369_v3  ;;  %v2389_v22 = vld [vmem:[%s3032_s1 + $0x80] sm:$0xff] (!%p165_p2)   ;;  %v2390_v23 = vld [vmem:[%s3032_s1 + $0xc8] sm:$0xff] (!%p165_p2)   ;;  %v2399_v28 = vld [vmem:[%s3032_s1 + $0xd0] sm:$0xff] (!%p165_p2)  }
   0xc   : > { %2061 = vmatprep.subr.bf16.mxu0 (!%p165_p2), %v2370_v4  ;;  %2343 = vmatprep.subr.bf16.mxu1 (!%p165_p2), %v2370_v4  ;;  %v2392_v26 = vld [vmem:[%s3032_s1 + $0x88] sm:$0xff] (!%p165_p2)   ;;  %v2400_v30 = vld [vmem:[%s3032_s1 + $0x90] sm:$0xff] (!%p165_p2)   ;;  %v2401_v31 = vld [vmem:[%s3032_s1 + $0xd8] sm:$0xff] (!%p165_p2)  }
   0xd   : > { %s3037_s19 = smov (!%p192_p3, %s1853_s19), 63  ;;  %v2402_v34 = vld [vmem:[%s3032_s1 + $0x98] sm:$0xff]   ;;  %v2422_v35 = vld [vmem:[%s3032_s1 + $0x108] sm:$0xff]   ;;  %v2409_v37 = vld [vmem:[%s3032_s1 + $0xe0] sm:$0xff]  }
   0xe   : > { %s2357_s6 = smul.u32 20, %s3037_s19  ;;  %v2410_v39 = vld [vmem:[%s3032_s1 + $0xa0] sm:$0xff]   ;;  %v2411_v40 = vld [vmem:[%s3032_s1 + $0xe8] sm:$0xff]   ;;  %v2419_v46 = vld [vmem:[%s3032_s1 + $0xf0] sm:$0xff]   ;;  %s1856_s27 = sshll.u32 %s3037_s19, 2 }
   0xf   : > { %2062 = vmatpush3.bf16.msra.mxu0 %v2371_v5  ;;  %2351 = vmatpush3.bf16.msra.mxu1 %v2371_v5  ;;  %v2412_v43 = vld [vmem:[%s3032_s1 + $0xa8] sm:$0xff]   ;;  %v2442_v47 = vld [vmem:[%s3032_s1 + $0x110] sm:$0xff]   ;;  %v2421_v49 = vld [vmem:[%s3032_s1 + $0xf8] sm:$0xff]   ;;  %s2862_s30 = scalar_lea.vmem %s3035_s4, %s1856_s27 }
  0x10   : > { %2063 = vmatprep.subr.bf16.mxu0 %v2372_v6  ;;  %2344 = vmatprep.subr.bf16.mxu1 %v2372_v6  ;;  %s2588_s13 = scalar_lea.vmem %s3031_s0, %s2357_s6  ;;  %v2420_v48 = vld [vmem:[%s3032_s1 + $0xb0] sm:$0xff]   ;;  %v2423_v52 = vld [vmem:[%s3032_s1 + $0xb8] sm:$0xff]  }
  0x11   : > { %v2384_v11 = vld [vmem:[%s2588_s13 + $0x4] ss:$20 sps:$4 sm:$0xff]   ;;  %v2382_v20 = vld [vmem:[%s2588_s13] ss:$20 sps:$4 sm:$0xff]   ;;  %v2397_v27 = vld [vmem:[%s2588_s13 + $0x28] ss:$20 sps:$4 sm:$0xff]  }
  0x12   : > { %v2387_v12 = vld [vmem:[%s2588_s13 + $0x1e4] ss:$20 sps:$4 sm:$0xff]   ;;  %1070 = vmatprep.mubr.bf16.mxu0 %v2384_v11  ;;  %v2385_v21 = vld [vmem:[%s2588_s13 + $0x1e0] ss:$20 sps:$4 sm:$0xff]   ;;  %v2398_v29 = vld [vmem:[%s2588_s13 + $0x208] ss:$20 sps:$4 sm:$0xff]  }
  0x13   : > { %2064 = vmatpush3.bf16.msra.mxu0 %v2373_v7  ;;  %2352 = vmatpush3.bf16.msra.mxu1 %v2373_v7  ;;  %v2393_v24 = vld [vmem:[%s2588_s13 + $0x2c] ss:$20 sps:$4 sm:$0xff]   ;;  %v2403_v32 = vld [vmem:[%s2588_s13 + $0x54] ss:$20 sps:$4 sm:$0xff]   ;;  %v2407_v36 = vld [vmem:[%s2588_s13 + $0x50] ss:$20 sps:$4 sm:$0xff]  }
  0x14   : > { %2065 = vmatprep.subr.bf16.mxu0 %v2374_v8  ;;  %2345 = vmatprep.subr.bf16.mxu1 %v2374_v8  ;;  %v2395_v25 = vld [vmem:[%s2588_s13 + $0x20c] ss:$20 sps:$4 sm:$0xff]   ;;  %v2405_v33 = vld [vmem:[%s2588_s13 + $0x234] ss:$20 sps:$4 sm:$0xff]   ;;  %v2408_v38 = vld [vmem:[%s2588_s13 + $0x230] ss:$20 sps:$4 sm:$0xff]  }
  0x15   : > { %1166 = vmatprep.mubr.bf16.mxu1 %v2387_v12  ;;  %v2413_v41 = vld [vmem:[%s2588_s13 + $0x7c] ss:$20 sps:$4 sm:$0xff]   ;;  %v2417_v44 = vld [vmem:[%s2588_s13 + $0x78] ss:$20 sps:$4 sm:$0xff]   ;;  %v2429_v54 = vld [vmem:[%s2588_s13 + $0xa0] ss:$20 sps:$4 sm:$0xff]  }
  0x16   : > { %v2415_v42 = vld [vmem:[%s2588_s13 + $0x25c] ss:$20 sps:$4 sm:$0xff]   ;;  %v2418_v45 = vld [vmem:[%s2588_s13 + $0x258] ss:$20 sps:$4 sm:$0xff]   ;;  %v2432_v57 = vld [vmem:[%s2588_s13 + $0x34] ss:$20 sps:$4 sm:$0xff]  }
  0x17   : > { %2066 = vmatpush3.bf16.msra.mxu0 %v2375_v9  ;;  %2353 = vmatpush3.bf16.msra.mxu1 %v2375_v9  ;;  %v2424_v50 = vld [vmem:[%s2588_s13 + $0xa4] ss:$20 sps:$4 sm:$0xff]   ;;  %v2428_v51 = vld [vmem:[%s2588_s13 + $0xc] ss:$20 sps:$4 sm:$0xff]   ;;  %v2426_v53 = vld [vmem:[%s2588_s13 + $0x8] ss:$20 sps:$4 sm:$0xff]  }
  0x18   : > { %2067 = vmatprep.subr.bf16.mxu0 %v2376_v10  ;;  %2346 = vmatprep.subr.bf16.mxu1 %v2376_v10  ;;  %v2430_v55 = vld [vmem:[%s2588_s13 + $0xcc] ss:$20 sps:$4 sm:$0xff]   ;;  %v2461_v56 = vld [vmem:[%s3032_s1 + $0x118] sm:$0xff]   ;;  %v2435_v59 = vld [vmem:[%s2588_s13 + $0x30] ss:$20 sps:$4 sm:$0xff]  }
  0x19   : > { %v2434_v58 = vld [vmem:[%s2588_s13 + $0xc8] ss:$20 sps:$4 sm:$0xff]   ;;  %v2440_v62 = vld [vmem:[%s2588_s13 + $0xf0] ss:$20 sps:$4 sm:$0xff]   ;;  %v2441_v63 = vld [vmem:[%s2588_s13 + $0x58] ss:$20 sps:$4 sm:$0xff]  }
  0x1a   : > { %v2436_v60 = vld [vmem:[%s2588_s13 + $0xf4] ss:$20 sps:$4 sm:$0xff]   ;;  %v2438_v61 = vld [vmem:[%s2588_s13 + $0x5c] ss:$20 sps:$4 sm:$0xff]   ;;  %v2445_v1 = vld [vmem:[%s2588_s13 + $0x84] ss:$20 sps:$4 sm:$0xff]  }
  0x1b   : > { %2068 = vmatpush3.bf16.msra.mxu0 %v2377_v13  ;;  %2354 = vmatpush3.bf16.msra.mxu1 %v2377_v13  ;;  %v2443_v0 = vld [vmem:[%s2588_s13 + $0x11c] ss:$20 sps:$4 sm:$0xff]   ;;  %v2447_v2 = vld [vmem:[%s2588_s13 + $0x118] ss:$20 sps:$4 sm:$0xff]   ;;  %v2448_v3 = vld [vmem:[%s2588_s13 + $0x80] ss:$20 sps:$4 sm:$0xff]  }
  0x1c   : > { %2069 = vmatprep.subr.bf16.mxu0 %v2378_v14  ;;  %2347 = vmatprep.subr.bf16.mxu1 %v2378_v14  ;;  %v2449_v4 = vld [vmem:[%s2588_s13 + $0x144] ss:$20 sps:$4 sm:$0xff]   ;;  %v2451_v5 = vld [vmem:[%s2588_s13 + $0xac] ss:$20 sps:$4 sm:$0xff]   ;;  %v2454_v7 = vld [vmem:[%s2588_s13 + $0xa8] ss:$20 sps:$4 sm:$0xff]  }
  0x1d   : > { %v2453_v6 = vld [vmem:[%s2588_s13 + $0x140] ss:$20 sps:$4 sm:$0xff]   ;;  %v2459_v10 = vld [vmem:[%s2588_s13 + $0x168] ss:$20 sps:$4 sm:$0xff]   ;;  %v2460_v11 = vld [vmem:[%s2588_s13 + $0xd0] ss:$20 sps:$4 sm:$0xff]  }
  0x1e   : > { %v2455_v8 = vld [vmem:[%s2588_s13 + $0x16c] ss:$20 sps:$4 sm:$0xff]   ;;  %v2457_v9 = vld [vmem:[%s2588_s13 + $0xd4] ss:$20 sps:$4 sm:$0xff]   ;;  %v2464_v13 = vld [vmem:[%s2588_s13 + $0xfc] ss:$20 sps:$4 sm:$0xff]  }
  0x1f   : > { %2070 = vmatpush3.bf16.msra.mxu0 %v2379_v15  ;;  %2355 = vmatpush3.bf16.msra.mxu1 %v2379_v15  ;;  %v2462_v12 = vld [vmem:[%s2588_s13 + $0x194] ss:$20 sps:$4 sm:$0xff]   ;;  %v2466_v14 = vld [vmem:[%s2588_s13 + $0x190] ss:$20 sps:$4 sm:$0xff]   ;;  %v2467_v15 = vld [vmem:[%s2588_s13 + $0xf8] ss:$20 sps:$4 sm:$0xff]  }
  0x20   : > { %2071 = vmatprep.subr.bf16.mxu0 %v2380_v16  ;;  %2348 = vmatprep.subr.bf16.mxu1 %v2380_v16  ;;  %v2468_v16 = vld [vmem:[%s2588_s13 + $0x1bc] ss:$20 sps:$4 sm:$0xff]  }
  0x23   : > { %2072 = vmatpush3.bf16.msra.mxu0 %v2381_v17  ;;  %2356 = vmatpush3.bf16.msra.mxu1 %v2381_v17  ;;  %v2470_v17 = vld [vmem:[%s2588_s13 + $0x124] ss:$20 sps:$4 sm:$0xff]  }
  0x24   : > { %2169 = vmatprep.subr.bf16.mxu1 %v2388_v18  ;;  %2301 = vmatprep.subr.bf16.mxu0 %v2391_v19  ;;  %v2472_v18 = vld [vmem:[%s2588_s13 + $0x1b8] ss:$20 sps:$4 sm:$0xff]  }
  0x26   : > { %1071 = vmatmul.mubr.bf16.vlgmr.msra.gmra.mrb[0].mxu0 %v2382_v20  ;;  %1167 = vmatmul.mubr.bf16.vlgmr.msra.gmra.mrb[0].mxu1 %v2385_v21  ;;  %v2474_v20 = vld [vmem:[%s2588_s13 + $0x14c] ss:$20 sps:$4 sm:$0xff]   ;;  %v2476_v21 = vld [vmem:[%s2588_s13 + $0x10] ss:$20 sps:$4 sm:$0xff]  }
  0x27   : > { %2170 = vmatpush3.bf16.msra.mxu1 %v2389_v22  ;;  %2302 = vmatpush3.bf16.msra.mxu0 %v2391_v19  ;;  %v2473_v19 = vld [vmem:[%s2588_s13 + $0x120] ss:$20 sps:$4 sm:$0xff]   ;;  %v2477_v22 = vld [vmem:[%s2588_s13 + $0x148] ss:$20 sps:$4 sm:$0xff]  }
  0x28   : > { %2171 = vmatprep.subr.bf16.mxu1 %v2390_v23  ;;  %1078 = vmatprep.mubr.bf16.mxu0 %v2393_v24  ;;  %v2478_v23 = vld [vmem:[%s2588_s13 + $0x38] ss:$20 sps:$4 sm:$0xff]   ;;  %v2479_v24 = vld [vmem:[%s2588_s13 + $0x174] ss:$20 sps:$4 sm:$0xff]  }
  0x29   : > { %1174 = vmatprep.mubr.bf16.mxu1 %v2395_v25  ;;  %2303 = vmatprep.subr.bf16.mxu0 %v2422_v35  ;;  %v2481_v25 = vld [vmem:[%s2588_s13 + $0x60] ss:$20 sps:$4 sm:$0xff]  }
  0x2b   : > { %2172 = vmatpush3.bf16.msra.mxu1 %v2392_v26  ;;  %2304 = vmatpush3.bf16.msra.mxu0 %v2422_v35  ;;  %v2482_v26 = vld [vmem:[%s2588_s13 + $0x170] ss:$20 sps:$4 sm:$0xff]   ;;  %v2493_v35 = vld [vmem:[%s2588_s13 + $0x128] ss:$20 sps:$4 sm:$0xff]  }
  0x2c   : > { %2173 = vmatprep.subr.bf16.mxu1 %v2399_v28  ;;  %2305 = vmatprep.subr.bf16.mxu0 %v2442_v47  ;;  %v2484_v28 = vld [vmem:[%s2588_s13 + $0x19c] ss:$20 sps:$4 sm:$0xff]  }
  0x2e   : > { %1079 = vmatmul.mubr.bf16.gmra.mrb[4].mxu0 %v2397_v27  ;;  %1175 = vmatmul.mubr.bf16.gmra.mrb[4].mxu1 %v2398_v29  ;;  %v2483_v27 = vld [vmem:[%s2588_s13 + $0x88] ss:$20 sps:$4 sm:$0xff]   ;;  %v2486_v29 = vld [vmem:[%s2588_s13 + $0xb0] ss:$20 sps:$4 sm:$0xff]  }
  0x2f   : > { %2174 = vmatpush3.bf16.msra.mxu1 %v2400_v30  ;;  %1086 = vmatprep.mubr.bf16.mxu0 %v2403_v32  ;;  %v2487_v30 = vld [vmem:[%s2588_s13 + $0x198] ss:$20 sps:$4 sm:$0xff]  }
  0x30   : > { %2175 = vmatprep.subr.bf16.mxu1 %v2401_v31  ;;  %1182 = vmatprep.mubr.bf16.mxu1 %v2405_v33  ;;  %v2488_v31 = vld [vmem:[%s2588_s13 + $0xd8] ss:$20 sps:$4 sm:$0xff]   ;;  %v2491_v33 = vld [vmem:[%s2588_s13 + $0x100] ss:$20 sps:$4 sm:$0xff]  }
  0x31   : > { %2306 = vmatpush3.bf16.msra.mxu0 %v2442_v47  ;;  %v2489_v32 = vld [vmem:[%s2588_s13 + $0x1c4] ss:$20 sps:$4 sm:$0xff]  }
  0x32   : > { %2307 = vmatprep.subr.bf16.mxu0 %v2461_v56  ;;  %v2508_v47 = vld [vmem:[%s2588_s13 + $0x218] ss:$20 sps:$4 sm:$0xff]  }
  0x33   : > { %2176 = vmatpush3.bf16.msra.mxu1 %v2402_v34  ;;  %v2492_v34 = vld [vmem:[%s2588_s13 + $0x1c0] ss:$20 sps:$4 sm:$0xff]  }
  0x34   : > { %2177 = vmatprep.subr.bf16.mxu1 %v2409_v37  ;;  %v2496_v37 = vld [vmem:[%s2588_s13 + $0x150] ss:$20 sps:$4 sm:$0xff]  }
  0x35   : > { %2308 = vmatpush3.bf16.msra.mxu0 %v2461_v56 }
  0x36   : > { %1087 = vmatmul.mubr.bf16.gmra.mrb[8].mxu0 %v2407_v36  ;;  %1183 = vmatmul.mubr.bf16.gmra.mrb[8].mxu1 %v2408_v38  ;;  %v2494_v36 = vld [vmem:[%s2588_s13 + $0x1ec] ss:$20 sps:$4 sm:$0xff]   ;;  %v2497_v38 = vld [vmem:[%s2588_s13 + $0x1e8] ss:$20 sps:$4 sm:$0xff]  }
  0x37   : > { %2178 = vmatpush3.bf16.msra.mxu1 %v2410_v39  ;;  %1094 = vmatprep.mubr.bf16.mxu0 %v2413_v41  ;;  %v2498_v39 = vld [vmem:[%s2588_s13 + $0x178] ss:$20 sps:$4 sm:$0xff]   ;;  %v2501_v41 = vld [vmem:[%s2588_s13 + $0x1a0] ss:$20 sps:$4 sm:$0xff]  }
  0x38   : > { %2179 = vmatprep.subr.bf16.mxu1 %v2411_v40  ;;  %1190 = vmatprep.mubr.bf16.mxu1 %v2415_v42  ;;  %v2499_v40 = vld [vmem:[%s2588_s13 + $0x214] ss:$20 sps:$4 sm:$0xff]   ;;  %v2502_v42 = vld [vmem:[%s2588_s13 + $0x210] ss:$20 sps:$4 sm:$0xff]  }
  0x3b   : > { %2180 = vmatpush3.bf16.msra.mxu1 %v2412_v43  ;;  %v2503_v43 = vld [vmem:[%s2588_s13 + $0x1c8] ss:$20 sps:$4 sm:$0xff]  }
  0x3c   : > { %2181 = vmatprep.subr.bf16.mxu1 %v2419_v46  ;;  %v2507_v46 = vld [vmem:[%s2588_s13 + $0x238] ss:$20 sps:$4 sm:$0xff]  }
  0x3e   : > { %1095 = vmatmul.mubr.bf16.gmra.mrb[12].mxu0 %v2417_v44  ;;  %1191 = vmatmul.mubr.bf16.gmra.mrb[12].mxu1 %v2418_v45  ;;  %v2504_v44 = vld [vmem:[%s2588_s13 + $0x23c] ss:$20 sps:$4 sm:$0xff]  }
  0x3f   : > { %2182 = vmatpush3.bf16.msra.mxu1 %v2420_v48  ;;  %1102 = vmatprep.mubr.bf16.mxu0 %v2424_v50  ;;  %v2506_v45 = vld [vmem:[%s2588_s13 + $0x1f0] ss:$20 sps:$4 sm:$0xff]   ;;  %v2512_v50 = vld [vmem:[%s2588_s13 + $0x260] ss:$20 sps:$4 sm:$0xff]  }
  0x40   : > { %2183 = vmatprep.subr.bf16.mxu1 %v2421_v49  ;;  %1231 = vmatprep.mubr.bf16.mxu1 %v2428_v51  ;;  %v2509_v48 = vld [vmem:[%s2588_s13 + $0x264] ss:$20 sps:$4 sm:$0xff]   ;;  %v2511_v49 = vld [vmem:[%s2588_s13 + $0x240] ss:$20 sps:$4 sm:$0xff]   ;;  %v2513_v51 = vld [vmem:[%s2588_s13 + $0x268] ss:$20 sps:$4 sm:$0xff]  }
  0x43   : > { %2184 = vmatpush3.bf16.msra.mxu1 %v2423_v52 }
  0x46   : > { %1103 = vmatmul.mubr.bf16.gmra.mrb[16].mxu0 %v2429_v54  ;;  %1232 = vmatmul.mubr.bf16.vlgmr.msra.gmra.mrb[16].mxu1 %v2426_v53 }
  0x47   : > { %1110 = vmatprep.mubr.bf16.mxu0 %v2430_v55  ;;  %1239 = vmatprep.mubr.bf16.mxu1 %v2432_v57 }
  0x4e   : > { %1111 = vmatmul.mubr.bf16.gmra.mrb[20].mxu0 %v2434_v58  ;;  %1240 = vmatmul.mubr.bf16.gmra.mrb[20].mxu1 %v2435_v59 }
  0x4f   : > { %1118 = vmatprep.mubr.bf16.mxu0 %v2436_v60  ;;  %1247 = vmatprep.mubr.bf16.mxu1 %v2438_v61 }
  0x56   : > { %1119 = vmatmul.mubr.bf16.gmra.mrb[24].mxu0 %v2440_v62  ;;  %1248 = vmatmul.mubr.bf16.gmra.mrb[24].mxu1 %v2441_v63 }
  0x57   : > { %1126 = vmatprep.mubr.bf16.mxu0 %v2443_v0  ;;  %1255 = vmatprep.mubr.bf16.mxu1 %v2445_v1 }
  0x5e   : > { %1127 = vmatmul.mubr.bf16.gmra.mrb[28].mxu0 %v2447_v2  ;;  %1256 = vmatmul.mubr.bf16.gmra.mrb[28].mxu1 %v2448_v3 }
  0x5f   : > { %1134 = vmatprep.mubr.bf16.mxu0 %v2449_v4  ;;  %1263 = vmatprep.mubr.bf16.mxu1 %v2451_v5 }
  0x66   : > { %1135 = vmatmul.mubr.bf16.gmra.mrb[32].mxu0 %v2453_v6  ;;  %1264 = vmatmul.mubr.bf16.gmra.mrb[32].mxu1 %v2454_v7 }
  0x67   : > { %1142 = vmatprep.mubr.bf16.mxu0 %v2455_v8  ;;  %1271 = vmatprep.mubr.bf16.mxu1 %v2457_v9 }
  0x6e   : > { %1143 = vmatmul.mubr.bf16.gmra.mrb[36].mxu0 %v2459_v10  ;;  %1272 = vmatmul.mubr.bf16.gmra.mrb[36].mxu1 %v2460_v11 }
  0x6f   : > { %1150 = vmatprep.mubr.bf16.mxu0 %v2462_v12  ;;  %1279 = vmatprep.mubr.bf16.mxu1 %v2464_v13 }
  0x76   : > { %1151 = vmatmul.mubr.bf16.gmra.mrb[40].mxu0 %v2466_v14  ;;  %1280 = vmatmul.mubr.bf16.gmra.mrb[40].mxu1 %v2467_v15 }
  0x77   : > { %1158 = vmatprep.mubr.bf16.mxu0 %v2468_v16  ;;  %1287 = vmatprep.mubr.bf16.mxu1 %v2470_v17 }
  0x7e   : > { %1159 = vmatmul.mubr.bf16.gmra.mrb[44].mxu0 %v2472_v18  ;;  %1288 = vmatmul.mubr.bf16.gmra.mrb[44].mxu1 %v2473_v19 }
  0x7f   : > { %1295 = vmatprep.mubr.bf16.mxu1 %v2474_v20  ;;  %2309 = vmatprep.mubr.msk.bf16.mxu0 %vm989_vm0, %v2476_v21 }
  0x86   : > { %1296 = vmatmul.mubr.bf16.gmra.mrb[48].mxu1 %v2477_v22  ;;  %2310 = vmatmul.mubr.msk.bf16.vlgmr.msra.gmra.mrb[48].mxu0 %vm989_vm0, %v2478_v23 }
  0x87   : > { %1303 = vmatprep.mubr.bf16.mxu1 %v2479_v24  ;;  %2313 = vmatprep.mubr.msk.bf16.mxu0 %vm989_vm0, %v2481_v25 }
  0x8e   : > { %1304 = vmatmul.mubr.bf16.gmra.mrb[52].mxu1 %v2482_v26  ;;  %2314 = vmatmul.mubr.msk.bf16.gmra.mrb[52].mxu0 %vm989_vm0, %v2483_v27 }
  0x8f   : > { %1311 = vmatprep.mubr.bf16.mxu1 %v2484_v28  ;;  %2317 = vmatprep.mubr.msk.bf16.mxu0 %vm989_vm0, %v2486_v29 }
  0x96   : > { %1312 = vmatmul.mubr.bf16.gmra.mrb[56].mxu1 %v2487_v30  ;;  %2318 = vmatmul.mubr.msk.bf16.gmra.mrb[56].mxu0 %vm989_vm0, %v2488_v31 }
  0x97   : > { %1319 = vmatprep.mubr.bf16.mxu1 %v2489_v32  ;;  %2321 = vmatprep.mubr.msk.bf16.mxu0 %vm989_vm0, %v2491_v33 }
  0x9e   : > { %1320 = vmatmul.mubr.bf16.gmra.mrb[60].mxu1 %v2492_v34  ;;  %2322 = vmatmul.mubr.msk.bf16.gmra.mrb[60].mxu0 %vm989_vm0, %v2493_v35 }
  0x9f   : > { %1327 = vmatprep.mubr.bf16.mxu1 %v2494_v36  ;;  %2325 = vmatprep.mubr.msk.bf16.mxu0 %vm989_vm0, %v2496_v37 }
  0xa6   : > { %1328 = vmatmul.mubr.bf16.gmra.mrb[64].mxu1 %v2497_v38  ;;  %2326 = vmatmul.mubr.msk.bf16.gmra.mrb[64].mxu0 %vm989_vm0, %v2498_v39 }
  0xa7   : > { %1335 = vmatprep.mubr.bf16.mxu1 %v2499_v40  ;;  %2329 = vmatprep.mubr.msk.bf16.mxu0 %vm989_vm0, %v2501_v41 }
  0xae   : > { %1336 = vmatmul.mubr.bf16.gmra.mrb[68].mxu1 %v2502_v42  ;;  %2330 = vmatmul.mubr.msk.bf16.gmra.mrb[68].mxu0 %vm989_vm0, %v2503_v43 }
  0xaf   : > { %1343 = vmatprep.mubr.bf16.mxu1 %v2504_v44  ;;  %2333 = vmatprep.mubr.msk.bf16.mxu0 %vm989_vm0, %v2506_v45 }
  0xb6   : > { %1344 = vmatmul.mubr.bf16.gmra.mrb[72].mxu1 %v2507_v46  ;;  %2334 = vmatmul.mubr.msk.bf16.gmra.mrb[72].mxu0 %vm989_vm0, %v2508_v47 }
  0xb7   : > { %1351 = vmatprep.mubr.bf16.mxu1 %v2509_v48  ;;  %2337 = vmatprep.mubr.msk.bf16.mxu0 %vm989_vm0, %v2511_v49 }
  0xbe   : > { %1352 = vmatmul.mubr.bf16.gmra.mrb[76].mxu1 %v2512_v50  ;;  %2338 = vmatmul.mubr.msk.bf16.gmra.mrb[76].mxu0 %vm989_vm0, %v2513_v51 }
  0xf9   : > { %v2145_v52 = vpop.f32.mrb[0].mxu1  ;;  %v2073_v53 = vpop.f32.mrb[0].mxu0 }
  0xfa   : > { %v2146_v54 = vpop.f32.mrb[1].mxu1  ;;  %v2074_v55 = vpop.f32.mrb[1].mxu0 }
  0xfb   : > { %v2767_v56 = vadd.f32 %v2146_v54, %v2145_v52  ;;  %v2148_v57 = vpop.f32.mrb[2].mxu1  ;;  %v2075_v58 = vadd.f32 %v2074_v55, %v2073_v53  ;;  %v2076_v59 = vpop.f32.mrb[2].mxu0 }
  0xfc   : > { %v2149_v60 = vpop.f32.mrb[3].mxu1  ;;  %v2077_v61 = vpop.f32.mrb[3].mxu0 }
  0xfd   : > { %v2769_v62 = vadd.f32 %v2149_v60, %v2148_v57  ;;  %v2078_v63 = vadd.f32 %v2077_v61, %v2076_v59 }
 0x101   : > { %v2151_v0 = vpop.f32.mrb[4].mxu1  ;;  %v2079_v1 = vpop.f32.mrb[4].mxu0 }
 0x102   : > { %v2152_v2 = vpop.f32.mrb[5].mxu1  ;;  %v2080_v3 = vpop.f32.mrb[5].mxu0 }
 0x103   : > { %v2771_v4 = vadd.f32 %v2152_v2, %v2151_v0  ;;  %v2154_v5 = vpop.f32.mrb[6].mxu1  ;;  %v2081_v6 = vadd.f32 %v2080_v3, %v2079_v1  ;;  %v2082_v7 = vpop.f32.mrb[6].mxu0 }
 0x104   : > { %v2155_v8 = vpop.f32.mrb[7].mxu1  ;;  %v2083_v9 = vpop.f32.mrb[7].mxu0 }
 0x105   : > { %v2773_v10 = vadd.f32 %v2155_v8, %v2154_v5  ;;  %v2084_v11 = vadd.f32 %v2083_v9, %v2082_v7 }
 0x109   : > { %v2157_v12 = vpop.f32.mrb[8].mxu1  ;;  %v2085_v13 = vpop.f32.mrb[8].mxu0 }
 0x10a   : > { %v2158_v14 = vpop.f32.mrb[9].mxu1  ;;  %v2086_v15 = vpop.f32.mrb[9].mxu0 }
 0x10b   : > { %v2775_v16 = vadd.f32 %v2158_v14, %v2157_v12  ;;  %v2160_v17 = vpop.f32.mrb[10].mxu1  ;;  %v2087_v18 = vadd.f32 %v2086_v15, %v2085_v13  ;;  %v2088_v19 = vpop.f32.mrb[10].mxu0 }
 0x10c   : > { %v2161_v20 = vpop.f32.mrb[11].mxu1  ;;  %v2089_v21 = vpop.f32.mrb[11].mxu0 }
 0x10d   : > { %v2777_v22 = vadd.f32 %v2161_v20, %v2160_v17  ;;  %v2090_v23 = vadd.f32 %v2089_v21, %v2088_v19 }
 0x111   : > { %v2163_v24 = vpop.f32.mrb[12].mxu1  ;;  %v2091_v25 = vpop.f32.mrb[12].mxu0 }
 0x112   : > { %v2164_v26 = vpop.f32.mrb[13].mxu1  ;;  %v2092_v27 = vpop.f32.mrb[13].mxu0 }
 0x113   : > { %v2779_v28 = vadd.f32 %v2164_v26, %v2163_v24  ;;  %v2166_v29 = vpop.f32.mrb[14].mxu1  ;;  %v2093_v30 = vadd.f32 %v2092_v27, %v2091_v25  ;;  %v2094_v31 = vpop.f32.mrb[14].mxu0 }
 0x114   : > { %v2167_v32 = vpop.f32.mrb[15].mxu1  ;;  %v2095_v33 = vpop.f32.mrb[15].mxu0 }
 0x115   : > { %v2781_v34 = vadd.f32 %v2167_v32, %v2166_v29  ;;  %v2096_v35 = vadd.f32 %v2095_v33, %v2094_v31 }
 0x119   : > { %v2185_v36 = vpop.f32.mrb[16].mxu1  ;;  %v2097_v37 = vpop.f32.mrb[16].mxu0 }
 0x11a   : > { %v2186_v38 = vpop.f32.mrb[17].mxu1  ;;  %v2098_v39 = vpop.f32.mrb[17].mxu0 }
 0x11b   : > { %v2187_v40 = vadd.f32 %v2186_v38, %v2185_v36  ;;  %v2188_v41 = vpop.f32.mrb[18].mxu1  ;;  %v2099_v42 = vadd.f32 %v2098_v39, %v2097_v37  ;;  %v2100_v43 = vpop.f32.mrb[18].mxu0 }
 0x11c   : > { %v2189_v44 = vpop.f32.mrb[19].mxu1  ;;  %v2101_v45 = vpop.f32.mrb[19].mxu0 }
 0x11d   : > { %v2190_v46 = vadd.f32 %v2189_v44, %v2188_v41  ;;  %v2102_v47 = vadd.f32 %v2101_v45, %v2100_v43  ;;  %v2783_v48 = vadd.f32 %v2187_v40, %v2075_v58 }
 0x11f   : > { %v2785_v49 = vadd.f32 %v2190_v46, %v2078_v63 }
 0x121   : > { %v2191_v50 = vpop.f32.mrb[20].mxu1  ;;  %v2103_v51 = vpop.f32.mrb[20].mxu0 }
 0x122   : > { %v2192_v52 = vpop.f32.mrb[21].mxu1  ;;  %v2104_v53 = vpop.f32.mrb[21].mxu0 }
 0x123   : > { %v2193_v54 = vadd.f32 %v2192_v52, %v2191_v50  ;;  %v2194_v55 = vpop.f32.mrb[22].mxu1  ;;  %v2105_v57 = vadd.f32 %v2104_v53, %v2103_v51  ;;  %v2106_v59 = vpop.f32.mrb[22].mxu0 }
 0x124   : > { %v2195_v60 = vpop.f32.mrb[23].mxu1  ;;  %v2107_v61 = vpop.f32.mrb[23].mxu0 }
 0x125   : > { %v2196_v0 = vadd.f32 %v2195_v60, %v2194_v55  ;;  %v2108_v1 = vadd.f32 %v2107_v61, %v2106_v59  ;;  %v2787_v2 = vadd.f32 %v2193_v54, %v2081_v6 }
 0x127   : > { %v2789_v3 = vadd.f32 %v2196_v0, %v2084_v11 }
 0x129   : > { %v2197_v58 = vpop.f32.mrb[24].mxu1  ;;  %v2109_v5 = vpop.f32.mrb[24].mxu0 }
 0x12a   : > { %v2198_v63 = vpop.f32.mrb[25].mxu1  ;;  %v2110_v7 = vpop.f32.mrb[25].mxu0 }
 0x12b   : > { %v2199_v8 = vadd.f32 %v2198_v63, %v2197_v58  ;;  %v2200_v9 = vpop.f32.mrb[26].mxu1  ;;  %v2111_v12 = vadd.f32 %v2110_v7, %v2109_v5  ;;  %v2112_v13 = vpop.f32.mrb[26].mxu0 }
 0x12c   : > { %v2201_v14 = vpop.f32.mrb[27].mxu1  ;;  %v2113_v15 = vpop.f32.mrb[27].mxu0 }
 0x12d   : > { %v2202_v17 = vadd.f32 %v2201_v14, %v2200_v9  ;;  %v2114_v19 = vadd.f32 %v2113_v15, %v2112_v13  ;;  %v2791_v20 = vadd.f32 %v2199_v8, %v2087_v18 }
 0x12f   : > { %v2793_v21 = vadd.f32 %v2202_v17, %v2090_v23 }
 0x131   : > { %v2203_v6 = vpop.f32.mrb[28].mxu1  ;;  %v2115_v24 = vpop.f32.mrb[28].mxu0 }
 0x132   : > { %v2204_v11 = vpop.f32.mrb[29].mxu1  ;;  %v2116_v25 = vpop.f32.mrb[29].mxu0 }
 0x133   : > { %v2205_v26 = vadd.f32 %v2204_v11, %v2203_v6  ;;  %v2206_v27 = vpop.f32.mrb[30].mxu1  ;;  %v2117_v29 = vadd.f32 %v2116_v25, %v2115_v24  ;;  %v2118_v31 = vpop.f32.mrb[30].mxu0 }
 0x134   : > { %v2207_v32 = vpop.f32.mrb[31].mxu1  ;;  %v2119_v33 = vpop.f32.mrb[31].mxu0 }
 0x135   : > { %v2208_v36 = vadd.f32 %v2207_v32, %v2206_v27  ;;  %v2120_v37 = vadd.f32 %v2119_v33, %v2118_v31  ;;  %v2795_v38 = vadd.f32 %v2205_v26, %v2093_v30 }
 0x137   : > { %v2797_v39 = vadd.f32 %v2208_v36, %v2096_v35 }
 0x139   : > { %v2209_v18 = vpop.f32.mrb[32].mxu1  ;;  %v2121_v40 = vpop.f32.mrb[32].mxu0 }
 0x13a   : > { %v2210_v23 = vpop.f32.mrb[33].mxu1  ;;  %v2122_v41 = vpop.f32.mrb[33].mxu0 }
 0x13b   : > { %v2211_v43 = vadd.f32 %v2210_v23, %v2209_v18  ;;  %v2212_v44 = vpop.f32.mrb[34].mxu1  ;;  %v2799_v45 = vadd.f32 %v2122_v41, %v2121_v40  ;;  %v2124_v46 = vpop.f32.mrb[34].mxu0 }
 0x13c   : > { %v2213_v50 = vpop.f32.mrb[35].mxu1  ;;  %v2125_v51 = vpop.f32.mrb[35].mxu0 }
 0x13d   : > { %v2214_v52 = vadd.f32 %v2213_v50, %v2212_v44  ;;  %v2801_v53 = vadd.f32 %v2125_v51, %v2124_v46  ;;  %v2803_v54 = vadd.f32 %v2211_v43, %v2099_v42 }
 0x13f   : > { %v2805_v30 = vadd.f32 %v2214_v52, %v2102_v47 }
 0x141   : > { %v2215_v35 = vpop.f32.mrb[36].mxu1  ;;  %v2127_v55 = vpop.f32.mrb[36].mxu0 }
 0x142   : > { %v2216_v59 = vpop.f32.mrb[37].mxu1  ;;  %v2128_v60 = vpop.f32.mrb[37].mxu0 }
 0x143   : > { %v2217_v61 = vadd.f32 %v2216_v59, %v2215_v35  ;;  %v2218_v0 = vpop.f32.mrb[38].mxu1  ;;  %v2807_v58 = vadd.f32 %v2128_v60, %v2127_v55  ;;  %v2130_v5 = vpop.f32.mrb[38].mxu0  ;;  %v2834_v59 = vld [vmem:[%s3033_s2] ss:$0 sm:$0xff] }
 0x144   : > { %v2219_v63 = vpop.f32.mrb[39].mxu1  ;;  %v2131_v7 = vpop.f32.mrb[39].mxu0 }
 0x145   : > { %v2220_v8 = vadd.f32 %v2219_v63, %v2218_v0  ;;  %v2809_v9 = vadd.f32 %v2131_v7, %v2130_v5  ;;  %v2811_v13 = vadd.f32 %v2217_v61, %v2105_v57  ;;  %v2840_v5 = vld [vmem:[%s3034_s3] ss:$0 sm:$0xff] }
 0x147   : > { %v2813_v42 = vadd.f32 %v2220_v8, %v2108_v1 }
 0x149   : > { %v2221_v47 = vpop.f32.mrb[40].mxu1  ;;  %v2133_v14 = vpop.f32.mrb[40].mxu0 }
 0x14a   : > { %v2222_v15 = vpop.f32.mrb[41].mxu1  ;;  %v2134_v17 = vpop.f32.mrb[41].mxu0 }
 0x14b   : > { %v2223_v6 = vadd.f32 %v2222_v15, %v2221_v47  ;;  %v2224_v24 = vpop.f32.mrb[42].mxu1  ;;  %v2815_v11 = vadd.f32 %v2134_v17, %v2133_v14  ;;  %v2136_v25 = vpop.f32.mrb[42].mxu0 }
 0x14c   : > { %v2225_v26 = vpop.f32.mrb[43].mxu1  ;;  %v2137_v27 = vpop.f32.mrb[43].mxu0 }
 0x14d   : > { %v2226_v31 = vadd.f32 %v2225_v26, %v2224_v24  ;;  %v2817_v32 = vadd.f32 %v2137_v27, %v2136_v25  ;;  %v2819_v33 = vadd.f32 %v2223_v6, %v2111_v12 }
 0x14f   : > { %v2821_v57 = vadd.f32 %v2226_v31, %v2114_v19 }
 0x151   : > { %v2227_v1 = vpop.f32.mrb[44].mxu1  ;;  %v2139_v36 = vpop.f32.mrb[44].mxu0 }
 0x152   : > { %v2228_v18 = vpop.f32.mrb[45].mxu1  ;;  %v2140_v40 = vpop.f32.mrb[45].mxu0 }
 0x153   : > { %v2229_v23 = vadd.f32 %v2228_v18, %v2227_v1  ;;  %v2230_v41 = vpop.f32.mrb[46].mxu1  ;;  %v2823_v43 = vadd.f32 %v2140_v40, %v2139_v36  ;;  %v2142_v44 = vpop.f32.mrb[46].mxu0 }
 0x154   : > { %v2231_v46 = vpop.f32.mrb[47].mxu1  ;;  %v2143_v50 = vpop.f32.mrb[47].mxu0 }
 0x155   : > { %v2232_v51 = vadd.f32 %v2231_v46, %v2230_v41  ;;  %v2825_v52 = vadd.f32 %v2143_v50, %v2142_v44  ;;  %v2827_v35 = vadd.f32 %v2229_v23, %v2117_v29 }
 0x157   : > { %v2829_v12 = vadd.f32 %v2232_v51, %v2120_v37 }
 0x159   : > { %v2233_v19 = vpop.f32.mrb[48].mxu1  ;;  %v2311_v55 = vpop.f32.mrb[48].mxu0 }
 0x15a   : > { %v1403_v60 = vadd.f32 %v2311_v55, %v2787_v2  ;;  %v2234_v61 = vpop.f32.mrb[49].mxu1  ;;  %v1394_v0 = vpop.f32.mrb[49].mxu0 }
 0x15b   : > { %v2235_v29 = vadd.f32 %v2234_v61, %v2233_v19  ;;  %v1395_v37 = vadd.f32 %v1394_v0, %v2783_v48  ;;  %v2236_v63 = vpop.f32.mrb[50].mxu1  ;;  %v2312_v7 = vpop.f32.mrb[50].mxu0 }
 0x15c   : > { %v1530_v8 = vmul.f32 %v2834_v59, %v1403_v60  ;;  %v1406_v47 = vadd.f32 %v2312_v7, %v2789_v3  ;;  %v2237_v14 = vpop.f32.mrb[51].mxu1  ;;  %v1397_v15 = vpop.f32.mrb[51].mxu0 }
 0x15d   : > { %v1528_v2 = vmul.f32 %v2834_v59, %v1395_v37  ;;  %v2238_v17 = vadd.f32 %v2237_v14, %v2236_v63  ;;  %v1398_v6 = vadd.f32 %v1397_v15, %v2785_v49  ;;  %v2848_v24 = vadd.f32 %v2235_v29, %v2799_v45 }
 0x15e   : > { %v1569_v25 = vadd.f32 %v2840_v5, %v1530_v8  ;;  %v1531_v48 = vmul.f32 %v2834_v59, %v1406_v47 }
 0x15f   : > { %v1567_v26 = vadd.f32 %v2840_v5, %v1528_v2  ;;  %v1529_v27 = vmul.f32 %v2834_v59, %v1398_v6  ;;  %v2856_v3 = vadd.f32 %v2238_v17, %v2801_v53 }
 0x160   : > { %v1601_v31 = vmax.f32 %v1569_v25, 0.0  ;;  %v1570_v1 = vadd.f32 %v2840_v5, %v1531_v48 }
 0x161   : > { %v1599_v49 = vmax.f32 %v1567_v26, 0.0  ;;  %v1568_v45 = vadd.f32 %v2840_v5, %v1529_v27  ;;  %v2239_v36 = vpop.f32.mrb[52].mxu1  ;;  %v2315_v18 = vpop.f32.mrb[52].mxu0 }
 0x162   : > { %v2027_v40 = vpack.c.bf16 %v1601_v31, %v1601_v31  ;;  %v1602_v23 = vmax.f32 %v1570_v1, 0.0  ;;  %v1419_v53 = vadd.f32 %v2315_v18, %v2795_v38  ;;  %v2240_v41 = vpop.f32.mrb[53].mxu1  ;;  %v1410_v44 = vpop.f32.mrb[53].mxu0 }
 0x163   : > { %v2025_v46 = vpack.c.bf16 %v1599_v49, %v1599_v49  ;;  %v1600_v50 = vmax.f32 %v1568_v45, 0.0  ;;  %v2241_v51 = vadd.f32 %v2240_v41, %v2239_v36  ;;  %v1411_v19 = vadd.f32 %v1410_v44, %v2791_v20  ;;  %v2242_v55 = vpop.f32.mrb[54].mxu1  ;;  %v2316_v60 = vpop.f32.mrb[54].mxu0 }
 0x164   : > { %1762 = vst.msk [vmem:[%s2862_s30 + $0x8] sm:$0xf] %vm1759_vm1, %v2027_v40  ;;  %v2028_v61 = vpack.c.bf16 %v1602_v23, %v1602_v23  ;;  %v1534_v0 = vmul.f32 %v2834_v59, %v1419_v53  ;;  %v1422_v29 = vadd.f32 %v2316_v60, %v2797_v39  ;;  %v2243_v37 = vpop.f32.mrb[55].mxu1  ;;  %v1413_v38 = vpop.f32.mrb[55].mxu0 }
 0x165   : > { %1760 = vst.msk [vmem:[%s2862_s30] sm:$0xf] %vm1759_vm1, %v2025_v46  ;;  %v2026_v63 = vpack.c.bf16 %v1600_v50, %v1600_v50  ;;  %v1532_v7 = vmul.f32 %v2834_v59, %v1411_v19  ;;  %v2244_v8 = vadd.f32 %v2243_v37, %v2242_v55  ;;  %v1414_v20 = vadd.f32 %v1413_v38, %v2793_v21 }
 0x166   : > { %1763 = vst.msk [vmem:[%s2862_s30 + $0xc] sm:$0xf] %vm1759_vm1, %v2028_v61  ;;  %v1573_v47 = vadd.f32 %v2840_v5, %v1534_v0  ;;  %v1535_v14 = vmul.f32 %v2834_v59, %v1422_v29  ;;  %v2880_v15 = vadd.f32 %v2241_v51, %v2807_v58 }
 0x167   : > { %1761 = vst.msk [vmem:[%s2862_s30 + $0x4] sm:$0xf] %vm1759_vm1, %v2026_v63  ;;  %v1571_v39 = vadd.f32 %v2840_v5, %v1532_v7  ;;  %v1533_v2 = vmul.f32 %v2834_v59, %v1414_v20  ;;  %v2887_v17 = vadd.f32 %v2244_v8, %v2809_v9 }
 0x168   : > { %v1605_v6 = vmax.f32 %v1573_v47, 0.0  ;;  %v1574_v21 = vadd.f32 %v2840_v5, %v1535_v14 }
 0x169   : > { %v1603_v25 = vmax.f32 %v1571_v39, 0.0  ;;  %v1572_v48 = vadd.f32 %v2840_v5, %v1533_v2  ;;  %v2245_v26 = vpop.f32.mrb[56].mxu1  ;;  %v2319_v27 = vpop.f32.mrb[56].mxu0 }
 0x16a   : > { %v2031_v58 = vpack.c.bf16 %v1605_v6, %v1605_v6  ;;  %v1606_v31 = vmax.f32 %v1574_v21, 0.0  ;;  %v1435_v1 = vadd.f32 %v2319_v27, %v2811_v13  ;;  %v2246_v49 = vpop.f32.mrb[57].mxu1  ;;  %v1426_v45 = vpop.f32.mrb[57].mxu0 }
 0x16b   : > { %v2029_v36 = vpack.c.bf16 %v1603_v25, %v1603_v25  ;;  %v1604_v18 = vmax.f32 %v1572_v48, 0.0  ;;  %v2247_v9 = vadd.f32 %v2246_v49, %v2245_v26  ;;  %v1427_v40 = vadd.f32 %v1426_v45, %v2803_v54  ;;  %v2248_v23 = vpop.f32.mrb[58].mxu1  ;;  %v2320_v53 = vpop.f32.mrb[58].mxu0 }
 0x16c   : > { %1766 = vst.msk [vmem:[%s2862_s30 + $0x18] sm:$0xf] %vm1759_vm1, %v2031_v58  ;;  %v2032_v41 = vpack.c.bf16 %v1606_v31, %v1606_v31  ;;  %v1538_v44 = vmul.f32 %v2834_v59, %v1435_v1  ;;  %v1438_v46 = vadd.f32 %v2320_v53, %v2813_v42  ;;  %v2249_v50 = vpop.f32.mrb[59].mxu1  ;;  %v1429_v13 = vpop.f32.mrb[59].mxu0 }
 0x16d   : > { %1764 = vst.msk [vmem:[%s2862_s30 + $0x10] sm:$0xf] %vm1759_vm1, %v2029_v36  ;;  %v2030_v51 = vpack.c.bf16 %v1604_v18, %v1604_v18  ;;  %v1536_v19 = vmul.f32 %v2834_v59, %v1427_v40  ;;  %v2250_v55 = vadd.f32 %v2249_v50, %v2248_v23  ;;  %v1430_v54 = vadd.f32 %v1429_v13, %v2805_v30 }
 0x16e   : > { %1767 = vst.msk [vmem:[%s2862_s30 + $0x1c] sm:$0xf] %vm1759_vm1, %v2032_v41  ;;  %v1577_v60 = vadd.f32 %v2840_v5, %v1538_v44  ;;  %v1539_v61 = vmul.f32 %v2834_v59, %v1438_v46  ;;  %v2906_v0 = vadd.f32 %v2247_v9, %v2815_v11 }
 0x16f   : > { %1765 = vst.msk [vmem:[%s2862_s30 + $0x14] sm:$0xf] %vm1759_vm1, %v2030_v51  ;;  %v1575_v42 = vadd.f32 %v2840_v5, %v1536_v19  ;;  %v1537_v29 = vmul.f32 %v2834_v59, %v1430_v54  ;;  %v2913_v37 = vadd.f32 %v2250_v55, %v2817_v32 }
 0x170   : > { %v1609_v38 = vmax.f32 %v1577_v60, 0.0  ;;  %v1578_v30 = vadd.f32 %v2840_v5, %v1539_v61 }
 0x171   : > { %v1607_v63 = vmax.f32 %v1575_v42, 0.0  ;;  %v1576_v7 = vadd.f32 %v2840_v5, %v1537_v29  ;;  %v2251_v8 = vpop.f32.mrb[60].mxu1  ;;  %v2323_v20 = vpop.f32.mrb[60].mxu0 }
 0x172   : > { %v2035_v11 = vpack.c.bf16 %v1609_v38, %v1609_v38  ;;  %v1610_v47 = vmax.f32 %v1578_v30, 0.0  ;;  %v1451_v14 = vadd.f32 %v2323_v20, %v2827_v35  ;;  %v2252_v39 = vpop.f32.mrb[61].mxu1  ;;  %v1442_v2 = vpop.f32.mrb[61].mxu0 }
 0x173   : > { %v2033_v6 = vpack.c.bf16 %v1607_v63, %v1607_v63  ;;  %v1608_v21 = vmax.f32 %v1576_v7, 0.0  ;;  %v2253_v32 = vadd.f32 %v2252_v39, %v2251_v8  ;;  %v1443_v25 = vadd.f32 %v1442_v2, %v2819_v33  ;;  %v2254_v48 = vpop.f32.mrb[62].mxu1  ;;  %v2324_v26 = vpop.f32.mrb[62].mxu0 }
 0x174   : > { %1770 = vst.msk [vmem:[%s2862_s30 + $0x28] sm:$0xf] %vm1759_vm1, %v2035_v11  ;;  %v2036_v27 = vpack.c.bf16 %v1610_v47, %v1610_v47  ;;  %v1542_v58 = vmul.f32 %v2834_v59, %v1451_v14  ;;  %v1454_v31 = vadd.f32 %v2324_v26, %v2829_v12  ;;  %v2255_v1 = vpop.f32.mrb[63].mxu1  ;;  %v1445_v35 = vpop.f32.mrb[63].mxu0 }
 0x175   : > { %1768 = vst.msk [vmem:[%s2862_s30 + $0x20] sm:$0xf] %vm1759_vm1, %v2033_v6  ;;  %v2034_v49 = vpack.c.bf16 %v1608_v21, %v1608_v21  ;;  %v1540_v45 = vmul.f32 %v2834_v59, %v1443_v25  ;;  %v2256_v36 = vadd.f32 %v2255_v1, %v2254_v48  ;;  %v1446_v33 = vadd.f32 %v1445_v35, %v2821_v57 }
 0x176   : > { %1771 = vst.msk [vmem:[%s2862_s30 + $0x2c] sm:$0xf] %vm1759_vm1, %v2036_v27  ;;  %v1581_v18 = vadd.f32 %v2840_v5, %v1542_v58  ;;  %v1543_v9 = vmul.f32 %v2834_v59, %v1454_v31  ;;  %v1322_v40 = vadd.f32 %v2253_v32, %v2823_v43 }
 0x177   : > { %1769 = vst.msk [vmem:[%s2862_s30 + $0x24] sm:$0xf] %vm1759_vm1, %v2034_v49  ;;  %v1579_v12 = vadd.f32 %v2840_v5, %v1540_v45  ;;  %v1541_v23 = vmul.f32 %v2834_v59, %v1446_v33  ;;  %v1325_v53 = vadd.f32 %v2256_v36, %v2825_v52 }
 0x178   : > { %v1613_v41 = vmax.f32 %v1581_v18, 0.0  ;;  %v1582_v44 = vadd.f32 %v2840_v5, %v1543_v9 }
 0x179   : > { %v1611_v57 = vmax.f32 %v1579_v12, 0.0  ;;  %v1580_v46 = vadd.f32 %v2840_v5, %v1541_v23  ;;  %v2257_v50 = vpop.f32.mrb[64].mxu1  ;;  %v2327_v13 = vpop.f32.mrb[64].mxu0 }
 0x17a   : > { %v2039_v51 = vpack.c.bf16 %v1613_v41, %v1613_v41  ;;  %v1614_v19 = vmax.f32 %v1582_v44, 0.0  ;;  %v1467_v43 = vadd.f32 %v2327_v13, %v2880_v15  ;;  %v2258_v55 = vpop.f32.mrb[65].mxu1  ;;  %v1458_v54 = vpop.f32.mrb[65].mxu0 }
 0x17b   : > { %v2037_v60 = vpack.c.bf16 %v1611_v57, %v1611_v57  ;;  %v1612_v61 = vmax.f32 %v1580_v46, 0.0  ;;  %v2259_v52 = vadd.f32 %v2258_v55, %v2257_v50  ;;  %v1459_v42 = vadd.f32 %v1458_v54, %v2848_v24  ;;  %v2260_v29 = vpop.f32.mrb[66].mxu1  ;;  %v2328_v38 = vpop.f32.mrb[66].mxu0 }
 0x17c   : > { %1774 = vst.msk [vmem:[%s2862_s30 + $0x38] sm:$0xf] %vm1759_vm1, %v2039_v51  ;;  %v2040_v30 = vpack.c.bf16 %v1614_v19, %v1614_v19  ;;  %v1546_v63 = vmul.f32 %v2834_v59, %v1467_v43  ;;  %v1470_v7 = vadd.f32 %v2328_v38, %v2887_v17  ;;  %v2261_v8 = vpop.f32.mrb[67].mxu1  ;;  %v1461_v15 = vpop.f32.mrb[67].mxu0 }
 0x17d   : > { %1772 = vst.msk [vmem:[%s2862_s30 + $0x30] sm:$0xf] %vm1759_vm1, %v2037_v60  ;;  %v2038_v20 = vpack.c.bf16 %v1612_v61, %v1612_v61  ;;  %v1544_v11 = vmul.f32 %v2834_v59, %v1459_v42  ;;  %v2262_v47 = vadd.f32 %v2261_v8, %v2260_v29  ;;  %v1462_v24 = vadd.f32 %v1461_v15, %v2856_v3 }
 0x17e   : > { %1775 = vst.msk [vmem:[%s2862_s30 + $0x3c] sm:$0xf] %vm1759_vm1, %v2040_v30  ;;  %v1585_v14 = vadd.f32 %v2840_v5, %v1546_v63  ;;  %v1547_v39 = vmul.f32 %v2834_v59, %v1470_v7  ;;  %v1330_v2 = vadd.f32 %v2259_v52, %v2767_v56 }
 0x17f   : > { %1773 = vst.msk [vmem:[%s2862_s30 + $0x34] sm:$0xf] %vm1759_vm1, %v2038_v20  ;;  %v1583_v17 = vadd.f32 %v2840_v5, %v1544_v11  ;;  %v1545_v6 = vmul.f32 %v2834_v59, %v1462_v24  ;;  %v2959_v21 = vadd.f32 %v2262_v47, %v2769_v62 }
 0x180   : > { %v1617_v32 = vmax.f32 %v1585_v14, 0.0  ;;  %v1586_v3 = vadd.f32 %v2840_v5, %v1547_v39 }
 0x181   : > { %v1615_v25 = vmax.f32 %v1583_v17, 0.0  ;;  %v1584_v48 = vadd.f32 %v2840_v5, %v1545_v6  ;;  %v2263_v26 = vpop.f32.mrb[68].mxu1  ;;  %v2331_v27 = vpop.f32.mrb[68].mxu0 }
 0x182   : > { %v2043_v58 = vpack.c.bf16 %v1617_v32, %v1617_v32  ;;  %v1618_v56 = vmax.f32 %v1586_v3, 0.0  ;;  %v1483_v31 = vadd.f32 %v2331_v27, %v1322_v40  ;;  %v2264_v1 = vpop.f32.mrb[69].mxu1  ;;  %v1474_v35 = vpop.f32.mrb[69].mxu0 }
 0x183   : > { %v2041_v49 = vpack.c.bf16 %v1615_v25, %v1615_v25  ;;  %v1616_v45 = vmax.f32 %v1584_v48, 0.0  ;;  %v2265_v62 = vadd.f32 %v2264_v1, %v2263_v26  ;;  %v1475_v36 = vadd.f32 %v1474_v35, %v2906_v0  ;;  %v2266_v33 = vpop.f32.mrb[70].mxu1  ;;  %v2332_v18 = vpop.f32.mrb[70].mxu0 }
 0x184   : > { %1778 = vst.msk [vmem:[%s2862_s30 + $0x48] sm:$0xf] %vm1759_vm1, %v2043_v58  ;;  %v2044_v9 = vpack.c.bf16 %v1618_v56, %v1618_v56  ;;  %v1550_v12 = vmul.f32 %v2834_v59, %v1483_v31  ;;  %v1486_v23 = vadd.f32 %v2332_v18, %v1325_v53  ;;  %v2267_v41 = vpop.f32.mrb[71].mxu1  ;;  %v1477_v44 = vpop.f32.mrb[71].mxu0 }
 0x185   : > { %1776 = vst.msk [vmem:[%s2862_s30 + $0x40] sm:$0xf] %vm1759_vm1, %v2041_v49  ;;  %v2042_v40 = vpack.c.bf16 %v1616_v45, %v1616_v45  ;;  %v1548_v57 = vmul.f32 %v2834_v59, %v1475_v36  ;;  %v2268_v46 = vadd.f32 %v2267_v41, %v2266_v33  ;;  %v1478_v50 = vadd.f32 %v1477_v44, %v2913_v37 }
 0x186   : > { %1779 = vst.msk [vmem:[%s2862_s30 + $0x4c] sm:$0xf] %vm1759_vm1, %v2044_v9  ;;  %v1589_v0 = vadd.f32 %v2840_v5, %v1550_v12  ;;  %v1551_v13 = vmul.f32 %v2834_v59, %v1486_v23  ;;  %v1338_v51 = vadd.f32 %v2265_v62, %v2771_v4 }
 0x187   : > { %1777 = vst.msk [vmem:[%s2862_s30 + $0x44] sm:$0xf] %vm1759_vm1, %v2042_v40  ;;  %v1587_v53 = vadd.f32 %v2840_v5, %v1548_v57  ;;  %v1549_v19 = vmul.f32 %v2834_v59, %v1478_v50  ;;  %v1341_v43 = vadd.f32 %v2268_v46, %v2773_v10 }
 0x188   : > { %v1621_v55 = vmax.f32 %v1589_v0, 0.0  ;;  %v1590_v54 = vadd.f32 %v2840_v5, %v1551_v13 }
 0x189   : > { %v1619_v37 = vmax.f32 %v1587_v53, 0.0  ;;  %v1588_v60 = vadd.f32 %v2840_v5, %v1549_v19  ;;  %v2269_v61 = vpop.f32.mrb[72].mxu1  ;;  %v2335_v52 = vpop.f32.mrb[72].mxu0 }
 0x18a   : > { %v2047_v42 = vpack.c.bf16 %v1621_v55, %v1621_v55  ;;  %v1622_v29 = vmax.f32 %v1590_v54, 0.0  ;;  %v1499_v4 = vadd.f32 %v2335_v52, %v1338_v51  ;;  %v2270_v38 = vpop.f32.mrb[73].mxu1  ;;  %v1490_v30 = vpop.f32.mrb[73].mxu0 }
 0x18b   : > { %v2045_v63 = vpack.c.bf16 %v1619_v37, %v1619_v37  ;;  %v1620_v7 = vmax.f32 %v1588_v60, 0.0  ;;  %v2271_v8 = vadd.f32 %v2270_v38, %v2269_v61  ;;  %v1491_v10 = vadd.f32 %v1490_v30, %v1330_v2  ;;  %v2272_v15 = vpop.f32.mrb[74].mxu1  ;;  %v2336_v20 = vpop.f32.mrb[74].mxu0 }
 0x18c   : > { %1782 = vst.msk [vmem:[%s2862_s30 + $0x58] sm:$0xf] %vm1759_vm1, %v2047_v42  ;;  %v2048_v11 = vpack.c.bf16 %v1622_v29, %v1622_v29  ;;  %v1554_v47 = vmul.f32 %v2834_v59, %v1499_v4  ;;  %v1502_v24 = vadd.f32 %v2336_v20, %v1341_v43  ;;  %v2273_v14 = vpop.f32.mrb[75].mxu1  ;;  %v1493_v39 = vpop.f32.mrb[75].mxu0 }
 0x18d   : > { %1780 = vst.msk [vmem:[%s2862_s30 + $0x50] sm:$0xf] %vm1759_vm1, %v2045_v63  ;;  %v2046_v17 = vpack.c.bf16 %v1620_v7, %v1620_v7  ;;  %v1552_v6 = vmul.f32 %v2834_v59, %v1491_v10  ;;  %v2274_v32 = vadd.f32 %v2273_v14, %v2272_v15  ;;  %v1494_v3 = vadd.f32 %v1493_v39, %v2959_v21 }
 0x18e   : > { %1783 = vst.msk [vmem:[%s2862_s30 + $0x5c] sm:$0xf] %vm1759_vm1, %v2048_v11  ;;  %v1593_v2 = vadd.f32 %v2840_v5, %v1554_v47  ;;  %v1555_v25 = vmul.f32 %v2834_v59, %v1502_v24  ;;  %v1346_v48 = vadd.f32 %v2271_v8, %v2775_v16 }
 0x18f   : > { %1781 = vst.msk [vmem:[%s2862_s30 + $0x54] sm:$0xf] %vm1759_vm1, %v2046_v17  ;;  %v1591_v26 = vadd.f32 %v2840_v5, %v1552_v6  ;;  %v1553_v27 = vmul.f32 %v2834_v59, %v1494_v3  ;;  %v1349_v58 = vadd.f32 %v2274_v32, %v2777_v22 }
 0x190   : > { %v1625_v56 = vmax.f32 %v1593_v2, 0.0  ;;  %v1594_v21 = vadd.f32 %v2840_v5, %v1555_v25 }
 0x191   : > { %v1623_v31 = vmax.f32 %v1591_v26, 0.0  ;;  %v1592_v1 = vadd.f32 %v2840_v5, %v1553_v27  ;;  %v2275_v35 = vpop.f32.mrb[76].mxu1  ;;  %v2339_v49 = vpop.f32.mrb[76].mxu0 }
 0x192   : > { %v2051_v45 = vpack.c.bf16 %v1625_v56, %v1625_v56  ;;  %v1626_v16 = vmax.f32 %v1594_v21, 0.0  ;;  %v2276_v62 = vpop.f32.mrb[77].mxu1  ;;  %v1506_v36 = vpop.f32.mrb[77].mxu0 }
 0x193   : > { %v2049_v33 = vpack.c.bf16 %v1623_v31, %v1623_v31  ;;  %v1624_v18 = vmax.f32 %v1592_v1, 0.0  ;;  %v2277_v9 = vadd.f32 %v2276_v62, %v2275_v35  ;;  %v1507_v22 = vadd.f32 %v1506_v36, %v1346_v48  ;;  %v2278_v12 = vpop.f32.mrb[78].mxu1  ;;  %v2340_v23 = vpop.f32.mrb[78].mxu0 }
 0x194   : > { %1786 = vst.msk [vmem:[%s2862_s30 + $0x68] sm:$0xf] %vm1759_vm1, %v2051_v45  ;;  %v2052_v41 = vpack.c.bf16 %v1626_v16, %v1626_v16  ;;  %v2279_v44 = vpop.f32.mrb[79].mxu1  ;;  %v1509_v40 = vpop.f32.mrb[79].mxu0 }
 0x195   : > { %1784 = vst.msk [vmem:[%s2862_s30 + $0x60] sm:$0xf] %vm1759_vm1, %v2049_v33  ;;  %v2050_v57 = vpack.c.bf16 %v1624_v18, %v1624_v18  ;;  %v1354_v46 = vadd.f32 %v2277_v9, %v2779_v28  ;;  %v1556_v50 = vmul.f32 %v2834_v59, %v1507_v22  ;;  %v2280_v0 = vadd.f32 %v2279_v44, %v2278_v12 }
 0x196   : > { %1787 = vst.msk [vmem:[%s2862_s30 + $0x6c] sm:$0xf] %vm1759_vm1, %v2052_v41  ;;  %v1510_v13 = vadd.f32 %v1509_v40, %v1349_v58 }
 0x197   : > { %1785 = vst.msk [vmem:[%s2862_s30 + $0x64] sm:$0xf] %vm1759_vm1, %v2050_v57  ;;  %v1515_v51 = vadd.f32 %v2339_v49, %v1354_v46  ;;  %v1595_v53 = vadd.f32 %v2840_v5, %v1556_v50  ;;  %v1357_v19 = vadd.f32 %v2280_v0, %v2781_v34 }
 0x198   : > { %v1557_v43 = vmul.f32 %v2834_v59, %v1510_v13 }
 0x199   : > { %v1558_v28 = vmul.f32 %v2834_v59, %v1515_v51  ;;  %v1627_v55 = vmax.f32 %v1595_v53, 0.0  ;;  %v1518_v54 = vadd.f32 %v2340_v23, %v1357_v19 }
 0x19a   : > { %v1596_v37 = vadd.f32 %v2840_v5, %v1557_v43 }
 0x19b   : > { %v1597_v60 = vadd.f32 %v2840_v5, %v1558_v28  ;;  %v2053_v61 = vpack.c.bf16 %v1627_v55, %v1627_v55  ;;  %v1559_v52 = vmul.f32 %v2834_v59, %v1518_v54 }
 0x19c   : > { %v1628_v42 = vmax.f32 %v1596_v37, 0.0 }
 0x19d   : > { %v1629_v29 = vmax.f32 %v1597_v60, 0.0  ;;  %1788 = vst.msk [vmem:[%s2862_s30 + $0x70] sm:$0xf] %vm1759_vm1, %v2053_v61  ;;  %v1598_v34 = vadd.f32 %v2840_v5, %v1559_v52 }
 0x19e   : > { %v2054_v4 = vpack.c.bf16 %v1628_v42, %v1628_v42 }
 0x19f   : > { %v2055_v38 = vpack.c.bf16 %v1629_v29, %v1629_v29  ;;  %v1630_v30 = vmax.f32 %v1598_v34, 0.0 }
 0x1a0   : > { %1789 = vst.msk [vmem:[%s2862_s30 + $0x74] sm:$0xf] %vm1759_vm1, %v2054_v4 }
 0x1a1   : > { %1790 = vst.msk [vmem:[%s2862_s30 + $0x78] sm:$0xf] %vm1759_vm1, %v2055_v38  ;;  %v2056_v63 = vpack.c.bf16 %v1630_v30, %v1630_v30 }
 0x1a3   : > { %1791 = vst.msk [vmem:[%s2862_s30 + $0x7c] sm:$0xf] %vm1759_vm1, %v2056_v63 }
 0x1a4 PF: > { %s14_s15 = sadd.s32 1, %s2520_s15  }
 0x1a5   : > { %p11_p4 = scmp.ge.s32.totalorder %s14_s15, 4  }
 0x1a7   :  { %13 = sbr.rel (!%p11_p4) target bundleno = 1 (0x1), region = 66 }

// kernel: resnet_forward.7
= control target key start
LH: loop header
LB: loop body
LE: loop exit
PB: predicated region body
PF: predicated region fallthrough
CT: control target
= control target key end

     0   :  { %s2790_s18 = smov 0   ;;  %s3356_s0 = inlined_call_operand.vmem [shape: bf16[512,576], index: 0, kind: input, shape index: {}]   ;;  %s3357_s1 = inlined_call_operand.vmem [shape: bf16[576,64], index: 1, kind: input, shape index: {}]   ;;  %s3358_s2 = inlined_call_operand.vmem [shape: f32[1,64], index: 2, kind: input, shape index: {}]   ;;  %s3359_s3 = inlined_call_operand.vmem [shape: f32[1,64], index: 3, kind: input, shape index: {}]   ;;  %s3360_s4 = inlined_call_operand.vmem [shape: bf16[512,64], index: 4, kind: input, shape index: {}]   ;;  %s3361_s5 = inlined_call_operand.vmem [shape: bf16[512,64], index: 5, kind: output, shape index: {}]  }
   0x1 LB: > { %s2005_s19 = sadd.s32 4294967295, %s2758_s18   ;;  %p2009_p0 = scmp.ge.s32.totalorder %s2758_s18, 1  ;;  %s2758_s18 = sphi %s2790_s18, %s15_s18  }
   0x2   : > { %p200_p1 = scmp.lt.s32.totalorder %s2758_s18, 3 }
   0x4   : > { %p201_p2 = pnand %p2009_p0, %p200_p1 }
   0x5   : > { %v2604_v0 = vld [vmem:[%s3357_s1 + $0x40] sm:$0xff] (!%p201_p2)   ;;  %s2010_s22 = sshll.u32 (!%p201_p2), %s2005_s19, 5  ;;  %v2606_v2 = vld [vmem:[%s3357_s1 + $0x48] sm:$0xff] (!%p201_p2)   ;;  %v2608_v4 = vld [vmem:[%s3357_s1 + $0x50] sm:$0xff] (!%p201_p2)   ;;  %vm1038_vm0 = vcmask (!%p201_p2), 523264   ;;  %vm1904_vm1 = vcmask (!%p201_p2), 519168  }
   0x6   : > { %204 = sbr.rel (%p201_p2) target bundleno = 423 (0x1a7), region = 40  ;;  %v2605_v1 = vld [vmem:[%s3357_s1] sm:$0xff] (!%p201_p2)   ;;  %2295 = vmatprep.subr.bf16.mxu0 (!%p201_p2), %v2604_v0  ;;  %2579 = vmatprep.subr.bf16.mxu1 (!%p201_p2), %v2604_v0  ;;  %p235_p3 = scmp.lt.s32.totalorder (!%p201_p2), %s2010_s22, 63  ;;  %v2607_v3 = vld [vmem:[%s3357_s1 + $0x8] sm:$0xff] (!%p201_p2)   ;;  %v2609_v5 = vld [vmem:[%s3357_s1 + $0x10] sm:$0xff] (!%p201_p2)  }
   0x7   : > { %2296 = vmatpush3.bf16.msra.mxu0 (!%p201_p2), %v2605_v1  ;;  %2587 = vmatpush3.bf16.msra.mxu1 (!%p201_p2), %v2605_v1  ;;  %v2610_v6 = vld [vmem:[%s3357_s1 + $0x58] sm:$0xff] (!%p201_p2)   ;;  %v2612_v8 = vld [vmem:[%s3357_s1 + $0x60] sm:$0xff] (!%p201_p2)   ;;  %v2614_v10 = vld [vmem:[%s3357_s1 + $0x68] sm:$0xff] (!%p201_p2)  }
   0x8   : > { %2297 = vmatprep.subr.bf16.mxu0 (!%p201_p2), %v2606_v2  ;;  %2580 = vmatprep.subr.bf16.mxu1 (!%p201_p2), %v2606_v2  ;;  %v2611_v7 = vld [vmem:[%s3357_s1 + $0x18] sm:$0xff] (!%p201_p2)   ;;  %v2613_v9 = vld [vmem:[%s3357_s1 + $0x20] sm:$0xff] (!%p201_p2)   ;;  %v2615_v13 = vld [vmem:[%s3357_s1 + $0x28] sm:$0xff] (!%p201_p2)  }
   0x9   : > { %v2616_v14 = vld [vmem:[%s3357_s1 + $0x70] sm:$0xff] (!%p201_p2)   ;;  %v2618_v16 = vld [vmem:[%s3357_s1 + $0x78] sm:$0xff] (!%p201_p2)   ;;  %v2626_v18 = vld [vmem:[%s3357_s1 + $0xc0] sm:$0xff] (!%p201_p2)  }
   0xa   : > { %v2617_v15 = vld [vmem:[%s3357_s1 + $0x30] sm:$0xff] (!%p201_p2)   ;;  %v2619_v17 = vld [vmem:[%s3357_s1 + $0x38] sm:$0xff] (!%p201_p2)   ;;  %v2629_v19 = vld [vmem:[%s3357_s1 + $0x100] sm:$0xff] (!%p201_p2)  }
   0xb   : > { %2298 = vmatpush3.bf16.msra.mxu0 (!%p201_p2), %v2607_v3  ;;  %2588 = vmatpush3.bf16.msra.mxu1 (!%p201_p2), %v2607_v3  ;;  %v2627_v22 = vld [vmem:[%s3357_s1 + $0x80] sm:$0xff] (!%p201_p2)   ;;  %v2628_v23 = vld [vmem:[%s3357_s1 + $0xc8] sm:$0xff] (!%p201_p2)   ;;  %v2637_v28 = vld [vmem:[%s3357_s1 + $0xd0] sm:$0xff] (!%p201_p2)  }
   0xc   : > { %2299 = vmatprep.subr.bf16.mxu0 (!%p201_p2), %v2608_v4  ;;  %2581 = vmatprep.subr.bf16.mxu1 (!%p201_p2), %v2608_v4  ;;  %v2630_v26 = vld [vmem:[%s3357_s1 + $0x88] sm:$0xff] (!%p201_p2)   ;;  %v2638_v30 = vld [vmem:[%s3357_s1 + $0x90] sm:$0xff] (!%p201_p2)   ;;  %v2639_v31 = vld [vmem:[%s3357_s1 + $0xd8] sm:$0xff] (!%p201_p2)  }
   0xd   : > { %s3363_s22 = smov (!%p235_p3, %s2010_s22), 63  ;;  %v2640_v34 = vld [vmem:[%s3357_s1 + $0x98] sm:$0xff]   ;;  %v2660_v35 = vld [vmem:[%s3357_s1 + $0x108] sm:$0xff]   ;;  %v2647_v37 = vld [vmem:[%s3357_s1 + $0xe0] sm:$0xff]  }
   0xe   : > { %s2595_s10 = smul.u32 20, %s3363_s22  ;;  %v2648_v39 = vld [vmem:[%s3357_s1 + $0xa0] sm:$0xff]   ;;  %v2649_v40 = vld [vmem:[%s3357_s1 + $0xe8] sm:$0xff]   ;;  %v2657_v46 = vld [vmem:[%s3357_s1 + $0xf0] sm:$0xff]  }
   0xf   : > { %2300 = vmatpush3.bf16.msra.mxu0 %v2609_v5  ;;  %2589 = vmatpush3.bf16.msra.mxu1 %v2609_v5  ;;  %v2650_v43 = vld [vmem:[%s3357_s1 + $0xa8] sm:$0xff]   ;;  %v2680_v47 = vld [vmem:[%s3357_s1 + $0x110] sm:$0xff]   ;;  %v2659_v49 = vld [vmem:[%s3357_s1 + $0xf8] sm:$0xff]  }
  0x10   : > { %2301 = vmatprep.subr.bf16.mxu0 %v2610_v6  ;;  %2582 = vmatprep.subr.bf16.mxu1 %v2610_v6  ;;  %s2831_s17 = scalar_lea.vmem %s3356_s0, %s2595_s10  ;;  %v2658_v48 = vld [vmem:[%s3357_s1 + $0xb0] sm:$0xff]   ;;  %v2661_v52 = vld [vmem:[%s3357_s1 + $0xb8] sm:$0xff]  }
  0x11   : > { %v2622_v11 = vld [vmem:[%s2831_s17 + $0x4] ss:$20 sps:$4 sm:$0xff]   ;;  %v2620_v20 = vld [vmem:[%s2831_s17] ss:$20 sps:$4 sm:$0xff]   ;;  %v2635_v27 = vld [vmem:[%s2831_s17 + $0x28] ss:$20 sps:$4 sm:$0xff]  }
  0x12   : > { %v2625_v12 = vld [vmem:[%s2831_s17 + $0x1e4] ss:$20 sps:$4 sm:$0xff]   ;;  %1119 = vmatprep.mubr.bf16.mxu0 %v2622_v11  ;;  %v2623_v21 = vld [vmem:[%s2831_s17 + $0x1e0] ss:$20 sps:$4 sm:$0xff]   ;;  %v2636_v29 = vld [vmem:[%s2831_s17 + $0x208] ss:$20 sps:$4 sm:$0xff]  }
  0x13   : > { %2302 = vmatpush3.bf16.msra.mxu0 %v2611_v7  ;;  %2590 = vmatpush3.bf16.msra.mxu1 %v2611_v7  ;;  %v2631_v24 = vld [vmem:[%s2831_s17 + $0x2c] ss:$20 sps:$4 sm:$0xff]   ;;  %v2641_v32 = vld [vmem:[%s2831_s17 + $0x54] ss:$20 sps:$4 sm:$0xff]   ;;  %v2645_v36 = vld [vmem:[%s2831_s17 + $0x50] ss:$20 sps:$4 sm:$0xff]  }
  0x14   : > { %2303 = vmatprep.subr.bf16.mxu0 %v2612_v8  ;;  %2583 = vmatprep.subr.bf16.mxu1 %v2612_v8  ;;  %v2633_v25 = vld [vmem:[%s2831_s17 + $0x20c] ss:$20 sps:$4 sm:$0xff]   ;;  %v2643_v33 = vld [vmem:[%s2831_s17 + $0x234] ss:$20 sps:$4 sm:$0xff]   ;;  %v2646_v38 = vld [vmem:[%s2831_s17 + $0x230] ss:$20 sps:$4 sm:$0xff]  }
  0x15   : > { %1215 = vmatprep.mubr.bf16.mxu1 %v2625_v12  ;;  %v2651_v41 = vld [vmem:[%s2831_s17 + $0x7c] ss:$20 sps:$4 sm:$0xff]   ;;  %v2655_v44 = vld [vmem:[%s2831_s17 + $0x78] ss:$20 sps:$4 sm:$0xff]   ;;  %v2667_v54 = vld [vmem:[%s2831_s17 + $0xa0] ss:$20 sps:$4 sm:$0xff]  }
  0x16   : > { %v2653_v42 = vld [vmem:[%s2831_s17 + $0x25c] ss:$20 sps:$4 sm:$0xff]   ;;  %v2656_v45 = vld [vmem:[%s2831_s17 + $0x258] ss:$20 sps:$4 sm:$0xff]   ;;  %v2670_v57 = vld [vmem:[%s2831_s17 + $0x34] ss:$20 sps:$4 sm:$0xff]  }
  0x17   : > { %2304 = vmatpush3.bf16.msra.mxu0 %v2613_v9  ;;  %2591 = vmatpush3.bf16.msra.mxu1 %v2613_v9  ;;  %v2662_v50 = vld [vmem:[%s2831_s17 + $0xa4] ss:$20 sps:$4 sm:$0xff]   ;;  %v2666_v51 = vld [vmem:[%s2831_s17 + $0xc] ss:$20 sps:$4 sm:$0xff]   ;;  %v2664_v53 = vld [vmem:[%s2831_s17 + $0x8] ss:$20 sps:$4 sm:$0xff]  }
  0x18   : > { %2305 = vmatprep.subr.bf16.mxu0 %v2614_v10  ;;  %2584 = vmatprep.subr.bf16.mxu1 %v2614_v10  ;;  %v2668_v55 = vld [vmem:[%s2831_s17 + $0xcc] ss:$20 sps:$4 sm:$0xff]   ;;  %v2699_v56 = vld [vmem:[%s3357_s1 + $0x118] sm:$0xff]   ;;  %v2673_v59 = vld [vmem:[%s2831_s17 + $0x30] ss:$20 sps:$4 sm:$0xff]  }
  0x19   : > { %v2672_v58 = vld [vmem:[%s2831_s17 + $0xc8] ss:$20 sps:$4 sm:$0xff]   ;;  %v2678_v62 = vld [vmem:[%s2831_s17 + $0xf0] ss:$20 sps:$4 sm:$0xff]   ;;  %v2679_v63 = vld [vmem:[%s2831_s17 + $0x58] ss:$20 sps:$4 sm:$0xff]  }
  0x1a   : > { %v2674_v60 = vld [vmem:[%s2831_s17 + $0xf4] ss:$20 sps:$4 sm:$0xff]   ;;  %v2676_v61 = vld [vmem:[%s2831_s17 + $0x5c] ss:$20 sps:$4 sm:$0xff]   ;;  %v2683_v1 = vld [vmem:[%s2831_s17 + $0x84] ss:$20 sps:$4 sm:$0xff]  }
  0x1b   : > { %2306 = vmatpush3.bf16.msra.mxu0 %v2615_v13  ;;  %2592 = vmatpush3.bf16.msra.mxu1 %v2615_v13  ;;  %v2681_v0 = vld [vmem:[%s2831_s17 + $0x11c] ss:$20 sps:$4 sm:$0xff]   ;;  %v2685_v2 = vld [vmem:[%s2831_s17 + $0x118] ss:$20 sps:$4 sm:$0xff]   ;;  %v2686_v3 = vld [vmem:[%s2831_s17 + $0x80] ss:$20 sps:$4 sm:$0xff]  }
  0x1c   : > { %2307 = vmatprep.subr.bf16.mxu0 %v2616_v14  ;;  %2585 = vmatprep.subr.bf16.mxu1 %v2616_v14  ;;  %v2687_v4 = vld [vmem:[%s2831_s17 + $0x144] ss:$20 sps:$4 sm:$0xff]   ;;  %v2689_v5 = vld [vmem:[%s2831_s17 + $0xac] ss:$20 sps:$4 sm:$0xff]   ;;  %v2692_v7 = vld [vmem:[%s2831_s17 + $0xa8] ss:$20 sps:$4 sm:$0xff]  }
  0x1d   : > { %v2691_v6 = vld [vmem:[%s2831_s17 + $0x140] ss:$20 sps:$4 sm:$0xff]   ;;  %v2697_v10 = vld [vmem:[%s2831_s17 + $0x168] ss:$20 sps:$4 sm:$0xff]   ;;  %v2698_v11 = vld [vmem:[%s2831_s17 + $0xd0] ss:$20 sps:$4 sm:$0xff]  }
  0x1e   : > { %v2693_v8 = vld [vmem:[%s2831_s17 + $0x16c] ss:$20 sps:$4 sm:$0xff]   ;;  %v2695_v9 = vld [vmem:[%s2831_s17 + $0xd4] ss:$20 sps:$4 sm:$0xff]   ;;  %v2702_v13 = vld [vmem:[%s2831_s17 + $0xfc] ss:$20 sps:$4 sm:$0xff]  }
  0x1f   : > { %2308 = vmatpush3.bf16.msra.mxu0 %v2617_v15  ;;  %2593 = vmatpush3.bf16.msra.mxu1 %v2617_v15  ;;  %v2700_v12 = vld [vmem:[%s2831_s17 + $0x194] ss:$20 sps:$4 sm:$0xff]   ;;  %v2704_v14 = vld [vmem:[%s2831_s17 + $0x190] ss:$20 sps:$4 sm:$0xff]   ;;  %v2705_v15 = vld [vmem:[%s2831_s17 + $0xf8] ss:$20 sps:$4 sm:$0xff]  }
  0x20   : > { %2309 = vmatprep.subr.bf16.mxu0 %v2618_v16  ;;  %2586 = vmatprep.subr.bf16.mxu1 %v2618_v16  ;;  %v2706_v16 = vld [vmem:[%s2831_s17 + $0x1bc] ss:$20 sps:$4 sm:$0xff]  }
  0x23   : > { %2310 = vmatpush3.bf16.msra.mxu0 %v2619_v17  ;;  %2594 = vmatpush3.bf16.msra.mxu1 %v2619_v17  ;;  %v2708_v17 = vld [vmem:[%s2831_s17 + $0x124] ss:$20 sps:$4 sm:$0xff]  }
  0x24   : > { %2407 = vmatprep.subr.bf16.mxu1 %v2626_v18  ;;  %2539 = vmatprep.subr.bf16.mxu0 %v2629_v19  ;;  %v2710_v18 = vld [vmem:[%s2831_s17 + $0x1b8] ss:$20 sps:$4 sm:$0xff]  }
  0x26   : > { %1120 = vmatmul.mubr.bf16.vlgmr.msra.gmra.mrb[0].mxu0 %v2620_v20  ;;  %1216 = vmatmul.mubr.bf16.vlgmr.msra.gmra.mrb[0].mxu1 %v2623_v21  ;;  %v2712_v20 = vld [vmem:[%s2831_s17 + $0x14c] ss:$20 sps:$4 sm:$0xff]   ;;  %v2714_v21 = vld [vmem:[%s2831_s17 + $0x10] ss:$20 sps:$4 sm:$0xff]  }
  0x27   : > { %2408 = vmatpush3.bf16.msra.mxu1 %v2627_v22  ;;  %2540 = vmatpush3.bf16.msra.mxu0 %v2629_v19  ;;  %v2711_v19 = vld [vmem:[%s2831_s17 + $0x120] ss:$20 sps:$4 sm:$0xff]   ;;  %v2715_v22 = vld [vmem:[%s2831_s17 + $0x148] ss:$20 sps:$4 sm:$0xff]  }
  0x28   : > { %2409 = vmatprep.subr.bf16.mxu1 %v2628_v23  ;;  %1127 = vmatprep.mubr.bf16.mxu0 %v2631_v24  ;;  %v2716_v23 = vld [vmem:[%s2831_s17 + $0x38] ss:$20 sps:$4 sm:$0xff]   ;;  %v2717_v24 = vld [vmem:[%s2831_s17 + $0x174] ss:$20 sps:$4 sm:$0xff]  }
  0x29   : > { %1223 = vmatprep.mubr.bf16.mxu1 %v2633_v25  ;;  %2541 = vmatprep.subr.bf16.mxu0 %v2660_v35  ;;  %v2719_v25 = vld [vmem:[%s2831_s17 + $0x60] ss:$20 sps:$4 sm:$0xff]  }
  0x2b   : > { %2410 = vmatpush3.bf16.msra.mxu1 %v2630_v26  ;;  %2542 = vmatpush3.bf16.msra.mxu0 %v2660_v35  ;;  %v2720_v26 = vld [vmem:[%s2831_s17 + $0x170] ss:$20 sps:$4 sm:$0xff]   ;;  %v2731_v35 = vld [vmem:[%s2831_s17 + $0x128] ss:$20 sps:$4 sm:$0xff]  }
  0x2c   : > { %2411 = vmatprep.subr.bf16.mxu1 %v2637_v28  ;;  %2543 = vmatprep.subr.bf16.mxu0 %v2680_v47  ;;  %v2722_v28 = vld [vmem:[%s2831_s17 + $0x19c] ss:$20 sps:$4 sm:$0xff]  }
  0x2e   : > { %1128 = vmatmul.mubr.bf16.gmra.mrb[4].mxu0 %v2635_v27  ;;  %1224 = vmatmul.mubr.bf16.gmra.mrb[4].mxu1 %v2636_v29  ;;  %v2721_v27 = vld [vmem:[%s2831_s17 + $0x88] ss:$20 sps:$4 sm:$0xff]   ;;  %v2724_v29 = vld [vmem:[%s2831_s17 + $0xb0] ss:$20 sps:$4 sm:$0xff]  }
  0x2f   : > { %2412 = vmatpush3.bf16.msra.mxu1 %v2638_v30  ;;  %1135 = vmatprep.mubr.bf16.mxu0 %v2641_v32  ;;  %v2725_v30 = vld [vmem:[%s2831_s17 + $0x198] ss:$20 sps:$4 sm:$0xff]  }
  0x30   : > { %2413 = vmatprep.subr.bf16.mxu1 %v2639_v31  ;;  %1231 = vmatprep.mubr.bf16.mxu1 %v2643_v33  ;;  %v2726_v31 = vld [vmem:[%s2831_s17 + $0xd8] ss:$20 sps:$4 sm:$0xff]   ;;  %v2729_v33 = vld [vmem:[%s2831_s17 + $0x100] ss:$20 sps:$4 sm:$0xff]  }
  0x31   : > { %2544 = vmatpush3.bf16.msra.mxu0 %v2680_v47  ;;  %v2727_v32 = vld [vmem:[%s2831_s17 + $0x1c4] ss:$20 sps:$4 sm:$0xff]  }
  0x32   : > { %2545 = vmatprep.subr.bf16.mxu0 %v2699_v56  ;;  %v2746_v47 = vld [vmem:[%s2831_s17 + $0x218] ss:$20 sps:$4 sm:$0xff]  }
  0x33   : > { %2414 = vmatpush3.bf16.msra.mxu1 %v2640_v34  ;;  %v2730_v34 = vld [vmem:[%s2831_s17 + $0x1c0] ss:$20 sps:$4 sm:$0xff]  }
  0x34   : > { %2415 = vmatprep.subr.bf16.mxu1 %v2647_v37  ;;  %v2734_v37 = vld [vmem:[%s2831_s17 + $0x150] ss:$20 sps:$4 sm:$0xff]  }
  0x35   : > { %2546 = vmatpush3.bf16.msra.mxu0 %v2699_v56 }
  0x36   : > { %1136 = vmatmul.mubr.bf16.gmra.mrb[8].mxu0 %v2645_v36  ;;  %1232 = vmatmul.mubr.bf16.gmra.mrb[8].mxu1 %v2646_v38  ;;  %v2732_v36 = vld [vmem:[%s2831_s17 + $0x1ec] ss:$20 sps:$4 sm:$0xff]   ;;  %v2735_v38 = vld [vmem:[%s2831_s17 + $0x1e8] ss:$20 sps:$4 sm:$0xff]  }
  0x37   : > { %2416 = vmatpush3.bf16.msra.mxu1 %v2648_v39  ;;  %1143 = vmatprep.mubr.bf16.mxu0 %v2651_v41  ;;  %v2736_v39 = vld [vmem:[%s2831_s17 + $0x178] ss:$20 sps:$4 sm:$0xff]   ;;  %v2739_v41 = vld [vmem:[%s2831_s17 + $0x1a0] ss:$20 sps:$4 sm:$0xff]  }
  0x38   : > { %2417 = vmatprep.subr.bf16.mxu1 %v2649_v40  ;;  %1239 = vmatprep.mubr.bf16.mxu1 %v2653_v42  ;;  %v2737_v40 = vld [vmem:[%s2831_s17 + $0x214] ss:$20 sps:$4 sm:$0xff]   ;;  %v2740_v42 = vld [vmem:[%s2831_s17 + $0x210] ss:$20 sps:$4 sm:$0xff]  }
  0x3b   : > { %2418 = vmatpush3.bf16.msra.mxu1 %v2650_v43  ;;  %v2741_v43 = vld [vmem:[%s2831_s17 + $0x1c8] ss:$20 sps:$4 sm:$0xff]  }
  0x3c   : > { %2419 = vmatprep.subr.bf16.mxu1 %v2657_v46  ;;  %v2745_v46 = vld [vmem:[%s2831_s17 + $0x238] ss:$20 sps:$4 sm:$0xff]  }
  0x3e   : > { %1144 = vmatmul.mubr.bf16.gmra.mrb[12].mxu0 %v2655_v44  ;;  %1240 = vmatmul.mubr.bf16.gmra.mrb[12].mxu1 %v2656_v45  ;;  %v2742_v44 = vld [vmem:[%s2831_s17 + $0x23c] ss:$20 sps:$4 sm:$0xff]  }
  0x3f   : > { %2420 = vmatpush3.bf16.msra.mxu1 %v2658_v48  ;;  %1151 = vmatprep.mubr.bf16.mxu0 %v2662_v50  ;;  %v2744_v45 = vld [vmem:[%s2831_s17 + $0x1f0] ss:$20 sps:$4 sm:$0xff]   ;;  %v2750_v50 = vld [vmem:[%s2831_s17 + $0x260] ss:$20 sps:$4 sm:$0xff]  }
  0x40   : > { %2421 = vmatprep.subr.bf16.mxu1 %v2659_v49  ;;  %1280 = vmatprep.mubr.bf16.mxu1 %v2666_v51  ;;  %v2747_v48 = vld [vmem:[%s2831_s17 + $0x264] ss:$20 sps:$4 sm:$0xff]   ;;  %v2749_v49 = vld [vmem:[%s2831_s17 + $0x240] ss:$20 sps:$4 sm:$0xff]   ;;  %v2751_v51 = vld [vmem:[%s2831_s17 + $0x268] ss:$20 sps:$4 sm:$0xff]  }
  0x41   : > { %s2013_s17 = sshll.u32 %s3363_s22, 2 }
  0x42   : > { %s3081_s7 = scalar_lea.vmem %s3360_s4, %s2013_s17  ;;  %s3130_s14 = scalar_lea.vmem %s3361_s5, %s2013_s17 }
  0x43   : > { %2422 = vmatpush3.bf16.msra.mxu1 %v2661_v52 }
  0x46   : > { %1152 = vmatmul.mubr.bf16.gmra.mrb[16].mxu0 %v2667_v54  ;;  %1281 = vmatmul.mubr.bf16.vlgmr.msra.gmra.mrb[16].mxu1 %v2664_v53 }
  0x47   : > { %1159 = vmatprep.mubr.bf16.mxu0 %v2668_v55  ;;  %1288 = vmatprep.mubr.bf16.mxu1 %v2670_v57 }
  0x4e   : > { %1160 = vmatmul.mubr.bf16.gmra.mrb[20].mxu0 %v2672_v58  ;;  %1289 = vmatmul.mubr.bf16.gmra.mrb[20].mxu1 %v2673_v59 }
  0x4f   : > { %1167 = vmatprep.mubr.bf16.mxu0 %v2674_v60  ;;  %1296 = vmatprep.mubr.bf16.mxu1 %v2676_v61 }
  0x56   : > { %1168 = vmatmul.mubr.bf16.gmra.mrb[24].mxu0 %v2678_v62  ;;  %1297 = vmatmul.mubr.bf16.gmra.mrb[24].mxu1 %v2679_v63 }
  0x57   : > { %1175 = vmatprep.mubr.bf16.mxu0 %v2681_v0  ;;  %1304 = vmatprep.mubr.bf16.mxu1 %v2683_v1 }
  0x5e   : > { %1176 = vmatmul.mubr.bf16.gmra.mrb[28].mxu0 %v2685_v2  ;;  %1305 = vmatmul.mubr.bf16.gmra.mrb[28].mxu1 %v2686_v3 }
  0x5f   : > { %1183 = vmatprep.mubr.bf16.mxu0 %v2687_v4  ;;  %1312 = vmatprep.mubr.bf16.mxu1 %v2689_v5 }
  0x66   : > { %1184 = vmatmul.mubr.bf16.gmra.mrb[32].mxu0 %v2691_v6  ;;  %1313 = vmatmul.mubr.bf16.gmra.mrb[32].mxu1 %v2692_v7 }
  0x67   : > { %1191 = vmatprep.mubr.bf16.mxu0 %v2693_v8  ;;  %1320 = vmatprep.mubr.bf16.mxu1 %v2695_v9 }
  0x6e   : > { %1192 = vmatmul.mubr.bf16.gmra.mrb[36].mxu0 %v2697_v10  ;;  %1321 = vmatmul.mubr.bf16.gmra.mrb[36].mxu1 %v2698_v11 }
  0x6f   : > { %1199 = vmatprep.mubr.bf16.mxu0 %v2700_v12  ;;  %1328 = vmatprep.mubr.bf16.mxu1 %v2702_v13 }
  0x76   : > { %1200 = vmatmul.mubr.bf16.gmra.mrb[40].mxu0 %v2704_v14  ;;  %1329 = vmatmul.mubr.bf16.gmra.mrb[40].mxu1 %v2705_v15 }
  0x77   : > { %1207 = vmatprep.mubr.bf16.mxu0 %v2706_v16  ;;  %1336 = vmatprep.mubr.bf16.mxu1 %v2708_v17 }
  0x7e   : > { %1208 = vmatmul.mubr.bf16.gmra.mrb[44].mxu0 %v2710_v18  ;;  %1337 = vmatmul.mubr.bf16.gmra.mrb[44].mxu1 %v2711_v19 }
  0x7f   : > { %1344 = vmatprep.mubr.bf16.mxu1 %v2712_v20  ;;  %2547 = vmatprep.mubr.msk.bf16.mxu0 %vm1038_vm0, %v2714_v21 }
  0x86   : > { %1345 = vmatmul.mubr.bf16.gmra.mrb[48].mxu1 %v2715_v22  ;;  %2548 = vmatmul.mubr.msk.bf16.vlgmr.msra.gmra.mrb[48].mxu0 %vm1038_vm0, %v2716_v23 }
  0x87   : > { %1352 = vmatprep.mubr.bf16.mxu1 %v2717_v24  ;;  %2551 = vmatprep.mubr.msk.bf16.mxu0 %vm1038_vm0, %v2719_v25 }
  0x8e   : > { %1353 = vmatmul.mubr.bf16.gmra.mrb[52].mxu1 %v2720_v26  ;;  %2552 = vmatmul.mubr.msk.bf16.gmra.mrb[52].mxu0 %vm1038_vm0, %v2721_v27 }
  0x8f   : > { %1360 = vmatprep.mubr.bf16.mxu1 %v2722_v28  ;;  %2555 = vmatprep.mubr.msk.bf16.mxu0 %vm1038_vm0, %v2724_v29 }
  0x96   : > { %1361 = vmatmul.mubr.bf16.gmra.mrb[56].mxu1 %v2725_v30  ;;  %2556 = vmatmul.mubr.msk.bf16.gmra.mrb[56].mxu0 %vm1038_vm0, %v2726_v31 }
  0x97   : > { %1368 = vmatprep.mubr.bf16.mxu1 %v2727_v32  ;;  %2559 = vmatprep.mubr.msk.bf16.mxu0 %vm1038_vm0, %v2729_v33 }
  0x9e   : > { %1369 = vmatmul.mubr.bf16.gmra.mrb[60].mxu1 %v2730_v34  ;;  %2560 = vmatmul.mubr.msk.bf16.gmra.mrb[60].mxu0 %vm1038_vm0, %v2731_v35 }
  0x9f   : > { %1376 = vmatprep.mubr.bf16.mxu1 %v2732_v36  ;;  %2563 = vmatprep.mubr.msk.bf16.mxu0 %vm1038_vm0, %v2734_v37 }
  0xa6   : > { %1377 = vmatmul.mubr.bf16.gmra.mrb[64].mxu1 %v2735_v38  ;;  %2564 = vmatmul.mubr.msk.bf16.gmra.mrb[64].mxu0 %vm1038_vm0, %v2736_v39 }
  0xa7   : > { %1384 = vmatprep.mubr.bf16.mxu1 %v2737_v40  ;;  %2567 = vmatprep.mubr.msk.bf16.mxu0 %vm1038_vm0, %v2739_v41 }
  0xae   : > { %1385 = vmatmul.mubr.bf16.gmra.mrb[68].mxu1 %v2740_v42  ;;  %2568 = vmatmul.mubr.msk.bf16.gmra.mrb[68].mxu0 %vm1038_vm0, %v2741_v43 }
  0xaf   : > { %1392 = vmatprep.mubr.bf16.mxu1 %v2742_v44  ;;  %2571 = vmatprep.mubr.msk.bf16.mxu0 %vm1038_vm0, %v2744_v45 }
  0xb6   : > { %1393 = vmatmul.mubr.bf16.gmra.mrb[72].mxu1 %v2745_v46  ;;  %2572 = vmatmul.mubr.msk.bf16.gmra.mrb[72].mxu0 %vm1038_vm0, %v2746_v47 }
  0xb7   : > { %1400 = vmatprep.mubr.bf16.mxu1 %v2747_v48  ;;  %2575 = vmatprep.mubr.msk.bf16.mxu0 %vm1038_vm0, %v2749_v49 }
  0xbe   : > { %1401 = vmatmul.mubr.bf16.gmra.mrb[76].mxu1 %v2750_v50  ;;  %2576 = vmatmul.mubr.msk.bf16.gmra.mrb[76].mxu0 %vm1038_vm0, %v2751_v51 }
  0xf9   : > { %v2383_v52 = vpop.f32.mrb[0].mxu1  ;;  %v2311_v53 = vpop.f32.mrb[0].mxu0 }
  0xfa   : > { %v2384_v54 = vpop.f32.mrb[1].mxu1  ;;  %v2312_v55 = vpop.f32.mrb[1].mxu0 }
  0xfb   : > { %v3010_v56 = vadd.f32 %v2384_v54, %v2383_v52  ;;  %v2386_v57 = vpop.f32.mrb[2].mxu1  ;;  %v2313_v58 = vadd.f32 %v2312_v55, %v2311_v53  ;;  %v2314_v59 = vpop.f32.mrb[2].mxu0 }
  0xfc   : > { %v2387_v60 = vpop.f32.mrb[3].mxu1  ;;  %v2315_v61 = vpop.f32.mrb[3].mxu0 }
  0xfd   : > { %v3012_v62 = vadd.f32 %v2387_v60, %v2386_v57  ;;  %v2316_v63 = vadd.f32 %v2315_v61, %v2314_v59 }
 0x101   : > { %v2389_v0 = vpop.f32.mrb[4].mxu1  ;;  %v2317_v1 = vpop.f32.mrb[4].mxu0 }
 0x102   : > { %v2390_v2 = vpop.f32.mrb[5].mxu1  ;;  %v2318_v3 = vpop.f32.mrb[5].mxu0 }
 0x103   : > { %v3014_v4 = vadd.f32 %v2390_v2, %v2389_v0  ;;  %v2392_v5 = vpop.f32.mrb[6].mxu1  ;;  %v2319_v6 = vadd.f32 %v2318_v3, %v2317_v1  ;;  %v2320_v7 = vpop.f32.mrb[6].mxu0 }
 0x104   : > { %v2393_v8 = vpop.f32.mrb[7].mxu1  ;;  %v2321_v9 = vpop.f32.mrb[7].mxu0 }
 0x105   : > { %v3016_v10 = vadd.f32 %v2393_v8, %v2392_v5  ;;  %v2322_v11 = vadd.f32 %v2321_v9, %v2320_v7 }
 0x109   : > { %v2395_v12 = vpop.f32.mrb[8].mxu1  ;;  %v2323_v13 = vpop.f32.mrb[8].mxu0 }
 0x10a   : > { %v2396_v14 = vpop.f32.mrb[9].mxu1  ;;  %v2324_v15 = vpop.f32.mrb[9].mxu0 }
 0x10b   : > { %v3018_v16 = vadd.f32 %v2396_v14, %v2395_v12  ;;  %v2398_v17 = vpop.f32.mrb[10].mxu1  ;;  %v2325_v18 = vadd.f32 %v2324_v15, %v2323_v13  ;;  %v2326_v19 = vpop.f32.mrb[10].mxu0 }
 0x10c   : > { %v2399_v20 = vpop.f32.mrb[11].mxu1  ;;  %v2327_v21 = vpop.f32.mrb[11].mxu0 }
 0x10d   : > { %v3020_v22 = vadd.f32 %v2399_v20, %v2398_v17  ;;  %v2328_v23 = vadd.f32 %v2327_v21, %v2326_v19 }
 0x111   : > { %v2401_v24 = vpop.f32.mrb[12].mxu1  ;;  %v2329_v25 = vpop.f32.mrb[12].mxu0 }
 0x112   : > { %v2402_v26 = vpop.f32.mrb[13].mxu1  ;;  %v2330_v27 = vpop.f32.mrb[13].mxu0 }
 0x113   : > { %v3022_v28 = vadd.f32 %v2402_v26, %v2401_v24  ;;  %v2404_v29 = vpop.f32.mrb[14].mxu1  ;;  %v2331_v30 = vadd.f32 %v2330_v27, %v2329_v25  ;;  %v2332_v31 = vpop.f32.mrb[14].mxu0 }
 0x114   : > { %v2405_v32 = vpop.f32.mrb[15].mxu1  ;;  %v2333_v33 = vpop.f32.mrb[15].mxu0 }
 0x115   : > { %v3024_v34 = vadd.f32 %v2405_v32, %v2404_v29  ;;  %v2334_v35 = vadd.f32 %v2333_v33, %v2332_v31 }
 0x119   : > { %v2423_v36 = vpop.f32.mrb[16].mxu1  ;;  %v2335_v37 = vpop.f32.mrb[16].mxu0 }
 0x11a   : > { %v2424_v38 = vpop.f32.mrb[17].mxu1  ;;  %v2336_v39 = vpop.f32.mrb[17].mxu0 }
 0x11b   : > { %v2425_v40 = vadd.f32 %v2424_v38, %v2423_v36  ;;  %v2426_v41 = vpop.f32.mrb[18].mxu1  ;;  %v2337_v42 = vadd.f32 %v2336_v39, %v2335_v37  ;;  %v2338_v43 = vpop.f32.mrb[18].mxu0 }
 0x11c   : > { %v2427_v44 = vpop.f32.mrb[19].mxu1  ;;  %v2339_v45 = vpop.f32.mrb[19].mxu0 }
 0x11d   : > { %v2428_v46 = vadd.f32 %v2427_v44, %v2426_v41  ;;  %v2340_v47 = vadd.f32 %v2339_v45, %v2338_v43  ;;  %v3026_v48 = vadd.f32 %v2425_v40, %v2313_v58 }
 0x11f   : > { %v3028_v49 = vadd.f32 %v2428_v46, %v2316_v63 }
 0x121   : > { %v2429_v50 = vpop.f32.mrb[20].mxu1  ;;  %v2341_v51 = vpop.f32.mrb[20].mxu0 }
 0x122   : > { %v2430_v52 = vpop.f32.mrb[21].mxu1  ;;  %v2342_v53 = vpop.f32.mrb[21].mxu0 }
 0x123   : > { %v2431_v54 = vadd.f32 %v2430_v52, %v2429_v50  ;;  %v2432_v55 = vpop.f32.mrb[22].mxu1  ;;  %v2343_v57 = vadd.f32 %v2342_v53, %v2341_v51  ;;  %v2344_v59 = vpop.f32.mrb[22].mxu0 }
 0x124   : > { %v2433_v60 = vpop.f32.mrb[23].mxu1  ;;  %v2345_v61 = vpop.f32.mrb[23].mxu0 }
 0x125   : > { %v2434_v0 = vadd.f32 %v2433_v60, %v2432_v55  ;;  %v2346_v1 = vadd.f32 %v2345_v61, %v2344_v59  ;;  %v3030_v2 = vadd.f32 %v2431_v54, %v2319_v6 }
 0x127   : > { %v3032_v3 = vadd.f32 %v2434_v0, %v2322_v11 }
 0x129   : > { %v2435_v58 = vpop.f32.mrb[24].mxu1  ;;  %v2347_v5 = vpop.f32.mrb[24].mxu0 }
 0x12a   : > { %v2436_v63 = vpop.f32.mrb[25].mxu1  ;;  %v2348_v7 = vpop.f32.mrb[25].mxu0 }
 0x12b   : > { %v2437_v8 = vadd.f32 %v2436_v63, %v2435_v58  ;;  %v2438_v9 = vpop.f32.mrb[26].mxu1  ;;  %v2349_v12 = vadd.f32 %v2348_v7, %v2347_v5  ;;  %v2350_v13 = vpop.f32.mrb[26].mxu0 }
 0x12c   : > { %v2439_v14 = vpop.f32.mrb[27].mxu1  ;;  %v2351_v15 = vpop.f32.mrb[27].mxu0 }
 0x12d   : > { %v2440_v17 = vadd.f32 %v2439_v14, %v2438_v9  ;;  %v2352_v19 = vadd.f32 %v2351_v15, %v2350_v13  ;;  %v3034_v20 = vadd.f32 %v2437_v8, %v2325_v18 }
 0x12f   : > { %v3036_v21 = vadd.f32 %v2440_v17, %v2328_v23 }
 0x131   : > { %v2441_v6 = vpop.f32.mrb[28].mxu1  ;;  %v2353_v24 = vpop.f32.mrb[28].mxu0 }
 0x132   : > { %v2442_v11 = vpop.f32.mrb[29].mxu1  ;;  %v2354_v25 = vpop.f32.mrb[29].mxu0 }
 0x133   : > { %v2443_v26 = vadd.f32 %v2442_v11, %v2441_v6  ;;  %v2444_v27 = vpop.f32.mrb[30].mxu1  ;;  %v3038_v29 = vadd.f32 %v2354_v25, %v2353_v24  ;;  %v2356_v31 = vpop.f32.mrb[30].mxu0 }
 0x134   : > { %v2445_v32 = vpop.f32.mrb[31].mxu1  ;;  %v2357_v33 = vpop.f32.mrb[31].mxu0 }
 0x135   : > { %v2446_v36 = vadd.f32 %v2445_v32, %v2444_v27  ;;  %v2358_v37 = vadd.f32 %v2357_v33, %v2356_v31  ;;  %v3040_v38 = vadd.f32 %v2443_v26, %v2331_v30 }
 0x137   : > { %v3042_v39 = vadd.f32 %v2446_v36, %v2334_v35 }
 0x139   : > { %v2447_v18 = vpop.f32.mrb[32].mxu1  ;;  %v2359_v23 = vpop.f32.mrb[32].mxu0 }
 0x13a   : > { %v2448_v40 = vpop.f32.mrb[33].mxu1  ;;  %v2360_v41 = vpop.f32.mrb[33].mxu0 }
 0x13b   : > { %v2449_v43 = vadd.f32 %v2448_v40, %v2447_v18  ;;  %v2450_v44 = vpop.f32.mrb[34].mxu1  ;;  %v3044_v45 = vadd.f32 %v2360_v41, %v2359_v23  ;;  %v2362_v46 = vpop.f32.mrb[34].mxu0 }
 0x13c   : > { %v2451_v50 = vpop.f32.mrb[35].mxu1  ;;  %v2363_v51 = vpop.f32.mrb[35].mxu0 }
 0x13d   : > { %v2452_v52 = vadd.f32 %v2451_v50, %v2450_v44  ;;  %v3046_v53 = vadd.f32 %v2363_v51, %v2362_v46  ;;  %v3048_v54 = vadd.f32 %v2449_v43, %v2337_v42 }
 0x13f   : > { %v3050_v30 = vadd.f32 %v2452_v52, %v2340_v47 }
 0x141   : > { %v2453_v35 = vpop.f32.mrb[36].mxu1  ;;  %v2365_v55 = vpop.f32.mrb[36].mxu0 }
 0x142   : > { %v2454_v59 = vpop.f32.mrb[37].mxu1  ;;  %v2366_v60 = vpop.f32.mrb[37].mxu0 }
 0x143   : > { %v2455_v61 = vadd.f32 %v2454_v59, %v2453_v35  ;;  %v2456_v0 = vpop.f32.mrb[38].mxu1  ;;  %v3052_v58 = vadd.f32 %v2366_v60, %v2365_v55  ;;  %v2368_v5 = vpop.f32.mrb[38].mxu0  ;;  %v3088_v59 = vld [vmem:[%s3358_s2] ss:$0 sm:$0xff]  ;;  %v2280_v60 = vld [vmem:[%s3081_s7 + $0x8] sm:$0xff]  }
 0x144   : > { %v2457_v63 = vpop.f32.mrb[39].mxu1  ;;  %v2369_v7 = vpop.f32.mrb[39].mxu0 }
 0x145   : > { %v2458_v8 = vadd.f32 %v2457_v63, %v2456_v0  ;;  %v3054_v9 = vadd.f32 %v2369_v7, %v2368_v5  ;;  %v3056_v13 = vadd.f32 %v2455_v61, %v2343_v57  ;;  %v3096_v63 = vld [vmem:[%s3359_s3] ss:$0 sm:$0xff] }
 0x147   : > { %v3058_v42 = vadd.f32 %v2458_v8, %v2346_v1 }
 0x149   : > { %v2459_v47 = vpop.f32.mrb[40].mxu1  ;;  %v2371_v14 = vpop.f32.mrb[40].mxu0 }
 0x14a   : > { %v2460_v15 = vpop.f32.mrb[41].mxu1  ;;  %v2372_v17 = vpop.f32.mrb[41].mxu0 }
 0x14b   : > { %v2461_v6 = vadd.f32 %v2460_v15, %v2459_v47  ;;  %v2462_v24 = vpop.f32.mrb[42].mxu1  ;;  %v3060_v11 = vadd.f32 %v2372_v17, %v2371_v14  ;;  %v2374_v25 = vpop.f32.mrb[42].mxu0  ;;  %v2222_v15 = vunpack.c.l.bf16 %v2280_v60 }
 0x14c   : > { %v2463_v26 = vpop.f32.mrb[43].mxu1  ;;  %v2375_v27 = vpop.f32.mrb[43].mxu0 }
 0x14d   : > { %v2464_v31 = vadd.f32 %v2463_v26, %v2462_v24  ;;  %v3062_v32 = vadd.f32 %v2375_v27, %v2374_v25  ;;  %v3064_v33 = vadd.f32 %v2461_v6, %v2349_v12 }
 0x14f   : > { %v3066_v57 = vadd.f32 %v2464_v31, %v2352_v19 }
 0x151   : > { %v2465_v1 = vpop.f32.mrb[44].mxu1  ;;  %v2377_v36 = vpop.f32.mrb[44].mxu0 }
 0x152   : > { %v2466_v18 = vpop.f32.mrb[45].mxu1  ;;  %v2378_v23 = vpop.f32.mrb[45].mxu0 }
 0x153   : > { %v2467_v40 = vadd.f32 %v2466_v18, %v2465_v1  ;;  %v2468_v41 = vpop.f32.mrb[46].mxu1  ;;  %v3068_v43 = vadd.f32 %v2378_v23, %v2377_v36  ;;  %v2380_v44 = vpop.f32.mrb[46].mxu0  ;;  %v2223_v36 = vunpack.c.h.bf16 %v2280_v60  ;;  %v3109_v18 = vld [vmem:[%s3081_s7 + $0x18] sm:$0xff]   ;;  %v3112_v23 = vld [vmem:[%s3081_s7 + $0x10] sm:$0xff]  }
 0x154   : > { %v2469_v46 = vpop.f32.mrb[47].mxu1  ;;  %v2381_v50 = vpop.f32.mrb[47].mxu0  ;;  %v2226_v60 = vunpack.c.l.bf16 %v3112_v23 }
 0x155   : > { %v2470_v51 = vadd.f32 %v2469_v46, %v2468_v41  ;;  %v3071_v52 = vadd.f32 %v2381_v50, %v2380_v44  ;;  %v3074_v12 = vadd.f32 %v2467_v40, %v3038_v29  ;;  %v2217_v29 = vld [vmem:[%s3081_s7] sm:$0xff]  }
 0x156   : > { %v2218_v17 = vunpack.c.l.bf16 %v2217_v29  ;;  %v2219_v41 = vunpack.c.h.bf16 %v2217_v29 }
 0x157   : > { %v3083_v19 = vadd.f32 %v2470_v51, %v2358_v37 }
 0x159   : > { %v2471_v35 = vpop.f32.mrb[48].mxu1  ;;  %v2549_v55 = vpop.f32.mrb[48].mxu0 }
 0x15a   : > { %v1452_v61 = vadd.f32 %v2549_v55, %v3030_v2  ;;  %v2472_v0 = vpop.f32.mrb[49].mxu1  ;;  %v1443_v5 = vpop.f32.mrb[49].mxu0  ;;  %v2230_v55 = vunpack.c.l.bf16 %v3109_v18 }
 0x15b   : > { %v2473_v37 = vadd.f32 %v2472_v0, %v2471_v35  ;;  %v1444_v7 = vadd.f32 %v1443_v5, %v3026_v48  ;;  %v2474_v8 = vpop.f32.mrb[50].mxu1  ;;  %v2550_v47 = vpop.f32.mrb[50].mxu0 }
 0x15c   : > { %v1579_v14 = vmul.f32 %v3088_v59, %v1452_v61  ;;  %v1455_v2 = vadd.f32 %v2550_v47, %v3032_v3  ;;  %v2475_v6 = vpop.f32.mrb[51].mxu1  ;;  %v1446_v24 = vpop.f32.mrb[51].mxu0 }
 0x15d   : > { %v1577_v25 = vmul.f32 %v3088_v59, %v1444_v7  ;;  %v2476_v26 = vadd.f32 %v2475_v6, %v2474_v8  ;;  %v1447_v27 = vadd.f32 %v1446_v24, %v3028_v49  ;;  %v3104_v31 = vadd.f32 %v2473_v37, %v3044_v45 }
 0x15e   : > { %v1618_v48 = vadd.f32 %v3096_v63, %v1579_v14  ;;  %v1580_v1 = vmul.f32 %v3088_v59, %v1455_v2  ;;  %v2231_v37 = vunpack.c.h.bf16 %v3109_v18 }
 0x15f   : > { %v1616_v3 = vadd.f32 %v3096_v63, %v1577_v25  ;;  %v1578_v40 = vmul.f32 %v3088_v59, %v1447_v27  ;;  %v3117_v44 = vadd.f32 %v2476_v26, %v3046_v53 }
 0x160   : > { %v1714_v49 = vadd.f32 %v2222_v15, %v1618_v48  ;;  %v1619_v45 = vadd.f32 %v3096_v63, %v1580_v1 }
 0x161   : > { %v1712_v46 = vadd.f32 %v2218_v17, %v1616_v3  ;;  %v1617_v50 = vadd.f32 %v3096_v63, %v1578_v40  ;;  %v2477_v51 = vpop.f32.mrb[52].mxu1  ;;  %v2553_v35 = vpop.f32.mrb[52].mxu0 }
 0x162   : > { %v1746_v61 = vmax.f32 %v1714_v49, 0.0  ;;  %v1715_v0 = vadd.f32 %v2223_v36, %v1619_v45  ;;  %v1468_v29 = vadd.f32 %v2553_v35, %v3040_v38  ;;  %v2478_v53 = vpop.f32.mrb[53].mxu1  ;;  %v1459_v5 = vpop.f32.mrb[53].mxu0 }
 0x163   : > { %v1744_v7 = vmax.f32 %v1712_v46, 0.0  ;;  %v1713_v8 = vadd.f32 %v2219_v41, %v1617_v50  ;;  %v2479_v47 = vadd.f32 %v2478_v53, %v2477_v51  ;;  %v1460_v14 = vadd.f32 %v1459_v5, %v3034_v20  ;;  %v2480_v15 = vpop.f32.mrb[54].mxu1  ;;  %v2554_v17 = vpop.f32.mrb[54].mxu0  ;;  %v3142_v41 = vld [vmem:[%s3081_s7 + $0x28] sm:$0xff]  }
 0x164   : > { %v2186_v38 = vpack.c.bf16 %v1746_v61, %v1746_v61  ;;  %v1747_v2 = vmax.f32 %v1715_v0, 0.0  ;;  %v1583_v6 = vmul.f32 %v3088_v59, %v1468_v29  ;;  %v1471_v24 = vadd.f32 %v2554_v17, %v3042_v39  ;;  %v2481_v25 = vpop.f32.mrb[55].mxu1  ;;  %v1462_v26 = vpop.f32.mrb[55].mxu0  ;;  %v3145_v39 = vld [vmem:[%s3081_s7 + $0x20] sm:$0xff]  }
 0x165   : > { %v2184_v27 = vpack.c.bf16 %v1744_v7, %v1744_v7  ;;  %v1745_v48 = vmax.f32 %v1713_v8, 0.0  ;;  %v1581_v1 = vmul.f32 %v3088_v59, %v1460_v14  ;;  %v2482_v36 = vadd.f32 %v2481_v25, %v2480_v15 }
 0x166   : > { %1907 = vst.msk [vmem:[%s3130_s14 + $0x8] sm:$0xf] %vm1904_vm1, %v2186_v38  ;;  %v2187_v20 = vpack.c.bf16 %v1747_v2, %v1747_v2  ;;  %v1622_v18 = vadd.f32 %v3096_v63, %v1583_v6  ;;  %v1584_v3 = vmul.f32 %v3088_v59, %v1471_v24  ;;  %v1463_v40 = vadd.f32 %v1462_v26, %v3036_v21 }
 0x167   : > { %1905 = vst.msk [vmem:[%s3130_s14] sm:$0xf] %vm1904_vm1, %v2184_v27  ;;  %v2185_v49 = vpack.c.bf16 %v1745_v48, %v1745_v48  ;;  %v1620_v45 = vadd.f32 %v3096_v63, %v1581_v1  ;;  %v3151_v46 = vadd.f32 %v2479_v47, %v3052_v58  ;;  %v3154_v50 = vadd.f32 %v2482_v36, %v3054_v9 }
 0x168   : > { %1908 = vst.msk [vmem:[%s3130_s14 + $0xc] sm:$0xf] %vm1904_vm1, %v2187_v20  ;;  %v1718_v51 = vadd.f32 %v2230_v55, %v1622_v18  ;;  %v1623_v21 = vadd.f32 %v3096_v63, %v1584_v3  ;;  %v1582_v35 = vmul.f32 %v3088_v59, %v1463_v40  ;;  %v2227_v61 = vunpack.c.h.bf16 %v3112_v23  ;;  %v3174_v20 = vld [vmem:[%s3081_s7 + $0x38] sm:$0xff]  }
 0x169   : > { %1906 = vst.msk [vmem:[%s3130_s14 + $0x4] sm:$0xf] %vm1904_vm1, %v2185_v49  ;;  %v1716_v0 = vadd.f32 %v2226_v60, %v1620_v45  ;;  %v2483_v29 = vpop.f32.mrb[56].mxu1  ;;  %v2557_v53 = vpop.f32.mrb[56].mxu0  ;;  %v2238_v58 = vunpack.c.l.bf16 %v3142_v41  ;;  %v2234_v5 = vunpack.c.l.bf16 %v3145_v39  ;;  %v2239_v9 = vunpack.c.h.bf16 %v3142_v41 }
 0x16a   : > { %v1750_v7 = vmax.f32 %v1718_v51, 0.0  ;;  %v1719_v8 = vadd.f32 %v2231_v37, %v1623_v21  ;;  %v1621_v55 = vadd.f32 %v3096_v63, %v1582_v35  ;;  %v1484_v47 = vadd.f32 %v2557_v53, %v3056_v13  ;;  %v2484_v14 = vpop.f32.mrb[57].mxu1  ;;  %v1475_v15 = vpop.f32.mrb[57].mxu0 }
 0x16b   : > { %v1748_v23 = vmax.f32 %v1716_v0, 0.0  ;;  %v2485_v17 = vadd.f32 %v2484_v14, %v2483_v29  ;;  %v1476_v60 = vadd.f32 %v1475_v15, %v3048_v54  ;;  %v2486_v38 = vpop.f32.mrb[58].mxu1  ;;  %v2558_v2 = vpop.f32.mrb[58].mxu0  ;;  %v2235_v6 = vunpack.c.h.bf16 %v3145_v39  ;;  %v3181_v39 = vld [vmem:[%s3081_s7 + $0x30] sm:$0xff]  }
 0x16c   : > { %v2190_v24 = vpack.c.bf16 %v1750_v7, %v1750_v7  ;;  %v1751_v25 = vmax.f32 %v1719_v8, 0.0  ;;  %v1717_v37 = vadd.f32 %v2227_v61, %v1621_v55  ;;  %v1587_v26 = vmul.f32 %v3088_v59, %v1484_v47  ;;  %v2487_v13 = vpop.f32.mrb[59].mxu1  ;;  %v1478_v27 = vpop.f32.mrb[59].mxu0 }
 0x16d   : > { %v2188_v48 = vpack.c.bf16 %v1748_v23, %v1748_v23  ;;  %v1585_v1 = vmul.f32 %v3088_v59, %v1476_v60  ;;  %v1487_v36 = vadd.f32 %v2558_v2, %v3058_v42  ;;  %v2488_v54 = vadd.f32 %v2487_v13, %v2486_v38 }
 0x16e   : > { %1911 = vst.msk [vmem:[%s3130_s14 + $0x18] sm:$0xf] %vm1904_vm1, %v2190_v24  ;;  %v2191_v18 = vpack.c.bf16 %v1751_v25, %v1751_v25  ;;  %v1749_v3 = vmax.f32 %v1717_v37, 0.0  ;;  %v1626_v40 = vadd.f32 %v3096_v63, %v1587_v26  ;;  %v1479_v41 = vadd.f32 %v1478_v27, %v3050_v30 }
 0x16f   : > { %1909 = vst.msk [vmem:[%s3130_s14 + $0x10] sm:$0xf] %vm1904_vm1, %v2188_v48  ;;  %v1624_v49 = vadd.f32 %v3096_v63, %v1585_v1  ;;  %v1588_v42 = vmul.f32 %v3088_v59, %v1487_v36  ;;  %v3188_v45 = vadd.f32 %v2485_v17, %v3060_v11  ;;  %v3191_v51 = vadd.f32 %v2488_v54, %v3062_v32 }
 0x170   : > { %1912 = vst.msk [vmem:[%s3130_s14 + $0x1c] sm:$0xf] %vm1904_vm1, %v2191_v18  ;;  %v2189_v21 = vpack.c.bf16 %v1749_v3, %v1749_v3  ;;  %v1722_v35 = vadd.f32 %v2238_v58, %v1626_v40  ;;  %v1586_v30 = vmul.f32 %v3088_v59, %v1479_v41  ;;  %v2246_v61 = vunpack.c.l.bf16 %v3174_v20 }
 0x171   : > { %v1720_v0 = vadd.f32 %v2234_v5, %v1624_v49  ;;  %v1627_v29 = vadd.f32 %v3096_v63, %v1588_v42  ;;  %v2489_v53 = vpop.f32.mrb[60].mxu1  ;;  %v2561_v7 = vpop.f32.mrb[60].mxu0  ;;  %v2242_v8 = vunpack.c.l.bf16 %v3181_v39  ;;  %v2247_v11 = vunpack.c.h.bf16 %v3174_v20  ;;  %v3215_v20 = vld [vmem:[%s3081_s7 + $0x48] sm:$0xff]  }
 0x172   : > { %1910 = vst.msk [vmem:[%s3130_s14 + $0x14] sm:$0xf] %vm1904_vm1, %v2189_v21  ;;  %v1754_v32 = vmax.f32 %v1722_v35, 0.0  ;;  %v1625_v55 = vadd.f32 %v3096_v63, %v1586_v30  ;;  %v1500_v58 = vadd.f32 %v2561_v7, %v3074_v12  ;;  %v2490_v47 = vpop.f32.mrb[61].mxu1  ;;  %v1491_v14 = vpop.f32.mrb[61].mxu0  ;;  %v2243_v15 = vunpack.c.h.bf16 %v3181_v39 }
 0x173   : > { %v1752_v5 = vmax.f32 %v1720_v0, 0.0  ;;  %v1723_v23 = vadd.f32 %v2239_v9, %v1627_v29  ;;  %v2491_v17 = vadd.f32 %v2490_v47, %v2489_v53  ;;  %v1492_v60 = vadd.f32 %v1491_v14, %v3064_v33  ;;  %v2492_v38 = vpop.f32.mrb[62].mxu1  ;;  %v2562_v2 = vpop.f32.mrb[62].mxu0 }
 0x174   : > { %v2194_v24 = vpack.c.bf16 %v1754_v32, %v1754_v32  ;;  %v1721_v25 = vadd.f32 %v2235_v6, %v1625_v55  ;;  %v1591_v37 = vmul.f32 %v3088_v59, %v1500_v58  ;;  %v1503_v12 = vadd.f32 %v2562_v2, %v3083_v19  ;;  %v2493_v26 = vpop.f32.mrb[63].mxu1  ;;  %v1494_v13 = vpop.f32.mrb[63].mxu0  ;;  %v3218_v19 = vld [vmem:[%s3081_s7 + $0x40] sm:$0xff]  }
 0x175   : > { %v2192_v27 = vpack.c.bf16 %v1752_v5, %v1752_v5  ;;  %v1755_v48 = vmax.f32 %v1723_v23, 0.0  ;;  %v1589_v9 = vmul.f32 %v3088_v59, %v1492_v60  ;;  %v2494_v1 = vadd.f32 %v2493_v26, %v2492_v38 }
 0x176   : > { %1915 = vst.msk [vmem:[%s3130_s14 + $0x28] sm:$0xf] %vm1904_vm1, %v2194_v24  ;;  %v1753_v33 = vmax.f32 %v1721_v25, 0.0  ;;  %v1630_v36 = vadd.f32 %v3096_v63, %v1591_v37  ;;  %v1592_v6 = vmul.f32 %v3088_v59, %v1503_v12  ;;  %v1495_v54 = vadd.f32 %v1494_v13, %v3066_v57  ;;  %v3244_v12 = vld [vmem:[%s3081_s7 + $0x58] sm:$0xff]  }
 0x177   : > { %1913 = vst.msk [vmem:[%s3130_s14 + $0x20] sm:$0xf] %vm1904_vm1, %v2192_v27  ;;  %v2195_v18 = vpack.c.bf16 %v1755_v48, %v1755_v48  ;;  %v1628_v3 = vadd.f32 %v3096_v63, %v1589_v9  ;;  %v1371_v40 = vadd.f32 %v2491_v17, %v3068_v43  ;;  %v3225_v41 = vadd.f32 %v2494_v1, %v3071_v52  ;;  %v3251_v48 = vld [vmem:[%s3081_s7 + $0x50] sm:$0xff]  }
 0x178   : > { %v2193_v39 = vpack.c.bf16 %v1753_v33, %v1753_v33  ;;  %v1726_v49 = vadd.f32 %v2246_v61, %v1630_v36  ;;  %v1631_v42 = vadd.f32 %v3096_v63, %v1592_v6  ;;  %v1590_v57 = vmul.f32 %v3088_v59, %v1495_v54 }
 0x179   : > { %1916 = vst.msk [vmem:[%s3130_s14 + $0x2c] sm:$0xf] %vm1904_vm1, %v2195_v18  ;;  %v1724_v21 = vadd.f32 %v2242_v8, %v1628_v3  ;;  %v2495_v35 = vpop.f32.mrb[64].mxu1  ;;  %v2565_v30 = vpop.f32.mrb[64].mxu0  ;;  %v2254_v0 = vunpack.c.l.bf16 %v3215_v20  ;;  %v2250_v29 = vunpack.c.l.bf16 %v3218_v19  ;;  %v2255_v43 = vunpack.c.h.bf16 %v3215_v20 }
 0x17a   : > { %1914 = vst.msk [vmem:[%s3130_s14 + $0x24] sm:$0xf] %vm1904_vm1, %v2193_v39  ;;  %v1758_v52 = vmax.f32 %v1726_v49, 0.0  ;;  %v1727_v53 = vadd.f32 %v2247_v11, %v1631_v42  ;;  %v1629_v61 = vadd.f32 %v3096_v63, %v1590_v57  ;;  %v1516_v7 = vadd.f32 %v2565_v30, %v3151_v46  ;;  %v2496_v32 = vpop.f32.mrb[65].mxu1  ;;  %v1507_v55 = vpop.f32.mrb[65].mxu0 }
 0x17b   : > { %v1756_v58 = vmax.f32 %v1724_v21, 0.0  ;;  %v2497_v8 = vadd.f32 %v2496_v32, %v2495_v35  ;;  %v1508_v47 = vadd.f32 %v1507_v55, %v3104_v31  ;;  %v2498_v14 = vpop.f32.mrb[66].mxu1  ;;  %v2566_v5 = vpop.f32.mrb[66].mxu0  ;;  %v2251_v23 = vunpack.c.h.bf16 %v3218_v19 }
 0x17c   : > { %v2198_v17 = vpack.c.bf16 %v1758_v52, %v1758_v52  ;;  %v1759_v60 = vmax.f32 %v1727_v53, 0.0  ;;  %v1725_v11 = vadd.f32 %v2243_v15, %v1629_v61  ;;  %v1595_v38 = vmul.f32 %v3088_v59, %v1516_v7  ;;  %v2499_v46 = vpop.f32.mrb[67].mxu1  ;;  %v1510_v2 = vpop.f32.mrb[67].mxu0 }
 0x17d   : > { %v2196_v24 = vpack.c.bf16 %v1756_v58, %v1756_v58  ;;  %v1593_v25 = vmul.f32 %v3088_v59, %v1508_v47  ;;  %v1519_v37 = vadd.f32 %v2566_v5, %v3154_v50  ;;  %v2500_v31 = vadd.f32 %v2499_v46, %v2498_v14 }
 0x17e   : > { %1919 = vst.msk [vmem:[%s3130_s14 + $0x38] sm:$0xf] %vm1904_vm1, %v2198_v17  ;;  %v2199_v26 = vpack.c.bf16 %v1759_v60, %v1759_v60  ;;  %v1757_v13 = vmax.f32 %v1725_v11, 0.0  ;;  %v1634_v27 = vadd.f32 %v3096_v63, %v1595_v38  ;;  %v1511_v15 = vadd.f32 %v1510_v2, %v3117_v44  ;;  %v3284_v11 = vld [vmem:[%s3081_s7 + $0x68] sm:$0xff]  }
 0x17f   : > { %1917 = vst.msk [vmem:[%s3130_s14 + $0x30] sm:$0xf] %vm1904_vm1, %v2196_v24  ;;  %v1632_v9 = vadd.f32 %v3096_v63, %v1593_v25  ;;  %v1596_v50 = vmul.f32 %v3088_v59, %v1519_v37  ;;  %v3258_v1 = vadd.f32 %v2497_v8, %v3010_v56  ;;  %v3261_v33 = vadd.f32 %v2500_v31, %v3012_v62 }
 0x180   : > { %1920 = vst.msk [vmem:[%s3130_s14 + $0x3c] sm:$0xf] %vm1904_vm1, %v2199_v26  ;;  %v2197_v36 = vpack.c.bf16 %v1757_v13, %v1757_v13  ;;  %v1730_v6 = vadd.f32 %v2254_v0, %v1634_v27  ;;  %v1594_v44 = vmul.f32 %v3088_v59, %v1511_v15  ;;  %v2262_v54 = vunpack.c.l.bf16 %v3244_v12 }
 0x181   : > { %v1728_v20 = vadd.f32 %v2250_v29, %v1632_v9  ;;  %v1635_v19 = vadd.f32 %v3096_v63, %v1596_v50  ;;  %v2501_v18 = vpop.f32.mrb[68].mxu1  ;;  %v2569_v3 = vpop.f32.mrb[68].mxu0  ;;  %v2258_v39 = vunpack.c.l.bf16 %v3251_v48  ;;  %v2263_v56 = vunpack.c.h.bf16 %v3244_v12 }
 0x182   : > { %1918 = vst.msk [vmem:[%s3130_s14 + $0x34] sm:$0xf] %vm1904_vm1, %v2197_v36  ;;  %v1762_v62 = vmax.f32 %v1730_v6, 0.0  ;;  %v1633_v49 = vadd.f32 %v3096_v63, %v1594_v44  ;;  %v1532_v42 = vadd.f32 %v2569_v3, %v1371_v40  ;;  %v2502_v57 = vpop.f32.mrb[69].mxu1  ;;  %v1523_v21 = vpop.f32.mrb[69].mxu0  ;;  %v2259_v35 = vunpack.c.h.bf16 %v3251_v48 }
 0x183   : > { %v1760_v30 = vmax.f32 %v1728_v20, 0.0  ;;  %v1731_v0 = vadd.f32 %v2255_v43, %v1635_v19  ;;  %v2503_v29 = vadd.f32 %v2502_v57, %v2501_v18  ;;  %v1524_v52 = vadd.f32 %v1523_v21, %v3188_v45  ;;  %v2504_v53 = vpop.f32.mrb[70].mxu1  ;;  %v2570_v61 = vpop.f32.mrb[70].mxu0 }
 0x184   : > { %v2202_v7 = vpack.c.bf16 %v1762_v62, %v1762_v62  ;;  %v1729_v32 = vadd.f32 %v2251_v23, %v1633_v49  ;;  %v1599_v55 = vmul.f32 %v3088_v59, %v1532_v42  ;;  %v1535_v40 = vadd.f32 %v2570_v61, %v3225_v41  ;;  %v2505_v58 = vpop.f32.mrb[71].mxu1  ;;  %v1526_v8 = vpop.f32.mrb[71].mxu0  ;;  %v3287_v41 = vld [vmem:[%s3081_s7 + $0x60] sm:$0xff]  }
 0x185   : > { %v2200_v47 = vpack.c.bf16 %v1760_v30, %v1760_v30  ;;  %v1763_v14 = vmax.f32 %v1731_v0, 0.0  ;;  %v1597_v43 = vmul.f32 %v3088_v59, %v1524_v52  ;;  %v2506_v5 = vadd.f32 %v2505_v58, %v2504_v53 }
 0x186   : > { %1923 = vst.msk [vmem:[%s3130_s14 + $0x48] sm:$0xf] %vm1904_vm1, %v2202_v7  ;;  %v1761_v45 = vmax.f32 %v1729_v32, 0.0  ;;  %v1638_v17 = vadd.f32 %v3096_v63, %v1599_v55  ;;  %v1600_v23 = vmul.f32 %v3088_v59, %v1535_v40  ;;  %v1527_v60 = vadd.f32 %v1526_v8, %v3191_v51 }
 0x187   : > { %1921 = vst.msk [vmem:[%s3130_s14 + $0x40] sm:$0xf] %vm1904_vm1, %v2200_v47  ;;  %v2203_v38 = vpack.c.bf16 %v1763_v14, %v1763_v14  ;;  %v1636_v46 = vadd.f32 %v3096_v63, %v1597_v43  ;;  %v1387_v2 = vadd.f32 %v2503_v29, %v3014_v4  ;;  %v1390_v24 = vadd.f32 %v2506_v5, %v3016_v10  ;;  %v2293_v5 = vld [vmem:[%s3081_s7 + $0x70] sm:$0xff]  }
 0x188   : > { %v2201_v25 = vpack.c.bf16 %v1761_v45, %v1761_v45  ;;  %v1734_v37 = vadd.f32 %v2262_v54, %v1638_v17  ;;  %v1639_v31 = vadd.f32 %v3096_v63, %v1600_v23  ;;  %v1598_v51 = vmul.f32 %v3088_v59, %v1527_v60 }
 0x189   : > { %1924 = vst.msk [vmem:[%s3130_s14 + $0x4c] sm:$0xf] %vm1904_vm1, %v2203_v38  ;;  %v1732_v12 = vadd.f32 %v2258_v39, %v1636_v46  ;;  %v2507_v26 = vpop.f32.mrb[72].mxu1  ;;  %v2573_v13 = vpop.f32.mrb[72].mxu0  ;;  %v2270_v27 = vunpack.c.l.bf16 %v3284_v11  ;;  %v2266_v15 = vunpack.c.l.bf16 %v3287_v41  ;;  %v2271_v18 = vunpack.c.h.bf16 %v3284_v11 }
 0x18a   : > { %1922 = vst.msk [vmem:[%s3130_s14 + $0x44] sm:$0xf] %vm1904_vm1, %v2201_v25  ;;  %v1766_v4 = vmax.f32 %v1734_v37, 0.0  ;;  %v1735_v48 = vadd.f32 %v2263_v56, %v1639_v31  ;;  %v1637_v10 = vadd.f32 %v3096_v63, %v1598_v51  ;;  %v1548_v9 = vadd.f32 %v2573_v13, %v1387_v2  ;;  %v2508_v50 = vpop.f32.mrb[73].mxu1  ;;  %v1539_v36 = vpop.f32.mrb[73].mxu0 }
 0x18b   : > { %v1764_v6 = vmax.f32 %v1732_v12, 0.0  ;;  %v2509_v44 = vadd.f32 %v2508_v50, %v2507_v26  ;;  %v1540_v54 = vadd.f32 %v1539_v36, %v3258_v1  ;;  %v2510_v20 = vpop.f32.mrb[74].mxu1  ;;  %v2574_v19 = vpop.f32.mrb[74].mxu0  ;;  %v2267_v8 = vunpack.c.h.bf16 %v3287_v41 }
 0x18c   : > { %v2206_v3 = vpack.c.bf16 %v1766_v4, %v1766_v4  ;;  %v1767_v39 = vmax.f32 %v1735_v48, 0.0  ;;  %v1733_v62 = vadd.f32 %v2259_v35, %v1637_v10  ;;  %v1603_v56 = vmul.f32 %v3088_v59, %v1548_v9  ;;  %v2511_v49 = vpop.f32.mrb[75].mxu1  ;;  %v1542_v42 = vpop.f32.mrb[75].mxu0 }
 0x18d   : > { %v2204_v57 = vpack.c.bf16 %v1764_v6, %v1764_v6  ;;  %v1601_v21 = vmul.f32 %v3088_v59, %v1540_v54  ;;  %v1551_v30 = vadd.f32 %v2574_v19, %v1390_v24  ;;  %v2512_v0 = vadd.f32 %v2511_v49, %v2510_v20 }
 0x18e   : > { %1927 = vst.msk [vmem:[%s3130_s14 + $0x58] sm:$0xf] %vm1904_vm1, %v2206_v3  ;;  %v2207_v1 = vpack.c.bf16 %v1767_v39, %v1767_v39  ;;  %v1765_v29 = vmax.f32 %v1733_v62, 0.0  ;;  %v1642_v52 = vadd.f32 %v3096_v63, %v1603_v56  ;;  %v1543_v53 = vadd.f32 %v1542_v42, %v3261_v33 }
 0x18f   : > { %1925 = vst.msk [vmem:[%s3130_s14 + $0x50] sm:$0xf] %vm1904_vm1, %v2204_v57  ;;  %v1640_v35 = vadd.f32 %v3096_v63, %v1601_v21  ;;  %v1604_v61 = vmul.f32 %v3088_v59, %v1551_v30  ;;  %v1395_v7 = vadd.f32 %v2509_v44, %v3018_v16  ;;  %v1398_v32 = vadd.f32 %v2512_v0, %v3020_v22 }
 0x190   : > { %1928 = vst.msk [vmem:[%s3130_s14 + $0x5c] sm:$0xf] %vm1904_vm1, %v2207_v1  ;;  %v2205_v55 = vpack.c.bf16 %v1765_v29, %v1765_v29  ;;  %v1738_v40 = vadd.f32 %v2270_v27, %v1642_v52  ;;  %v1602_v58 = vmul.f32 %v3088_v59, %v1543_v53  ;;  %v2274_v25 = vunpack.c.l.bf16 %v2293_v5 }
 0x191   : > { %v1736_v33 = vadd.f32 %v2266_v15, %v1640_v35  ;;  %v1643_v47 = vadd.f32 %v3096_v63, %v1604_v61  ;;  %v2513_v14 = vpop.f32.mrb[76].mxu1  ;;  %v2577_v43 = vpop.f32.mrb[76].mxu0  ;;  %v2294_v15 = vld [vmem:[%s3081_s7 + $0x78] sm:$0xff]   ;;  %v2275_v44 = vunpack.c.h.bf16 %v2293_v5 }
 0x192   : > { %1926 = vst.msk [vmem:[%s3130_s14 + $0x54] sm:$0xf] %vm1904_vm1, %v2205_v55  ;;  %v1770_v45 = vmax.f32 %v1738_v40, 0.0  ;;  %v1641_v16 = vadd.f32 %v3096_v63, %v1602_v58  ;;  %v2514_v22 = vpop.f32.mrb[77].mxu1  ;;  %v1555_v17 = vpop.f32.mrb[77].mxu0  ;;  %v2278_v20 = vunpack.c.l.bf16 %v2294_v15  ;;  %v2279_v56 = vunpack.c.h.bf16 %v2294_v15 }
 0x193   : > { %v1768_v23 = vmax.f32 %v1736_v33, 0.0  ;;  %v1739_v60 = vadd.f32 %v2271_v18, %v1643_v47  ;;  %v2515_v11 = vadd.f32 %v2514_v22, %v2513_v14  ;;  %v1556_v38 = vadd.f32 %v1555_v17, %v1395_v7  ;;  %v2516_v41 = vpop.f32.mrb[78].mxu1  ;;  %v2578_v46 = vpop.f32.mrb[78].mxu0 }
 0x194   : > { %v2210_v2 = vpack.c.bf16 %v1770_v45, %v1770_v45  ;;  %v1737_v24 = vadd.f32 %v2267_v8, %v1641_v16  ;;  %v2517_v37 = vpop.f32.mrb[79].mxu1  ;;  %v1558_v31 = vpop.f32.mrb[79].mxu0 }
 0x195   : > { %v2208_v51 = vpack.c.bf16 %v1768_v23, %v1768_v23  ;;  %v1771_v12 = vmax.f32 %v1739_v60, 0.0  ;;  %v1403_v26 = vadd.f32 %v2515_v11, %v3022_v28  ;;  %v1605_v13 = vmul.f32 %v3088_v59, %v1556_v38 }
 0x196   : > { %1931 = vst.msk [vmem:[%s3130_s14 + $0x68] sm:$0xf] %vm1904_vm1, %v2210_v2  ;;  %v1769_v27 = vmax.f32 %v1737_v24, 0.0  ;;  %v2518_v4 = vadd.f32 %v2517_v37, %v2516_v41  ;;  %v1559_v48 = vadd.f32 %v1558_v31, %v1398_v32 }
 0x197   : > { %1929 = vst.msk [vmem:[%s3130_s14 + $0x60] sm:$0xf] %vm1904_vm1, %v2208_v51  ;;  %v2211_v10 = vpack.c.bf16 %v1771_v12, %v1771_v12  ;;  %v1564_v9 = vadd.f32 %v2577_v43, %v1403_v26  ;;  %v1644_v50 = vadd.f32 %v3096_v63, %v1605_v13 }
 0x198   : > { %v2209_v36 = vpack.c.bf16 %v1769_v27, %v1769_v27  ;;  %v1406_v6 = vadd.f32 %v2518_v4, %v3024_v34  ;;  %v1606_v28 = vmul.f32 %v3088_v59, %v1559_v48 }
 0x199   : > { %1932 = vst.msk [vmem:[%s3130_s14 + $0x6c] sm:$0xf] %vm1904_vm1, %v2211_v10  ;;  %v1607_v54 = vmul.f32 %v3088_v59, %v1564_v9  ;;  %v1740_v19 = vadd.f32 %v2274_v25, %v1644_v50 }
 0x19a   : > { %1930 = vst.msk [vmem:[%s3130_s14 + $0x64] sm:$0xf] %vm1904_vm1, %v2209_v36  ;;  %v1567_v18 = vadd.f32 %v2578_v46, %v1406_v6  ;;  %v1645_v3 = vadd.f32 %v3096_v63, %v1606_v28 }
 0x19b   : > { %v1646_v39 = vadd.f32 %v3096_v63, %v1607_v54  ;;  %v1772_v34 = vmax.f32 %v1740_v19, 0.0 }
 0x19c   : > { %v1608_v62 = vmul.f32 %v3088_v59, %v1567_v18  ;;  %v1741_v49 = vadd.f32 %v2275_v44, %v1645_v3 }
 0x19d   : > { %v1742_v42 = vadd.f32 %v2278_v20, %v1646_v39  ;;  %v2212_v57 = vpack.c.bf16 %v1772_v34, %v1772_v34 }
 0x19e   : > { %v1647_v21 = vadd.f32 %v3096_v63, %v1608_v62  ;;  %v1773_v30 = vmax.f32 %v1741_v49, 0.0 }
 0x19f   : > { %v1774_v0 = vmax.f32 %v1742_v42, 0.0  ;;  %1933 = vst.msk [vmem:[%s3130_s14 + $0x70] sm:$0xf] %vm1904_vm1, %v2212_v57 }
 0x1a0   : > { %v1743_v1 = vadd.f32 %v2279_v56, %v1647_v21  ;;  %v2213_v29 = vpack.c.bf16 %v1773_v30, %v1773_v30 }
 0x1a1   : > { %v2214_v52 = vpack.c.bf16 %v1774_v0, %v1774_v0 }
 0x1a2   : > { %v1775_v53 = vmax.f32 %v1743_v1, 0.0  ;;  %1934 = vst.msk [vmem:[%s3130_s14 + $0x74] sm:$0xf] %vm1904_vm1, %v2213_v29 }
 0x1a3   : > { %1935 = vst.msk [vmem:[%s3130_s14 + $0x78] sm:$0xf] %vm1904_vm1, %v2214_v52 }
 0x1a4   : > { %v2215_v59 = vpack.c.bf16 %v1775_v53, %v1775_v53 }
 0x1a6   : > { %1936 = vst.msk [vmem:[%s3130_s14 + $0x7c] sm:$0xf] %vm1904_vm1, %v2215_v59 }
 0x1a7 PF: > { %s15_s18 = sadd.s32 1, %s2758_s18  }
 0x1a8   : > { %p12_p4 = scmp.ge.s32.totalorder %s15_s18, 4  }
 0x1aa   :  { %14 = sbr.rel (!%p12_p4) target bundleno = 1 (0x1), region = 73 }

// kernel: resnet_forward.8
= control target key start
LH: loop header
LB: loop body
LE: loop exit
PB: predicated region body
PF: predicated region fallthrough
CT: control target
= control target key end

     0   :  { %vm554_vm0 = vcmask 523264   ;;  %s1808_s1 = inlined_call_operand.vmem [shape: bf16[576,128], index: 1, kind: input, shape index: {}]   ;;  %s1809_s0 = inlined_call_operand.vmem [shape: bf16[128,576], index: 0, kind: input, shape index: {}]   ;;  %s1810_s2 = inlined_call_operand.vmem [shape: f32[1,128], index: 2, kind: input, shape index: {}]   ;;  %s1811_s3 = inlined_call_operand.vmem [shape: f32[1,128], index: 3, kind: input, shape index: {}]   ;;  %s1812_s4 = inlined_call_operand.vmem [shape: bf16[128,128], index: 4, kind: output, shape index: {}]  }
   0x1   :  { %v1353_v0 = vld [vmem:[%s1808_s1 + $0x40] sm:$0xff]   ;;  %v1357_v4 = vld [vmem:[%s1808_s1 + $0x48] sm:$0xff]   ;;  %v1361_v8 = vld [vmem:[%s1808_s1 + $0x50] sm:$0xff]  }
   0x2   :  { %v1354_v1 = vld [vmem:[%s1808_s1 + $0xc0] sm:$0xff]   ;;  %1181 = vmatprep.subr.bf16.mxu0 %v1353_v0  ;;  %v1358_v5 = vld [vmem:[%s1808_s1 + $0xc8] sm:$0xff]   ;;  %v1362_v9 = vld [vmem:[%s1808_s1 + $0xd0] sm:$0xff]  }
   0x3   :  { %v1355_v2 = vld [vmem:[%s1808_s1] sm:$0xff]   ;;  %1245 = vmatprep.subr.bf16.mxu1 %v1354_v1  ;;  %v1359_v6 = vld [vmem:[%s1808_s1 + $0x8] sm:$0xff]   ;;  %v1363_v10 = vld [vmem:[%s1808_s1 + $0x10] sm:$0xff]  }
   0x4   :  { %v1356_v3 = vld [vmem:[%s1808_s1 + $0x80] sm:$0xff]   ;;  %1182 = vmatpush3.bf16.msra.mxu0 %v1355_v2  ;;  %v1360_v7 = vld [vmem:[%s1808_s1 + $0x88] sm:$0xff]   ;;  %v1364_v11 = vld [vmem:[%s1808_s1 + $0x90] sm:$0xff]  }
   0x5   :  { %1246 = vmatpush3.bf16.msra.mxu1 %v1356_v3  ;;  %1183 = vmatprep.subr.bf16.mxu0 %v1357_v4  ;;  %v1365_v12 = vld [vmem:[%s1808_s1 + $0x58] sm:$0xff]   ;;  %v1369_v16 = vld [vmem:[%s1808_s1 + $0x60] sm:$0xff]   ;;  %v1373_v20 = vld [vmem:[%s1808_s1 + $0x68] sm:$0xff]  }
   0x6   :  { %1247 = vmatprep.subr.bf16.mxu1 %v1358_v5  ;;  %v1366_v13 = vld [vmem:[%s1808_s1 + $0xd8] sm:$0xff]   ;;  %v1370_v17 = vld [vmem:[%s1808_s1 + $0xe0] sm:$0xff]   ;;  %v1374_v21 = vld [vmem:[%s1808_s1 + $0xe8] sm:$0xff]  }
   0x7   :  { %v1367_v14 = vld [vmem:[%s1808_s1 + $0x18] sm:$0xff]   ;;  %v1371_v18 = vld [vmem:[%s1808_s1 + $0x20] sm:$0xff]   ;;  %v1375_v22 = vld [vmem:[%s1808_s1 + $0x28] sm:$0xff]  }
   0x8   :  { %1184 = vmatpush3.bf16.msra.mxu0 %v1359_v6  ;;  %v1368_v15 = vld [vmem:[%s1808_s1 + $0x98] sm:$0xff]   ;;  %v1372_v19 = vld [vmem:[%s1808_s1 + $0xa0] sm:$0xff]   ;;  %v1376_v23 = vld [vmem:[%s1808_s1 + $0xa8] sm:$0xff]  }
   0x9   :  { %1248 = vmatpush3.bf16.msra.mxu1 %v1360_v7  ;;  %1185 = vmatprep.subr.bf16.mxu0 %v1361_v8  ;;  %v1377_v24 = vld [vmem:[%s1808_s1 + $0x70] sm:$0xff]   ;;  %v1381_v28 = vld [vmem:[%s1808_s1 + $0x78] sm:$0xff]   ;;  %v1390_v35 = vld [vmem:[%s1809_s0 + $0xc] ss:$20 sps:$4 sm:$0xff]  }
   0xa   :  { %1249 = vmatprep.subr.bf16.mxu1 %v1362_v9  ;;  %v1378_v25 = vld [vmem:[%s1808_s1 + $0xf0] sm:$0xff]   ;;  %v1382_v29 = vld [vmem:[%s1808_s1 + $0xf8] sm:$0xff]   ;;  %v1391_v36 = vld [vmem:[%s1808_s1 + $0x100] sm:$0xff]   ;;  %708 = vmatprep.mubr.bf16.mxu1 %v1390_v35 }
   0xb   :  { %v1379_v26 = vld [vmem:[%s1808_s1 + $0x30] sm:$0xff]   ;;  %v1383_v30 = vld [vmem:[%s1808_s1 + $0x38] sm:$0xff]   ;;  %v1392_v37 = vld [vmem:[%s1809_s0 + $0x2c] ss:$20 sps:$4 sm:$0xff]  }
   0xc   :  { %1186 = vmatpush3.bf16.msra.mxu0 %v1363_v10  ;;  %v1380_v27 = vld [vmem:[%s1808_s1 + $0xb0] sm:$0xff]   ;;  %v1384_v31 = vld [vmem:[%s1808_s1 + $0xb8] sm:$0xff]   ;;  %v1404_v42 = vld [vmem:[%s1808_s1 + $0x108] sm:$0xff]  }
   0xd   :  { %1250 = vmatpush3.bf16.msra.mxu1 %v1364_v11  ;;  %1187 = vmatprep.subr.bf16.mxu0 %v1365_v12  ;;  %v1385_v32 = vld [vmem:[%s1809_s0] ss:$20 sps:$4 sm:$0xff]   ;;  %v1387_v33 = vld [vmem:[%s1809_s0 + $0x4] ss:$20 sps:$4 sm:$0xff]   ;;  %v1388_v34 = vld [vmem:[%s1809_s0 + $0x8] ss:$20 sps:$4 sm:$0xff]  }
   0xe   :  { %1251 = vmatprep.subr.bf16.mxu1 %v1366_v13  ;;  %611 = vmatprep.mubr.bf16.mxu0 %v1387_v33  ;;  %v1394_v38 = vld [vmem:[%s1809_s0 + $0x34] ss:$20 sps:$4 sm:$0xff]   ;;  %v1397_v40 = vld [vmem:[%s1809_s0 + $0x30] ss:$20 sps:$4 sm:$0xff]   ;;  %v1403_v45 = vld [vmem:[%s1809_s0 + $0x58] ss:$20 sps:$4 sm:$0xff]  }
   0xf   :  { %v1396_v39 = vld [vmem:[%s1809_s0 + $0x28] ss:$20 sps:$4 sm:$0xff]   ;;  %v1402_v44 = vld [vmem:[%s1809_s0 + $0x50] ss:$20 sps:$4 sm:$0xff]   ;;  %v1409_v50 = vld [vmem:[%s1809_s0 + $0x78] ss:$20 sps:$4 sm:$0xff]  }
  0x10   :  { %1188 = vmatpush3.bf16.msra.mxu0 %v1367_v14  ;;  %v1398_v41 = vld [vmem:[%s1809_s0 + $0x54] ss:$20 sps:$4 sm:$0xff]   ;;  %v1400_v43 = vld [vmem:[%s1809_s0 + $0x5c] ss:$20 sps:$4 sm:$0xff]   ;;  %v1407_v48 = vld [vmem:[%s1809_s0 + $0x84] ss:$20 sps:$4 sm:$0xff]  }
  0x11   :  { %1252 = vmatpush3.bf16.msra.mxu1 %v1368_v15  ;;  %1189 = vmatprep.subr.bf16.mxu0 %v1369_v16  ;;  %v1417_v46 = vld [vmem:[%s1808_s1 + $0x110] sm:$0xff]   ;;  %v1430_v49 = vld [vmem:[%s1808_s1 + $0x118] sm:$0xff]   ;;  %v1413_v53 = vld [vmem:[%s1809_s0 + $0xac] ss:$20 sps:$4 sm:$0xff]  }
  0x12   :  { %1253 = vmatprep.subr.bf16.mxu1 %v1370_v17  ;;  %v1405_v47 = vld [vmem:[%s1809_s0 + $0x7c] ss:$20 sps:$4 sm:$0xff]   ;;  %v1410_v51 = vld [vmem:[%s1809_s0 + $0x80] ss:$20 sps:$4 sm:$0xff]   ;;  %v1411_v52 = vld [vmem:[%s1809_s0 + $0xa4] ss:$20 sps:$4 sm:$0xff]  }
  0x13   :  { %v1415_v54 = vld [vmem:[%s1809_s0 + $0xa0] ss:$20 sps:$4 sm:$0xff]   ;;  %v1416_v55 = vld [vmem:[%s1809_s0 + $0xa8] ss:$20 sps:$4 sm:$0xff]   ;;  %v1423_v59 = vld [vmem:[%s1809_s0 + $0xd0] ss:$20 sps:$4 sm:$0xff]  }
  0x14   :  { %1190 = vmatpush3.bf16.msra.mxu0 %v1371_v18  ;;  %v1418_v56 = vld [vmem:[%s1809_s0 + $0xcc] ss:$20 sps:$4 sm:$0xff]   ;;  %v1420_v57 = vld [vmem:[%s1809_s0 + $0xd4] ss:$20 sps:$4 sm:$0xff]   ;;  %v1426_v61 = vld [vmem:[%s1809_s0 + $0xfc] ss:$20 sps:$4 sm:$0xff]  }
  0x15   :  { %1254 = vmatpush3.bf16.msra.mxu1 %v1372_v19  ;;  %1191 = vmatprep.subr.bf16.mxu0 %v1373_v20  ;;  %v1422_v58 = vld [vmem:[%s1809_s0 + $0xc8] ss:$20 sps:$4 sm:$0xff]   ;;  %v1428_v62 = vld [vmem:[%s1809_s0 + $0xf0] ss:$20 sps:$4 sm:$0xff]   ;;  %v1429_v63 = vld [vmem:[%s1809_s0 + $0xf8] ss:$20 sps:$4 sm:$0xff]  }
  0x16   :  { %1255 = vmatprep.subr.bf16.mxu1 %v1374_v21  ;;  %v1424_v60 = vld [vmem:[%s1809_s0 + $0xf4] ss:$20 sps:$4 sm:$0xff]   ;;  %v1431_v0 = vld [vmem:[%s1809_s0 + $0x11c] ss:$20 sps:$4 sm:$0xff]   ;;  %v1433_v1 = vld [vmem:[%s1809_s0 + $0x124] ss:$20 sps:$4 sm:$0xff]  }
  0x17   :  { %v1435_v2 = vld [vmem:[%s1809_s0 + $0x118] ss:$20 sps:$4 sm:$0xff]   ;;  %v1436_v3 = vld [vmem:[%s1809_s0 + $0x120] ss:$20 sps:$4 sm:$0xff]   ;;  %v1437_v4 = vld [vmem:[%s1809_s0 + $0x10] ss:$20 sps:$4 sm:$0xff]  }
  0x18   :  { %1192 = vmatpush3.bf16.msra.mxu0 %v1375_v22  ;;  %v1438_v5 = vld [vmem:[%s1809_s0 + $0xb0] ss:$20 sps:$4 sm:$0xff]   ;;  %v1439_v6 = vld [vmem:[%s1809_s0 + $0x38] ss:$20 sps:$4 sm:$0xff]   ;;  %v1441_v8 = vld [vmem:[%s1809_s0 + $0x60] ss:$20 sps:$4 sm:$0xff]  }
  0x19   :  { %1256 = vmatpush3.bf16.msra.mxu1 %v1376_v23  ;;  %1193 = vmatprep.subr.bf16.mxu0 %v1377_v24  ;;  %v1440_v7 = vld [vmem:[%s1809_s0 + $0xd8] ss:$20 sps:$4 sm:$0xff]   ;;  %v1442_v9 = vld [vmem:[%s1809_s0 + $0x100] ss:$20 sps:$4 sm:$0xff]   ;;  %v1443_v10 = vld [vmem:[%s1809_s0 + $0x88] ss:$20 sps:$4 sm:$0xff]  }
  0x1a   :  { %1257 = vmatprep.subr.bf16.mxu1 %v1378_v25  ;;  %v1444_v11 = vld [vmem:[%s1809_s0 + $0x128] ss:$20 sps:$4 sm:$0xff]  }
  0x1c   :  { %1194 = vmatpush3.bf16.msra.mxu0 %v1379_v26 }
  0x1d   :  { %1258 = vmatpush3.bf16.msra.mxu1 %v1380_v27  ;;  %1195 = vmatprep.subr.bf16.mxu0 %v1381_v28 }
  0x1e   :  { %1259 = vmatprep.subr.bf16.mxu1 %v1382_v29 }
  0x20   :  { %1196 = vmatpush3.bf16.msra.mxu0 %v1383_v30 }
  0x21   :  { %1260 = vmatpush3.bf16.msra.mxu1 %v1384_v31  ;;  %1321 = vmatprep.subr.bf16.mxu0 %v1391_v36 }
  0x22   :  { %1345 = vmatprep.subr.bf16.mxu1 %v1391_v36 }
  0x23   :  { %612 = vmatmul.mubr.bf16.vlgmr.msra.gmra.mrb[0].mxu0 %v1385_v32 }
  0x24   :  { %709 = vmatmul.mubr.bf16.vlgmr.msra.gmra.mrb[0].mxu1 %v1388_v34  ;;  %1322 = vmatpush3.bf16.msra.mxu0 %v1391_v36 }
  0x25   :  { %1349 = vmatpush3.bf16.msra.mxu1 %v1391_v36  ;;  %619 = vmatprep.mubr.bf16.mxu0 %v1392_v37 }
  0x26   :  { %716 = vmatprep.mubr.bf16.mxu1 %v1394_v38  ;;  %1323 = vmatprep.subr.bf16.mxu0 %v1404_v42 }
  0x27   :  { %1346 = vmatprep.subr.bf16.mxu1 %v1404_v42 }
  0x28   :  { %1324 = vmatpush3.bf16.msra.mxu0 %v1404_v42 }
  0x29   :  { %1350 = vmatpush3.bf16.msra.mxu1 %v1404_v42  ;;  %1325 = vmatprep.subr.bf16.mxu0 %v1417_v46 }
  0x2a   :  { %1347 = vmatprep.subr.bf16.mxu1 %v1417_v46 }
  0x2b   :  { %620 = vmatmul.mubr.bf16.gmra.mrb[4].mxu0 %v1396_v39 }
  0x2c   :  { %717 = vmatmul.mubr.bf16.gmra.mrb[4].mxu1 %v1397_v40  ;;  %627 = vmatprep.mubr.bf16.mxu0 %v1398_v41 }
  0x2d   :  { %724 = vmatprep.mubr.bf16.mxu1 %v1400_v43  ;;  %1326 = vmatpush3.bf16.msra.mxu0 %v1417_v46 }
  0x2e   :  { %1351 = vmatpush3.bf16.msra.mxu1 %v1417_v46  ;;  %1327 = vmatprep.subr.bf16.mxu0 %v1430_v49 }
  0x2f   :  { %1348 = vmatprep.subr.bf16.mxu1 %v1430_v49 }
  0x31   :  { %1328 = vmatpush3.bf16.msra.mxu0 %v1430_v49 }
  0x32   :  { %1352 = vmatpush3.bf16.msra.mxu1 %v1430_v49 }
  0x33   :  { %628 = vmatmul.mubr.bf16.gmra.mrb[8].mxu0 %v1402_v44 }
  0x34   :  { %725 = vmatmul.mubr.bf16.gmra.mrb[8].mxu1 %v1403_v45  ;;  %635 = vmatprep.mubr.bf16.mxu0 %v1405_v47 }
  0x35   :  { %732 = vmatprep.mubr.bf16.mxu1 %v1407_v48 }
  0x3b   :  { %636 = vmatmul.mubr.bf16.gmra.mrb[12].mxu0 %v1409_v50 }
  0x3c   :  { %733 = vmatmul.mubr.bf16.gmra.mrb[12].mxu1 %v1410_v51  ;;  %643 = vmatprep.mubr.bf16.mxu0 %v1411_v52 }
  0x3d   :  { %740 = vmatprep.mubr.bf16.mxu1 %v1413_v53 }
  0x43   :  { %644 = vmatmul.mubr.bf16.gmra.mrb[16].mxu0 %v1415_v54 }
  0x44   :  { %741 = vmatmul.mubr.bf16.gmra.mrb[16].mxu1 %v1416_v55  ;;  %651 = vmatprep.mubr.bf16.mxu0 %v1418_v56 }
  0x45   :  { %748 = vmatprep.mubr.bf16.mxu1 %v1420_v57 }
  0x4b   :  { %652 = vmatmul.mubr.bf16.gmra.mrb[20].mxu0 %v1422_v58 }
  0x4c   :  { %749 = vmatmul.mubr.bf16.gmra.mrb[20].mxu1 %v1423_v59  ;;  %659 = vmatprep.mubr.bf16.mxu0 %v1424_v60 }
  0x4d   :  { %756 = vmatprep.mubr.bf16.mxu1 %v1426_v61 }
  0x53   :  { %660 = vmatmul.mubr.bf16.gmra.mrb[24].mxu0 %v1428_v62 }
  0x54   :  { %757 = vmatmul.mubr.bf16.gmra.mrb[24].mxu1 %v1429_v63  ;;  %667 = vmatprep.mubr.bf16.mxu0 %v1431_v0 }
  0x55   :  { %764 = vmatprep.mubr.bf16.mxu1 %v1433_v1 }
  0x5b   :  { %668 = vmatmul.mubr.bf16.gmra.mrb[28].mxu0 %v1435_v2 }
  0x5c   :  { %765 = vmatmul.mubr.bf16.gmra.mrb[28].mxu1 %v1436_v3  ;;  %1329 = vmatprep.mubr.msk.bf16.mxu0 %vm554_vm0, %v1437_v4 }
  0x5d   :  { %1337 = vmatprep.mubr.msk.bf16.mxu1 %vm554_vm0, %v1438_v5 }
  0x63   :  { %1330 = vmatmul.mubr.msk.bf16.vlgmr.msra.gmra.mrb[32].mxu0 %vm554_vm0, %v1439_v6 }
  0x64   :  { %1338 = vmatmul.mubr.msk.bf16.vlgmr.msra.gmra.mrb[32].mxu1 %vm554_vm0, %v1440_v7  ;;  %1333 = vmatprep.mubr.msk.bf16.mxu0 %vm554_vm0, %v1441_v8 }
  0x65   :  { %1341 = vmatprep.mubr.msk.bf16.mxu1 %vm554_vm0, %v1442_v9 }
  0x6b   :  { %1334 = vmatmul.mubr.msk.bf16.gmra.mrb[36].mxu0 %vm554_vm0, %v1443_v10 }
  0x6c   :  { %1342 = vmatmul.mubr.msk.bf16.gmra.mrb[36].mxu1 %vm554_vm0, %v1444_v11 }
  0xf6   :  { %v1197_v12 = vpop.f32.mrb[0].mxu0 }
  0xf7   :  { %v1261_v13 = vpop.f32.mrb[0].mxu1  ;;  %v1198_v14 = vpop.f32.mrb[1].mxu0 }
  0xf8   :  { %v1199_v15 = vadd.f32 %v1198_v14, %v1197_v12  ;;  %v1262_v16 = vpop.f32.mrb[1].mxu1  ;;  %v1200_v17 = vpop.f32.mrb[2].mxu0 }
  0xf9   :  { %v1263_v18 = vadd.f32 %v1262_v16, %v1261_v13  ;;  %v1264_v19 = vpop.f32.mrb[2].mxu1  ;;  %v1201_v20 = vpop.f32.mrb[3].mxu0 }
  0xfa   :  { %v1202_v21 = vadd.f32 %v1201_v20, %v1200_v17  ;;  %v1265_v22 = vpop.f32.mrb[3].mxu1 }
  0xfb   :  { %v1266_v23 = vadd.f32 %v1265_v22, %v1264_v19  ;;  %v1706_v24 = vadd.f32 %v1263_v18, %v1199_v15 }
  0xfd   :  { %v1708_v25 = vadd.f32 %v1266_v23, %v1202_v21 }
  0xfe   :  { %v1203_v26 = vpop.f32.mrb[4].mxu0 }
  0xff   :  { %v1267_v27 = vpop.f32.mrb[4].mxu1  ;;  %v1204_v28 = vpop.f32.mrb[5].mxu0 }
 0x100   :  { %v1205_v29 = vadd.f32 %v1204_v28, %v1203_v26  ;;  %v1268_v30 = vpop.f32.mrb[5].mxu1  ;;  %v1206_v31 = vpop.f32.mrb[6].mxu0 }
 0x101   :  { %v1269_v32 = vadd.f32 %v1268_v30, %v1267_v27  ;;  %v1270_v33 = vpop.f32.mrb[6].mxu1  ;;  %v1207_v34 = vpop.f32.mrb[7].mxu0 }
 0x102   :  { %v1208_v35 = vadd.f32 %v1207_v34, %v1206_v31  ;;  %v1271_v36 = vpop.f32.mrb[7].mxu1 }
 0x103   :  { %v1272_v37 = vadd.f32 %v1271_v36, %v1270_v33  ;;  %v1710_v38 = vadd.f32 %v1269_v32, %v1205_v29 }
 0x105   :  { %v1712_v39 = vadd.f32 %v1272_v37, %v1208_v35 }
 0x106   :  { %v1209_v40 = vpop.f32.mrb[8].mxu0 }
 0x107   :  { %v1273_v41 = vpop.f32.mrb[8].mxu1  ;;  %v1210_v42 = vpop.f32.mrb[9].mxu0 }
 0x108   :  { %v1211_v43 = vadd.f32 %v1210_v42, %v1209_v40  ;;  %v1274_v44 = vpop.f32.mrb[9].mxu1  ;;  %v1212_v45 = vpop.f32.mrb[10].mxu0 }
 0x109   :  { %v1275_v46 = vadd.f32 %v1274_v44, %v1273_v41  ;;  %v1276_v47 = vpop.f32.mrb[10].mxu1  ;;  %v1213_v48 = vpop.f32.mrb[11].mxu0 }
 0x10a   :  { %v1214_v49 = vadd.f32 %v1213_v48, %v1212_v45  ;;  %v1277_v50 = vpop.f32.mrb[11].mxu1 }
 0x10b   :  { %v1278_v51 = vadd.f32 %v1277_v50, %v1276_v47  ;;  %v1714_v52 = vadd.f32 %v1275_v46, %v1211_v43 }
 0x10d   :  { %v1716_v53 = vadd.f32 %v1278_v51, %v1214_v49 }
 0x10e   :  { %v1215_v54 = vpop.f32.mrb[12].mxu0 }
 0x10f   :  { %v1279_v55 = vpop.f32.mrb[12].mxu1  ;;  %v1216_v56 = vpop.f32.mrb[13].mxu0 }
 0x110   :  { %v1217_v57 = vadd.f32 %v1216_v56, %v1215_v54  ;;  %v1280_v58 = vpop.f32.mrb[13].mxu1  ;;  %v1218_v59 = vpop.f32.mrb[14].mxu0 }
 0x111   :  { %v1281_v60 = vadd.f32 %v1280_v58, %v1279_v55  ;;  %v1282_v61 = vpop.f32.mrb[14].mxu1  ;;  %v1219_v62 = vpop.f32.mrb[15].mxu0 }
 0x112   :  { %v1220_v63 = vadd.f32 %v1219_v62, %v1218_v59  ;;  %v1283_v0 = vpop.f32.mrb[15].mxu1 }
 0x113   :  { %v1284_v1 = vadd.f32 %v1283_v0, %v1282_v61  ;;  %v1718_v2 = vadd.f32 %v1281_v60, %v1217_v57 }
 0x115   :  { %v1720_v3 = vadd.f32 %v1284_v1, %v1220_v63 }
 0x116   :  { %v1221_v4 = vpop.f32.mrb[16].mxu0 }
 0x117   :  { %v1285_v5 = vpop.f32.mrb[16].mxu1  ;;  %v1222_v6 = vpop.f32.mrb[17].mxu0 }
 0x118   :  { %v1223_v7 = vadd.f32 %v1222_v6, %v1221_v4  ;;  %v1286_v8 = vpop.f32.mrb[17].mxu1  ;;  %v1224_v9 = vpop.f32.mrb[18].mxu0 }
 0x119   :  { %v1287_v10 = vadd.f32 %v1286_v8, %v1285_v5  ;;  %v1288_v11 = vpop.f32.mrb[18].mxu1  ;;  %v1225_v12 = vpop.f32.mrb[19].mxu0  ;;  %v1733_v5 = vld [vmem:[%s1810_s2] ss:$0 sm:$0xff] }
 0x11a   :  { %v1226_v13 = vadd.f32 %v1225_v12, %v1224_v9  ;;  %v1289_v14 = vpop.f32.mrb[19].mxu1  ;;  %v1739_v9 = vld [vmem:[%s1811_s3] ss:$0 sm:$0xff] }
 0x11b   :  { %v1290_v15 = vadd.f32 %v1289_v14, %v1288_v11  ;;  %v743_v16 = vadd.f32 %v1287_v10, %v1223_v7 }
 0x11d   :  { %v1722_v17 = vadd.f32 %v1290_v15, %v1226_v13 }
 0x11e   :  { %v1227_v18 = vpop.f32.mrb[20].mxu0 }
 0x11f   :  { %v1291_v19 = vpop.f32.mrb[20].mxu1  ;;  %v1228_v20 = vpop.f32.mrb[21].mxu0 }
 0x120   :  { %v1229_v21 = vadd.f32 %v1228_v20, %v1227_v18  ;;  %v1292_v22 = vpop.f32.mrb[21].mxu1  ;;  %v1230_v23 = vpop.f32.mrb[22].mxu0 }
 0x121   :  { %v1293_v26 = vadd.f32 %v1292_v22, %v1291_v19  ;;  %v1294_v27 = vpop.f32.mrb[22].mxu1  ;;  %v1231_v28 = vpop.f32.mrb[23].mxu0 }
 0x122   :  { %v1232_v29 = vadd.f32 %v1231_v28, %v1230_v23  ;;  %v1295_v30 = vpop.f32.mrb[23].mxu1 }
 0x123   :  { %v1296_v31 = vadd.f32 %v1295_v30, %v1294_v27  ;;  %v751_v32 = vadd.f32 %v1293_v26, %v1229_v21 }
 0x125   :  { %v754_v33 = vadd.f32 %v1296_v31, %v1232_v29 }
 0x126   :  { %v1233_v34 = vpop.f32.mrb[24].mxu0 }
 0x127   :  { %v1297_v35 = vpop.f32.mrb[24].mxu1  ;;  %v1234_v36 = vpop.f32.mrb[25].mxu0 }
 0x128   :  { %v1235_v37 = vadd.f32 %v1234_v36, %v1233_v34  ;;  %v1298_v40 = vpop.f32.mrb[25].mxu1  ;;  %v1236_v41 = vpop.f32.mrb[26].mxu0 }
 0x129   :  { %v1299_v42 = vadd.f32 %v1298_v40, %v1297_v35  ;;  %v1300_v43 = vpop.f32.mrb[26].mxu1  ;;  %v1237_v44 = vpop.f32.mrb[27].mxu0 }
 0x12a   :  { %v1238_v45 = vadd.f32 %v1237_v44, %v1236_v41  ;;  %v1301_v46 = vpop.f32.mrb[27].mxu1 }
 0x12b   :  { %v1302_v47 = vadd.f32 %v1301_v46, %v1300_v43  ;;  %v1724_v48 = vadd.f32 %v1299_v42, %v1235_v37 }
 0x12d   :  { %v1726_v49 = vadd.f32 %v1302_v47, %v1238_v45 }
 0x12e   :  { %v1239_v50 = vpop.f32.mrb[28].mxu0 }
 0x12f   :  { %v1303_v51 = vpop.f32.mrb[28].mxu1  ;;  %v1240_v54 = vpop.f32.mrb[29].mxu0 }
 0x130   :  { %v1241_v55 = vadd.f32 %v1240_v54, %v1239_v50  ;;  %v1304_v56 = vpop.f32.mrb[29].mxu1  ;;  %v1242_v57 = vpop.f32.mrb[30].mxu0 }
 0x131   :  { %v1305_v58 = vadd.f32 %v1304_v56, %v1303_v51  ;;  %v1306_v59 = vpop.f32.mrb[30].mxu1  ;;  %v1243_v60 = vpop.f32.mrb[31].mxu0 }
 0x132   :  { %v1244_v61 = vadd.f32 %v1243_v60, %v1242_v57  ;;  %v1307_v62 = vpop.f32.mrb[31].mxu1 }
 0x133   :  { %v1308_v63 = vadd.f32 %v1307_v62, %v1306_v59  ;;  %v767_v0 = vadd.f32 %v1305_v58, %v1241_v55 }
 0x135   :  { %v1728_v1 = vadd.f32 %v1308_v63, %v1244_v61 }
 0x136   :  { %v1331_v4 = vpop.f32.mrb[32].mxu0 }
 0x137   :  { %v816_v6 = vadd.f32 %v1331_v4, %v1710_v38  ;;  %v1339_v7 = vpop.f32.mrb[32].mxu1  ;;  %v807_v8 = vpop.f32.mrb[33].mxu0 }
 0x138   :  { %v848_v10 = vadd.f32 %v1339_v7, %v751_v32  ;;  %v808_v11 = vadd.f32 %v807_v8, %v1706_v24  ;;  %v839_v12 = vpop.f32.mrb[33].mxu1  ;;  %v1332_v13 = vpop.f32.mrb[34].mxu0 }
 0x139   :  { %v879_v14 = vmul.f32 %v1733_v5, %v816_v6  ;;  %v840_v15 = vadd.f32 %v839_v12, %v743_v16  ;;  %v819_v18 = vadd.f32 %v1332_v13, %v1712_v39  ;;  %v1340_v19 = vpop.f32.mrb[34].mxu1  ;;  %v810_v20 = vpop.f32.mrb[35].mxu0 }
 0x13a   :  { %v887_v38 = vmul.f32 %v1733_v5, %v848_v10  ;;  %v877_v21 = vmul.f32 %v1733_v5, %v808_v11  ;;  %v851_v22 = vadd.f32 %v1340_v19, %v754_v33  ;;  %v811_v23 = vadd.f32 %v810_v20, %v1708_v25  ;;  %v842_v26 = vpop.f32.mrb[35].mxu1 }
 0x13b   :  { %v902_v27 = vadd.f32 %v1739_v9, %v879_v14  ;;  %v885_v24 = vmul.f32 %v1733_v5, %v840_v15  ;;  %v880_v28 = vmul.f32 %v1733_v5, %v819_v18  ;;  %v843_v16 = vadd.f32 %v842_v26, %v1722_v17 }
 0x13c   :  { %v910_v39 = vadd.f32 %v1739_v9, %v887_v38  ;;  %v900_v29 = vadd.f32 %v1739_v9, %v877_v21  ;;  %v888_v30 = vmul.f32 %v1733_v5, %v851_v22  ;;  %v878_v31 = vmul.f32 %v1733_v5, %v811_v23 }
 0x13d   :  { %v918_v32 = vmax.f32 %v902_v27, 0.0  ;;  %v908_v25 = vadd.f32 %v1739_v9, %v885_v24  ;;  %v903_v33 = vadd.f32 %v1739_v9, %v880_v28  ;;  %v886_v34 = vmul.f32 %v1733_v5, %v843_v16 }
 0x13e   :  { %v926_v35 = vmax.f32 %v910_v39, 0.0  ;;  %v916_v36 = vmax.f32 %v900_v29, 0.0  ;;  %v911_v37 = vadd.f32 %v1739_v9, %v888_v30  ;;  %v901_v17 = vadd.f32 %v1739_v9, %v878_v31  ;;  %v1335_v40 = vpop.f32.mrb[36].mxu0 }
 0x13f   :  { %v924_v41 = vmax.f32 %v908_v25, 0.0  ;;  %v919_v42 = vmax.f32 %v903_v33, 0.0  ;;  %v909_v43 = vadd.f32 %v1739_v9, %v886_v34  ;;  %v832_v44 = vadd.f32 %v1335_v40, %v1718_v2  ;;  %v1343_v45 = vpop.f32.mrb[36].mxu1  ;;  %v823_v46 = vpop.f32.mrb[37].mxu0 }
 0x140   :  { %v927_v47 = vmax.f32 %v911_v37, 0.0  ;;  %v917_v50 = vmax.f32 %v901_v17, 0.0  ;;  %v864_v51 = vadd.f32 %v1343_v45, %v767_v0  ;;  %v824_v54 = vadd.f32 %v823_v46, %v1714_v52  ;;  %v855_v55 = vpop.f32.mrb[37].mxu1  ;;  %v1336_v56 = vpop.f32.mrb[38].mxu0 }
 0x141   :  { %v1142_v57 = vpack.c.bf16 %v919_v42, %v918_v32  ;;  %v925_v58 = vmax.f32 %v909_v43, 0.0  ;;  %v883_v59 = vmul.f32 %v1733_v5, %v832_v44  ;;  %v856_v60 = vadd.f32 %v855_v55, %v1724_v48  ;;  %v1344_v61 = vpop.f32.mrb[38].mxu1  ;;  %v826_v62 = vpop.f32.mrb[39].mxu0 }
 0x142   :  { %v1162_v63 = vpack.c.bf16 %v927_v47, %v926_v35  ;;  %v1137_v4 = vpack.c.bf16 %v917_v50, %v916_v36  ;;  %v891_v2 = vmul.f32 %v1733_v5, %v864_v51  ;;  %v881_v6 = vmul.f32 %v1733_v5, %v824_v54  ;;  %v858_v7 = vpop.f32.mrb[39].mxu1 }
 0x143   :  { %1174 = vst [vmem:[%s1812_s4 + $0x8] sm:$0xff] %v1142_v57   ;;  %v1157_v52 = vpack.c.bf16 %v925_v58, %v924_v41  ;;  %v889_v0 = vmul.f32 %v1733_v5, %v856_v60  ;;  %v835_v8 = vadd.f32 %v1336_v56, %v1720_v3  ;;  %v867_v48 = vadd.f32 %v1344_v61, %v1728_v1 }
 0x144   :  { %1178 = vst [vmem:[%s1812_s4 + $0x28] sm:$0xff] %v1162_v63   ;;  %1138 = vst [vmem:[%s1812_s4] sm:$0xff] %v1137_v4   ;;  %v827_v10 = vadd.f32 %v826_v62, %v1716_v53  ;;  %v906_v11 = vadd.f32 %v1739_v9, %v883_v59  ;;  %v859_v12 = vadd.f32 %v858_v7, %v1726_v49 }
 0x145   :  { %1177 = vst [vmem:[%s1812_s4 + $0x20] sm:$0xff] %v1157_v52   ;;  %v884_v3 = vmul.f32 %v1733_v5, %v835_v8  ;;  %v914_v13 = vadd.f32 %v1739_v9, %v891_v2  ;;  %v904_v14 = vadd.f32 %v1739_v9, %v881_v6  ;;  %v892_v15 = vmul.f32 %v1733_v5, %v867_v48 }
 0x146   :  { %v882_v1 = vmul.f32 %v1733_v5, %v827_v10  ;;  %v912_v53 = vadd.f32 %v1739_v9, %v889_v0  ;;  %v890_v19 = vmul.f32 %v1733_v5, %v859_v12  ;;  %v922_v21 = vmax.f32 %v906_v11, 0.0 }
 0x147   :  { %v907_v18 = vadd.f32 %v1739_v9, %v884_v3  ;;  %v915_v20 = vadd.f32 %v1739_v9, %v892_v15  ;;  %v930_v23 = vmax.f32 %v914_v13, 0.0  ;;  %v920_v26 = vmax.f32 %v904_v14, 0.0 }
 0x148   :  { %v905_v38 = vadd.f32 %v1739_v9, %v882_v1  ;;  %v913_v22 = vadd.f32 %v1739_v9, %v890_v19  ;;  %v928_v28 = vmax.f32 %v912_v53, 0.0 }
 0x149   :  { %v923_v49 = vmax.f32 %v907_v18, 0.0  ;;  %v931_v27 = vmax.f32 %v915_v20, 0.0 }
 0x14a   :  { %v921_v24 = vmax.f32 %v905_v38, 0.0  ;;  %v929_v39 = vmax.f32 %v913_v22, 0.0 }
 0x14b   :  { %v1152_v16 = vpack.c.bf16 %v923_v49, %v922_v21  ;;  %v1172_v29 = vpack.c.bf16 %v931_v27, %v930_v23 }
 0x14c   :  { %v1147_v30 = vpack.c.bf16 %v921_v24, %v920_v26  ;;  %v1167_v5 = vpack.c.bf16 %v929_v39, %v928_v28 }
 0x14d   :  { %1176 = vst [vmem:[%s1812_s4 + $0x18] sm:$0xff] %v1152_v16   ;;  %1180 = vst [vmem:[%s1812_s4 + $0x38] sm:$0xff] %v1172_v29  }
 0x14e   :  { %1175 = vst [vmem:[%s1812_s4 + $0x10] sm:$0xff] %v1147_v30   ;;  %1179 = vst [vmem:[%s1812_s4 + $0x30] sm:$0xff] %v1167_v5  }

// kernel: resnet_forward.9
= control target key start
LH: loop header
LB: loop body
LE: loop exit
PB: predicated region body
PF: predicated region fallthrough
CT: control target
= control target key end

     0   :  { %vm1673_vm0 = vcmask 523264   ;;  %s3457_s1 = inlined_call_operand.vmem [shape: bf16[1152,128], index: 1, kind: input, shape index: {}]   ;;  %s3458_s0 = inlined_call_operand.vmem [shape: bf16[128,1152], index: 0, kind: input, shape index: {}]   ;;  %s3459_s5 = inlined_call_operand.vmem [shape: bf16[64,128], index: 5, kind: input, shape index: {}]   ;;  %s3460_s4 = inlined_call_operand.vmem [shape: bf16[128,64], index: 4, kind: input, shape index: {}]   ;;  %s3461_s2 = inlined_call_operand.vmem [shape: f32[1,128], index: 2, kind: input, shape index: {}]   ;;  %s3462_s6 = inlined_call_operand.vmem [shape: f32[1,128], index: 6, kind: input, shape index: {}]   ;;  %s3463_s3 = inlined_call_operand.vmem [shape: f32[1,128], index: 3, kind: input, shape index: {}]   ;;  %s3464_s7 = inlined_call_operand.vmem [shape: f32[1,128], index: 7, kind: input, shape index: {}]   ;;  %s3465_s8 = inlined_call_operand.vmem [shape: bf16[128,128], index: 8, kind: output, shape index: {}]  }
   0x1   :  { %v2544_v0 = vld [vmem:[%s3457_s1 + $0x40] sm:$0xff]   ;;  %v2548_v4 = vld [vmem:[%s3457_s1 + $0x48] sm:$0xff]   ;;  %v2552_v8 = vld [vmem:[%s3457_s1 + $0x50] sm:$0xff]  }
   0x2   :  { %v2545_v1 = vld [vmem:[%s3457_s1 + $0xc0] sm:$0xff]   ;;  %2204 = vmatprep.subr.bf16.mxu0 %v2544_v0  ;;  %v2549_v5 = vld [vmem:[%s3457_s1 + $0xc8] sm:$0xff]   ;;  %v2553_v9 = vld [vmem:[%s3457_s1 + $0xd0] sm:$0xff]  }
   0x3   :  { %v2546_v2 = vld [vmem:[%s3457_s1] sm:$0xff]   ;;  %2268 = vmatprep.subr.bf16.mxu1 %v2545_v1  ;;  %v2550_v6 = vld [vmem:[%s3457_s1 + $0x8] sm:$0xff]   ;;  %v2554_v10 = vld [vmem:[%s3457_s1 + $0x10] sm:$0xff]  }
   0x4   :  { %v2547_v3 = vld [vmem:[%s3457_s1 + $0x80] sm:$0xff]   ;;  %2205 = vmatpush3.bf16.msra.mxu0 %v2546_v2  ;;  %v2551_v7 = vld [vmem:[%s3457_s1 + $0x88] sm:$0xff]   ;;  %v2555_v11 = vld [vmem:[%s3457_s1 + $0x90] sm:$0xff]  }
   0x5   :  { %2269 = vmatpush3.bf16.msra.mxu1 %v2547_v3  ;;  %2206 = vmatprep.subr.bf16.mxu0 %v2548_v4  ;;  %v2556_v12 = vld [vmem:[%s3457_s1 + $0x58] sm:$0xff]   ;;  %v2560_v16 = vld [vmem:[%s3457_s1 + $0x60] sm:$0xff]   ;;  %v2564_v20 = vld [vmem:[%s3457_s1 + $0x68] sm:$0xff]  }
   0x6   :  { %2270 = vmatprep.subr.bf16.mxu1 %v2549_v5  ;;  %v2557_v13 = vld [vmem:[%s3457_s1 + $0xd8] sm:$0xff]   ;;  %v2561_v17 = vld [vmem:[%s3457_s1 + $0xe0] sm:$0xff]   ;;  %v2565_v21 = vld [vmem:[%s3457_s1 + $0xe8] sm:$0xff]  }
   0x7   :  { %v2558_v14 = vld [vmem:[%s3457_s1 + $0x18] sm:$0xff]   ;;  %v2562_v18 = vld [vmem:[%s3457_s1 + $0x20] sm:$0xff]   ;;  %v2566_v22 = vld [vmem:[%s3457_s1 + $0x28] sm:$0xff]  }
   0x8   :  { %2207 = vmatpush3.bf16.msra.mxu0 %v2550_v6  ;;  %v2559_v15 = vld [vmem:[%s3457_s1 + $0x98] sm:$0xff]   ;;  %v2563_v19 = vld [vmem:[%s3457_s1 + $0xa0] sm:$0xff]   ;;  %v2567_v23 = vld [vmem:[%s3457_s1 + $0xa8] sm:$0xff]  }
   0x9   :  { %2271 = vmatpush3.bf16.msra.mxu1 %v2551_v7  ;;  %2208 = vmatprep.subr.bf16.mxu0 %v2552_v8  ;;  %v2568_v24 = vld [vmem:[%s3457_s1 + $0x70] sm:$0xff]   ;;  %v2572_v28 = vld [vmem:[%s3457_s1 + $0x78] sm:$0xff]   ;;  %v2576_v32 = vld [vmem:[%s3458_s0] ss:$36 sps:$4 sm:$0xff]  }
   0xa   :  { %2272 = vmatprep.subr.bf16.mxu1 %v2553_v9  ;;  %v2569_v25 = vld [vmem:[%s3457_s1 + $0xf0] sm:$0xff]   ;;  %v2573_v29 = vld [vmem:[%s3457_s1 + $0xf8] sm:$0xff]   ;;  %v2578_v33 = vld [vmem:[%s3458_s0 + $0x4] ss:$36 sps:$4 sm:$0xff]  }
   0xb   :  { %v2570_v26 = vld [vmem:[%s3457_s1 + $0x30] sm:$0xff]   ;;  %v2574_v30 = vld [vmem:[%s3457_s1 + $0x38] sm:$0xff]   ;;  %v2579_v34 = vld [vmem:[%s3458_s0 + $0x8] ss:$36 sps:$4 sm:$0xff]   ;;  %1086 = vmatprep.mubr.bf16.mxu0 %v2578_v33 }
   0xc   :  { %2209 = vmatpush3.bf16.msra.mxu0 %v2554_v10  ;;  %v2571_v27 = vld [vmem:[%s3457_s1 + $0xb0] sm:$0xff]   ;;  %v2575_v31 = vld [vmem:[%s3457_s1 + $0xb8] sm:$0xff]   ;;  %v2582_v36 = vld [vmem:[%s3457_s1 + $0x140] sm:$0xff]  }
   0xd   :  { %2273 = vmatpush3.bf16.msra.mxu1 %v2555_v11  ;;  %2210 = vmatprep.subr.bf16.mxu0 %v2556_v12  ;;  %v2581_v35 = vld [vmem:[%s3458_s0 + $0xc] ss:$36 sps:$4 sm:$0xff]   ;;  %v2583_v37 = vld [vmem:[%s3457_s1 + $0x100] sm:$0xff]   ;;  %v2588_v41 = vld [vmem:[%s3458_s0 + $0x54] ss:$36 sps:$4 sm:$0xff]  }
   0xe   :  { %2274 = vmatprep.subr.bf16.mxu1 %v2557_v13  ;;  %1183 = vmatprep.mubr.bf16.mxu1 %v2581_v35  ;;  %v2584_v38 = vld [vmem:[%s3457_s1 + $0x1c0] sm:$0xff]   ;;  %v2586_v40 = vld [vmem:[%s3458_s0 + $0x4c] ss:$36 sps:$4 sm:$0xff]   ;;  %v2596_v48 = vld [vmem:[%s3458_s0 + $0x94] ss:$36 sps:$4 sm:$0xff]  }
   0xf   :  { %v2585_v39 = vld [vmem:[%s3457_s1 + $0x180] sm:$0xff]   ;;  %v2590_v42 = vld [vmem:[%s3458_s0 + $0x48] ss:$36 sps:$4 sm:$0xff]   ;;  %v2591_v43 = vld [vmem:[%s3458_s0 + $0x50] ss:$36 sps:$4 sm:$0xff]  }
  0x10   :  { %2211 = vmatpush3.bf16.msra.mxu0 %v2558_v14  ;;  %v2592_v44 = vld [vmem:[%s3457_s1 + $0x148] sm:$0xff]   ;;  %v2598_v49 = vld [vmem:[%s3458_s0 + $0x9c] ss:$36 sps:$4 sm:$0xff]   ;;  %v2600_v50 = vld [vmem:[%s3458_s0 + $0x90] ss:$36 sps:$4 sm:$0xff]  }
  0x11   :  { %2275 = vmatpush3.bf16.msra.mxu1 %v2559_v15  ;;  %2212 = vmatprep.subr.bf16.mxu0 %v2560_v16  ;;  %v2593_v45 = vld [vmem:[%s3457_s1 + $0x108] sm:$0xff]   ;;  %v2601_v51 = vld [vmem:[%s3458_s0 + $0x98] ss:$36 sps:$4 sm:$0xff]   ;;  %v2602_v52 = vld [vmem:[%s3457_s1 + $0x150] sm:$0xff]  }
  0x12   :  { %2276 = vmatprep.subr.bf16.mxu1 %v2561_v17  ;;  %v2594_v46 = vld [vmem:[%s3457_s1 + $0x1c8] sm:$0xff]   ;;  %v2603_v53 = vld [vmem:[%s3457_s1 + $0x110] sm:$0xff]   ;;  %v2606_v56 = vld [vmem:[%s3458_s0 + $0xdc] ss:$36 sps:$4 sm:$0xff]  }
  0x13   :  { %v2595_v47 = vld [vmem:[%s3457_s1 + $0x188] sm:$0xff]   ;;  %v2604_v54 = vld [vmem:[%s3457_s1 + $0x1d0] sm:$0xff]   ;;  %v2610_v58 = vld [vmem:[%s3458_s0 + $0xd8] ss:$36 sps:$4 sm:$0xff]  }
  0x14   :  { %2213 = vmatpush3.bf16.msra.mxu0 %v2562_v18  ;;  %v2605_v55 = vld [vmem:[%s3457_s1 + $0x190] sm:$0xff]   ;;  %v2608_v57 = vld [vmem:[%s3458_s0 + $0xe4] ss:$36 sps:$4 sm:$0xff]   ;;  %v2612_v60 = vld [vmem:[%s3457_s1 + $0x158] sm:$0xff]  }
  0x15   :  { %2277 = vmatpush3.bf16.msra.mxu1 %v2563_v19  ;;  %2214 = vmatprep.subr.bf16.mxu0 %v2564_v20  ;;  %v2611_v59 = vld [vmem:[%s3458_s0 + $0xe0] ss:$36 sps:$4 sm:$0xff]   ;;  %v2613_v61 = vld [vmem:[%s3457_s1 + $0x118] sm:$0xff]   ;;  %v2618_v1 = vld [vmem:[%s3458_s0 + $0x12c] ss:$36 sps:$4 sm:$0xff]  }
  0x16   :  { %2278 = vmatprep.subr.bf16.mxu1 %v2565_v21  ;;  %v2614_v62 = vld [vmem:[%s3457_s1 + $0x1d8] sm:$0xff]   ;;  %v2616_v0 = vld [vmem:[%s3458_s0 + $0x124] ss:$36 sps:$4 sm:$0xff]   ;;  %v2626_v8 = vld [vmem:[%s3458_s0 + $0x16c] ss:$36 sps:$4 sm:$0xff]  }
  0x17   :  { %v2615_v63 = vld [vmem:[%s3457_s1 + $0x198] sm:$0xff]   ;;  %v2620_v2 = vld [vmem:[%s3458_s0 + $0x120] ss:$36 sps:$4 sm:$0xff]   ;;  %v2621_v4 = vld [vmem:[%s3458_s0 + $0x128] ss:$36 sps:$4 sm:$0xff]  }
  0x18   :  { %2215 = vmatpush3.bf16.msra.mxu0 %v2566_v22  ;;  %v2622_v3 = vld [vmem:[%s3457_s1 + $0x160] sm:$0xff]   ;;  %v2628_v9 = vld [vmem:[%s3458_s0 + $0x174] ss:$36 sps:$4 sm:$0xff]   ;;  %v2632_v10 = vld [vmem:[%s3457_s1 + $0x168] sm:$0xff]  }
  0x19   :  { %2279 = vmatpush3.bf16.msra.mxu1 %v2567_v23  ;;  %2216 = vmatprep.subr.bf16.mxu0 %v2568_v24  ;;  %v2623_v5 = vld [vmem:[%s3457_s1 + $0x120] sm:$0xff]   ;;  %v2633_v11 = vld [vmem:[%s3457_s1 + $0x128] sm:$0xff]   ;;  %v2631_v15 = vld [vmem:[%s3458_s0 + $0x170] ss:$36 sps:$4 sm:$0xff]  }
  0x1a   :  { %2280 = vmatprep.subr.bf16.mxu1 %v2569_v25  ;;  %v2624_v6 = vld [vmem:[%s3457_s1 + $0x1e0] sm:$0xff]   ;;  %v2630_v12 = vld [vmem:[%s3458_s0 + $0x168] ss:$36 sps:$4 sm:$0xff]   ;;  %v2636_v16 = vld [vmem:[%s3458_s0 + $0x1b4] ss:$36 sps:$4 sm:$0xff]  }
  0x1b   :  { %v2625_v7 = vld [vmem:[%s3457_s1 + $0x1a0] sm:$0xff]   ;;  %v2634_v13 = vld [vmem:[%s3457_s1 + $0x1e8] sm:$0xff]   ;;  %v2642_v18 = vld [vmem:[%s3457_s1 + $0x170] sm:$0xff]  }
  0x1c   :  { %2217 = vmatpush3.bf16.msra.mxu0 %v2570_v26  ;;  %v2635_v14 = vld [vmem:[%s3457_s1 + $0x1a8] sm:$0xff]   ;;  %v2638_v17 = vld [vmem:[%s3458_s0 + $0x1bc] ss:$36 sps:$4 sm:$0xff]   ;;  %v2643_v19 = vld [vmem:[%s3457_s1 + $0x130] sm:$0xff]  }
  0x1d   :  { %2281 = vmatpush3.bf16.msra.mxu1 %v2571_v27  ;;  %2218 = vmatprep.subr.bf16.mxu0 %v2572_v28  ;;  %v2644_v20 = vld [vmem:[%s3457_s1 + $0x1f0] sm:$0xff]   ;;  %v2641_v23 = vld [vmem:[%s3458_s0 + $0x1b8] ss:$36 sps:$4 sm:$0xff]   ;;  %v2648_v25 = vld [vmem:[%s3458_s0 + $0x204] ss:$36 sps:$4 sm:$0xff]  }
  0x1e   :  { %2282 = vmatprep.subr.bf16.mxu1 %v2573_v29  ;;  %v2645_v21 = vld [vmem:[%s3457_s1 + $0x1b0] sm:$0xff]   ;;  %v2646_v24 = vld [vmem:[%s3458_s0 + $0x1fc] ss:$36 sps:$4 sm:$0xff]  }
  0x1f   :  { %v2640_v22 = vld [vmem:[%s3458_s0 + $0x1b0] ss:$36 sps:$4 sm:$0xff]   ;;  %v2652_v26 = vld [vmem:[%s3457_s1 + $0x178] sm:$0xff]  }
  0x20   :  { %2219 = vmatpush3.bf16.msra.mxu0 %v2574_v30  ;;  %v2653_v27 = vld [vmem:[%s3457_s1 + $0x138] sm:$0xff]  }
  0x21   :  { %2283 = vmatpush3.bf16.msra.mxu1 %v2575_v31  ;;  %2332 = vmatprep.subr.bf16.mxu0 %v2582_v36  ;;  %v2654_v28 = vld [vmem:[%s3457_s1 + $0x1f8] sm:$0xff]   ;;  %v2659_v31 = vld [vmem:[%s3457_s1 + $0x200] sm:$0xff]   ;;  %v2656_v36 = vld [vmem:[%s3458_s0 + $0x10] ss:$36 sps:$4 sm:$0xff]  }
  0x22   :  { %2396 = vmatprep.subr.bf16.mxu1 %v2584_v38  ;;  %v2655_v29 = vld [vmem:[%s3457_s1 + $0x1b8] sm:$0xff]  }
  0x23   :  { %1087 = vmatmul.mubr.bf16.vlgmr.msra.gmra.mrb[0].mxu0 %v2576_v32  ;;  %v2650_v30 = vld [vmem:[%s3458_s0 + $0x1f8] ss:$36 sps:$4 sm:$0xff]   ;;  %v2651_v32 = vld [vmem:[%s3458_s0 + $0x200] ss:$36 sps:$4 sm:$0xff]  }
  0x24   :  { %1184 = vmatmul.mubr.bf16.vlgmr.msra.gmra.mrb[0].mxu1 %v2579_v34  ;;  %2333 = vmatpush3.bf16.msra.mxu0 %v2583_v37  ;;  %v2658_v33 = vld [vmem:[%s3458_s0 + $0x14] ss:$36 sps:$4 sm:$0xff]   ;;  %v2663_v34 = vld [vmem:[%s3459_s5] sm:$0xff]  }
  0x25   :  { %2397 = vmatpush3.bf16.msra.mxu1 %v2585_v39  ;;  %1094 = vmatprep.mubr.bf16.mxu0 %v2586_v40  ;;  %v2662_v35 = vld [vmem:[%s3458_s0 + $0x1c] ss:$36 sps:$4 sm:$0xff]   ;;  %v2667_v39 = vld [vmem:[%s3457_s1 + $0x208] sm:$0xff]  }
  0x26   :  { %1191 = vmatprep.mubr.bf16.mxu1 %v2588_v41  ;;  %2334 = vmatprep.subr.bf16.mxu0 %v2592_v44  ;;  %v2660_v37 = vld [vmem:[%s3458_s0 + $0x18] ss:$36 sps:$4 sm:$0xff]   ;;  %v2668_v40 = vld [vmem:[%s3458_s0 + $0x64] ss:$36 sps:$4 sm:$0xff]  }
  0x27   :  { %2398 = vmatprep.subr.bf16.mxu1 %v2594_v46  ;;  %v2664_v38 = vld [vmem:[%s3458_s0 + $0x5c] ss:$36 sps:$4 sm:$0xff]   ;;  %v2678_v41 = vld [vmem:[%s3459_s5 + $0x8] sm:$0xff]  }
  0x28   :  { %2335 = vmatpush3.bf16.msra.mxu0 %v2593_v45  ;;  %v2670_v44 = vld [vmem:[%s3458_s0 + $0x60] ss:$36 sps:$4 sm:$0xff]   ;;  %v2675_v46 = vld [vmem:[%s3458_s0 + $0xac] ss:$36 sps:$4 sm:$0xff]  }
  0x29   :  { %2399 = vmatpush3.bf16.msra.mxu1 %v2595_v47  ;;  %2336 = vmatprep.subr.bf16.mxu0 %v2602_v52  ;;  %v2671_v45 = vld [vmem:[%s3458_s0 + $0xa4] ss:$36 sps:$4 sm:$0xff]   ;;  %v2693_v47 = vld [vmem:[%s3459_s5 + $0x10] sm:$0xff]  }
  0x2a   :  { %2400 = vmatprep.subr.bf16.mxu1 %v2604_v54  ;;  %v2679_v52 = vld [vmem:[%s3458_s0 + $0xec] ss:$36 sps:$4 sm:$0xff]   ;;  %v2708_v54 = vld [vmem:[%s3459_s5 + $0x18] sm:$0xff]  }
  0x2b   :  { %1095 = vmatmul.mubr.bf16.gmra.mrb[4].mxu0 %v2590_v42  ;;  %v2674_v42 = vld [vmem:[%s3457_s1 + $0x210] sm:$0xff]  }
  0x2c   :  { %1192 = vmatmul.mubr.bf16.gmra.mrb[4].mxu1 %v2591_v43  ;;  %1102 = vmatprep.mubr.bf16.mxu0 %v2596_v48  ;;  %v2666_v43 = vld [vmem:[%s3458_s0 + $0x58] ss:$36 sps:$4 sm:$0xff]  }
  0x2d   :  { %1199 = vmatprep.mubr.bf16.mxu1 %v2598_v49  ;;  %2337 = vmatpush3.bf16.msra.mxu0 %v2603_v53  ;;  %v2682_v48 = vld [vmem:[%s3457_s1 + $0x218] sm:$0xff]   ;;  %v2673_v49 = vld [vmem:[%s3458_s0 + $0xa0] ss:$36 sps:$4 sm:$0xff]  }
  0x2e   :  { %2401 = vmatpush3.bf16.msra.mxu1 %v2605_v55  ;;  %2338 = vmatprep.subr.bf16.mxu0 %v2612_v60  ;;  %v2683_v53 = vld [vmem:[%s3458_s0 + $0xf4] ss:$36 sps:$4 sm:$0xff]   ;;  %v2697_v55 = vld [vmem:[%s3457_s1 + $0x228] sm:$0xff]   ;;  %v2690_v60 = vld [vmem:[%s3458_s0 + $0x13c] ss:$36 sps:$4 sm:$0xff]  }
  0x2f   :  { %2402 = vmatprep.subr.bf16.mxu1 %v2614_v62  ;;  %v2688_v62 = vld [vmem:[%s3458_s0 + $0x130] ss:$36 sps:$4 sm:$0xff]  }
  0x31   :  { %2339 = vmatpush3.bf16.msra.mxu0 %v2613_v61  ;;  %v2712_v61 = vld [vmem:[%s3457_s1 + $0x238] sm:$0xff]  }
  0x32   :  { %2403 = vmatpush3.bf16.msra.mxu1 %v2615_v63  ;;  %2340 = vmatprep.subr.bf16.mxu0 %v2622_v3  ;;  %v2692_v63 = vld [vmem:[%s3458_s0 + $0x138] ss:$36 sps:$4 sm:$0xff]   ;;  %v2700_v3 = vld [vmem:[%s3458_s0 + $0x180] ss:$36 sps:$4 sm:$0xff]  }
  0x33   :  { %1103 = vmatmul.mubr.bf16.gmra.mrb[8].mxu0 %v2600_v50  ;;  %2404 = vmatprep.subr.bf16.mxu1 %v2624_v6  ;;  %v2689_v50 = vld [vmem:[%s3457_s1 + $0x220] sm:$0xff]  }
  0x34   :  { %1200 = vmatmul.mubr.bf16.gmra.mrb[8].mxu1 %v2601_v51  ;;  %1110 = vmatprep.mubr.bf16.mxu0 %v2606_v56  ;;  %v2677_v51 = vld [vmem:[%s3458_s0 + $0xa8] ss:$36 sps:$4 sm:$0xff]   ;;  %v2703_v6 = vld [vmem:[%s3458_s0 + $0x1c0] ss:$36 sps:$4 sm:$0xff]  }
  0x35   :  { %1207 = vmatprep.mubr.bf16.mxu1 %v2608_v57  ;;  %2341 = vmatpush3.bf16.msra.mxu0 %v2623_v5  ;;  %v2681_v56 = vld [vmem:[%s3458_s0 + $0xe8] ss:$36 sps:$4 sm:$0xff]   ;;  %v2704_v57 = vld [vmem:[%s3457_s1 + $0x230] sm:$0xff]  }
  0x36   :  { %2405 = vmatpush3.bf16.msra.mxu1 %v2625_v7  ;;  %2342 = vmatprep.subr.bf16.mxu0 %v2632_v10  ;;  %v2705_v5 = vld [vmem:[%s3458_s0 + $0x1cc] ss:$36 sps:$4 sm:$0xff]  }
  0x37   :  { %2406 = vmatprep.subr.bf16.mxu1 %v2634_v13  ;;  %v2707_v7 = vld [vmem:[%s3458_s0 + $0x1c8] ss:$36 sps:$4 sm:$0xff]   ;;  %v2718_v13 = vld [vmem:[%s3460_s4] sm:$0xff]  }
  0x38   :  { %v2711_v10 = vld [vmem:[%s3458_s0 + $0x208] ss:$36 sps:$4 sm:$0xff]  }
  0x39   :  { %2343 = vmatpush3.bf16.msra.mxu0 %v2633_v11  ;;  %v2715_v11 = vld [vmem:[%s3458_s0 + $0x210] ss:$36 sps:$4 sm:$0xff]  }
  0x3a   :  { %2407 = vmatpush3.bf16.msra.mxu1 %v2635_v14  ;;  %2344 = vmatprep.subr.bf16.mxu0 %v2642_v18  ;;  %v2717_v14 = vld [vmem:[%s3458_s0 + $0x68] ss:$36 sps:$4 sm:$0xff]   ;;  %v2721_v18 = vld [vmem:[%s3458_s0 + $0xf8] ss:$36 sps:$4 sm:$0xff]  }
  0x3b   :  { %1111 = vmatmul.mubr.bf16.gmra.mrb[12].mxu0 %v2610_v58  ;;  %2408 = vmatprep.subr.bf16.mxu1 %v2644_v20  ;;  %v2685_v58 = vld [vmem:[%s3458_s0 + $0xf0] ss:$36 sps:$4 sm:$0xff]   ;;  %v2724_v20 = vld [vmem:[%s3458_s0 + $0x140] ss:$36 sps:$4 sm:$0xff]  }
  0x3c   :  { %1208 = vmatmul.mubr.bf16.gmra.mrb[12].mxu1 %v2611_v59  ;;  %1118 = vmatprep.mubr.bf16.mxu0 %v2616_v0  ;;  %v2686_v59 = vld [vmem:[%s3458_s0 + $0x134] ss:$36 sps:$4 sm:$0xff]   ;;  %v2694_v0 = vld [vmem:[%s3458_s0 + $0x17c] ss:$36 sps:$4 sm:$0xff]  }
  0x3d   :  { %1215 = vmatprep.mubr.bf16.mxu1 %v2618_v1  ;;  %2345 = vmatpush3.bf16.msra.mxu0 %v2643_v19  ;;  %v2698_v1 = vld [vmem:[%s3458_s0 + $0x184] ss:$36 sps:$4 sm:$0xff]   ;;  %v2723_v19 = vld [vmem:[%s3460_s4 + $0x18] sm:$0xff]  }
  0x3e   :  { %2409 = vmatpush3.bf16.msra.mxu1 %v2645_v21  ;;  %2346 = vmatprep.subr.bf16.mxu0 %v2652_v26  ;;  %v2726_v21 = vld [vmem:[%s3460_s4 + $0x20] sm:$0xff]   ;;  %v2729_v26 = vld [vmem:[%s3458_s0 + $0x218] ss:$36 sps:$4 sm:$0xff]  }
  0x3f   :  { %2410 = vmatprep.subr.bf16.mxu1 %v2654_v28 }
  0x41   :  { %2347 = vmatpush3.bf16.msra.mxu0 %v2653_v27  ;;  %v2731_v27 = vld [vmem:[%s3460_s4 + $0x38] sm:$0xff]  }
  0x42   :  { %2411 = vmatpush3.bf16.msra.mxu1 %v2655_v29  ;;  %2488 = vmatprep.subr.bf16.mxu0 %v2659_v31 }
  0x43   :  { %1119 = vmatmul.mubr.bf16.gmra.mrb[16].mxu0 %v2620_v2  ;;  %2520 = vmatprep.subr.bf16.mxu1 %v2663_v34  ;;  %v2696_v2 = vld [vmem:[%s3458_s0 + $0x178] ss:$36 sps:$4 sm:$0xff]  }
  0x44   :  { %1216 = vmatmul.mubr.bf16.gmra.mrb[16].mxu1 %v2621_v4  ;;  %1126 = vmatprep.mubr.bf16.mxu0 %v2626_v8  ;;  %v2701_v4 = vld [vmem:[%s3458_s0 + $0x1c4] ss:$36 sps:$4 sm:$0xff]   ;;  %v2709_v8 = vld [vmem:[%s3458_s0 + $0x20c] ss:$36 sps:$4 sm:$0xff]  }
  0x45   :  { %1223 = vmatprep.mubr.bf16.mxu1 %v2628_v9  ;;  %v2713_v9 = vld [vmem:[%s3458_s0 + $0x214] ss:$36 sps:$4 sm:$0xff]  }
  0x4b   :  { %1127 = vmatmul.mubr.bf16.gmra.mrb[20].mxu0 %v2630_v12  ;;  %v2716_v12 = vld [vmem:[%s3458_s0 + $0x20] ss:$36 sps:$4 sm:$0xff]  }
  0x4c   :  { %1224 = vmatmul.mubr.bf16.gmra.mrb[20].mxu1 %v2631_v15  ;;  %1134 = vmatprep.mubr.bf16.mxu0 %v2636_v16  ;;  %v2719_v15 = vld [vmem:[%s3460_s4 + $0x8] sm:$0xff]   ;;  %v2720_v16 = vld [vmem:[%s3458_s0 + $0xb0] ss:$36 sps:$4 sm:$0xff]  }
  0x4d   :  { %1231 = vmatprep.mubr.bf16.mxu1 %v2638_v17  ;;  %v2722_v17 = vld [vmem:[%s3460_s4 + $0x10] sm:$0xff]  }
  0x53   :  { %1135 = vmatmul.mubr.bf16.gmra.mrb[24].mxu0 %v2640_v22  ;;  %v2725_v22 = vld [vmem:[%s3458_s0 + $0x188] ss:$36 sps:$4 sm:$0xff]  }
  0x54   :  { %1232 = vmatmul.mubr.bf16.gmra.mrb[24].mxu1 %v2641_v23  ;;  %1142 = vmatprep.mubr.bf16.mxu0 %v2646_v24  ;;  %v2727_v23 = vld [vmem:[%s3460_s4 + $0x28] sm:$0xff]   ;;  %v2728_v24 = vld [vmem:[%s3458_s0 + $0x1d0] ss:$36 sps:$4 sm:$0xff]  }
  0x55   :  { %1239 = vmatprep.mubr.bf16.mxu1 %v2648_v25  ;;  %v2730_v25 = vld [vmem:[%s3460_s4 + $0x30] sm:$0xff]  }
  0x5b   :  { %1143 = vmatmul.mubr.bf16.gmra.mrb[28].mxu0 %v2650_v30 }
  0x5c   :  { %1240 = vmatmul.mubr.bf16.gmra.mrb[28].mxu1 %v2651_v32  ;;  %1280 = vmatprep.mubr.bf16.mxu0 %v2658_v33 }
  0x5d   :  { %1377 = vmatprep.mubr.bf16.mxu1 %v2662_v35 }
  0x63   :  { %1281 = vmatmul.mubr.bf16.vlgmr.msra.gmra.mrb[32].mxu0 %v2656_v36 }
  0x64   :  { %2489 = vmatpush3.bf16.msra.mxu0 %v2659_v31  ;;  %1378 = vmatmul.mubr.bf16.vlgmr.msra.gmra.mrb[32].mxu1 %v2660_v37 }
  0x65   :  { %2521 = vmatpush3.bf16.msra.mxu1 %v2663_v34  ;;  %1288 = vmatprep.mubr.bf16.mxu0 %v2664_v38 }
  0x66   :  { %2490 = vmatprep.subr.bf16.mxu0 %v2667_v39  ;;  %1385 = vmatprep.mubr.bf16.mxu1 %v2668_v40 }
  0x67   :  { %2522 = vmatprep.subr.bf16.mxu1 %v2678_v41 }
  0x68   :  { %2491 = vmatpush3.bf16.msra.mxu0 %v2667_v39 }
  0x69   :  { %2492 = vmatprep.subr.bf16.mxu0 %v2674_v42  ;;  %2523 = vmatpush3.bf16.msra.mxu1 %v2678_v41 }
  0x6a   :  { %2524 = vmatprep.subr.bf16.mxu1 %v2693_v47 }
  0x6b   :  { %1289 = vmatmul.mubr.bf16.gmra.mrb[36].mxu0 %v2666_v43 }
  0x6c   :  { %1386 = vmatmul.mubr.bf16.gmra.mrb[36].mxu1 %v2670_v44  ;;  %1296 = vmatprep.mubr.bf16.mxu0 %v2671_v45 }
  0x6d   :  { %1393 = vmatprep.mubr.bf16.mxu1 %v2675_v46  ;;  %2493 = vmatpush3.bf16.msra.mxu0 %v2674_v42 }
  0x6e   :  { %2494 = vmatprep.subr.bf16.mxu0 %v2682_v48  ;;  %2525 = vmatpush3.bf16.msra.mxu1 %v2693_v47 }
  0x6f   :  { %2526 = vmatprep.subr.bf16.mxu1 %v2708_v54 }
  0x71   :  { %2495 = vmatpush3.bf16.msra.mxu0 %v2682_v48 }
  0x72   :  { %2496 = vmatprep.subr.bf16.mxu0 %v2689_v50  ;;  %2527 = vmatpush3.bf16.msra.mxu1 %v2708_v54 }
  0x73   :  { %1297 = vmatmul.mubr.bf16.gmra.mrb[40].mxu0 %v2673_v49 }
  0x74   :  { %1394 = vmatmul.mubr.bf16.gmra.mrb[40].mxu1 %v2677_v51  ;;  %1304 = vmatprep.mubr.bf16.mxu0 %v2679_v52 }
  0x75   :  { %1401 = vmatprep.mubr.bf16.mxu1 %v2683_v53  ;;  %2497 = vmatpush3.bf16.msra.mxu0 %v2689_v50 }
  0x76   :  { %2498 = vmatprep.subr.bf16.mxu0 %v2697_v55 }
  0x79   :  { %2499 = vmatpush3.bf16.msra.mxu0 %v2697_v55 }
  0x7a   :  { %2500 = vmatprep.subr.bf16.mxu0 %v2704_v57 }
  0x7b   :  { %1305 = vmatmul.mubr.bf16.gmra.mrb[44].mxu0 %v2681_v56 }
  0x7c   :  { %1402 = vmatmul.mubr.bf16.gmra.mrb[44].mxu1 %v2685_v58  ;;  %1312 = vmatprep.mubr.bf16.mxu0 %v2686_v59 }
  0x7d   :  { %1409 = vmatprep.mubr.bf16.mxu1 %v2690_v60  ;;  %2501 = vmatpush3.bf16.msra.mxu0 %v2704_v57 }
  0x7e   :  { %2502 = vmatprep.subr.bf16.mxu0 %v2712_v61 }
  0x81   :  { %2503 = vmatpush3.bf16.msra.mxu0 %v2712_v61 }
  0x83   :  { %1313 = vmatmul.mubr.bf16.gmra.mrb[48].mxu0 %v2688_v62 }
  0x84   :  { %1410 = vmatmul.mubr.bf16.gmra.mrb[48].mxu1 %v2692_v63  ;;  %1320 = vmatprep.mubr.bf16.mxu0 %v2694_v0 }
  0x85   :  { %1417 = vmatprep.mubr.bf16.mxu1 %v2698_v1 }
  0x8b   :  { %1321 = vmatmul.mubr.bf16.gmra.mrb[52].mxu0 %v2696_v2 }
  0x8c   :  { %1418 = vmatmul.mubr.bf16.gmra.mrb[52].mxu1 %v2700_v3  ;;  %1328 = vmatprep.mubr.bf16.mxu0 %v2701_v4 }
  0x8d   :  { %1425 = vmatprep.mubr.bf16.mxu1 %v2705_v5 }
  0x93   :  { %1329 = vmatmul.mubr.bf16.gmra.mrb[56].mxu0 %v2703_v6 }
  0x94   :  { %1426 = vmatmul.mubr.bf16.gmra.mrb[56].mxu1 %v2707_v7  ;;  %1336 = vmatprep.mubr.bf16.mxu0 %v2709_v8 }
  0x95   :  { %1433 = vmatprep.mubr.bf16.mxu1 %v2713_v9 }
  0x9b   :  { %1337 = vmatmul.mubr.bf16.gmra.mrb[60].mxu0 %v2711_v10 }
  0x9c   :  { %1434 = vmatmul.mubr.bf16.gmra.mrb[60].mxu1 %v2715_v11  ;;  %2504 = vmatprep.mubr.bf16.mxu0 %v2716_v12 }
  0x9d   :  { %2528 = vmatprep.mubr.msk.bf16.mxu1 %vm1673_vm0, %v2718_v13 }
  0xa3   :  { %2505 = vmatmul.mubr.bf16.vlgmr.msra.gmra.mrb[64].mxu0 %v2717_v14 }
  0xa4   :  { %2529 = vmatmul.mubr.msk.bf16.vlgmr.msra.gmra.mrb[64].mxu1 %vm1673_vm0, %v2719_v15  ;;  %2508 = vmatprep.mubr.bf16.mxu0 %v2720_v16 }
  0xa5   :  { %2532 = vmatprep.mubr.msk.bf16.mxu1 %vm1673_vm0, %v2722_v17 }
  0xab   :  { %2509 = vmatmul.mubr.bf16.gmra.mrb[68].mxu0 %v2721_v18 }
  0xac   :  { %2533 = vmatmul.mubr.msk.bf16.gmra.mrb[68].mxu1 %vm1673_vm0, %v2723_v19  ;;  %2512 = vmatprep.mubr.bf16.mxu0 %v2724_v20 }
  0xad   :  { %2536 = vmatprep.mubr.msk.bf16.mxu1 %vm1673_vm0, %v2726_v21 }
  0xb3   :  { %2513 = vmatmul.mubr.bf16.gmra.mrb[72].mxu0 %v2725_v22 }
  0xb4   :  { %2537 = vmatmul.mubr.msk.bf16.gmra.mrb[72].mxu1 %vm1673_vm0, %v2727_v23  ;;  %2516 = vmatprep.mubr.bf16.mxu0 %v2728_v24 }
  0xb5   :  { %2540 = vmatprep.mubr.msk.bf16.mxu1 %vm1673_vm0, %v2730_v25 }
  0xbb   :  { %2517 = vmatmul.mubr.bf16.gmra.mrb[76].mxu0 %v2729_v26 }
  0xbc   :  { %2541 = vmatmul.mubr.msk.bf16.gmra.mrb[76].mxu1 %vm1673_vm0, %v2731_v27 }
  0xf6   :  { %v2220_v28 = vpop.f32.mrb[0].mxu0 }
  0xf7   :  { %v2284_v29 = vpop.f32.mrb[0].mxu1  ;;  %v2221_v30 = vpop.f32.mrb[1].mxu0 }
  0xf8   :  { %v2222_v31 = vadd.f32 %v2221_v30, %v2220_v28  ;;  %v2285_v32 = vpop.f32.mrb[1].mxu1  ;;  %v2223_v33 = vpop.f32.mrb[2].mxu0 }
  0xf9   :  { %v2286_v34 = vadd.f32 %v2285_v32, %v2284_v29  ;;  %v2287_v35 = vpop.f32.mrb[2].mxu1  ;;  %v2224_v36 = vpop.f32.mrb[3].mxu0 }
  0xfa   :  { %v2225_v37 = vadd.f32 %v2224_v36, %v2223_v33  ;;  %v2288_v38 = vpop.f32.mrb[3].mxu1 }
  0xfb   :  { %v3253_v39 = vadd.f32 %v2286_v34, %v2222_v31  ;;  %v2289_v40 = vadd.f32 %v2288_v38, %v2287_v35 }
  0xfd   :  { %v3255_v41 = vadd.f32 %v2289_v40, %v2225_v37 }
  0xfe   :  { %v2226_v42 = vpop.f32.mrb[4].mxu0 }
  0xff   :  { %v2290_v43 = vpop.f32.mrb[4].mxu1  ;;  %v2227_v44 = vpop.f32.mrb[5].mxu0 }
 0x100   :  { %v2228_v45 = vadd.f32 %v2227_v44, %v2226_v42  ;;  %v2291_v46 = vpop.f32.mrb[5].mxu1  ;;  %v2229_v47 = vpop.f32.mrb[6].mxu0 }
 0x101   :  { %v2292_v48 = vadd.f32 %v2291_v46, %v2290_v43  ;;  %v2293_v49 = vpop.f32.mrb[6].mxu1  ;;  %v2230_v50 = vpop.f32.mrb[7].mxu0 }
 0x102   :  { %v2231_v51 = vadd.f32 %v2230_v50, %v2229_v47  ;;  %v2294_v52 = vpop.f32.mrb[7].mxu1 }
 0x103   :  { %v3257_v53 = vadd.f32 %v2292_v48, %v2228_v45  ;;  %v2295_v54 = vadd.f32 %v2294_v52, %v2293_v49 }
 0x105   :  { %v3259_v55 = vadd.f32 %v2295_v54, %v2231_v51 }
 0x106   :  { %v2232_v56 = vpop.f32.mrb[8].mxu0 }
 0x107   :  { %v2296_v57 = vpop.f32.mrb[8].mxu1  ;;  %v2233_v58 = vpop.f32.mrb[9].mxu0 }
 0x108   :  { %v2234_v59 = vadd.f32 %v2233_v58, %v2232_v56  ;;  %v2297_v60 = vpop.f32.mrb[9].mxu1  ;;  %v2235_v61 = vpop.f32.mrb[10].mxu0 }
 0x109   :  { %v2298_v62 = vadd.f32 %v2297_v60, %v2296_v57  ;;  %v2299_v63 = vpop.f32.mrb[10].mxu1  ;;  %v2236_v0 = vpop.f32.mrb[11].mxu0 }
 0x10a   :  { %v2237_v1 = vadd.f32 %v2236_v0, %v2235_v61  ;;  %v2300_v2 = vpop.f32.mrb[11].mxu1 }
 0x10b   :  { %v3261_v3 = vadd.f32 %v2298_v62, %v2234_v59  ;;  %v2301_v4 = vadd.f32 %v2300_v2, %v2299_v63 }
 0x10d   :  { %v3263_v5 = vadd.f32 %v2301_v4, %v2237_v1 }
 0x10e   :  { %v2238_v6 = vpop.f32.mrb[12].mxu0 }
 0x10f   :  { %v2302_v7 = vpop.f32.mrb[12].mxu1  ;;  %v2239_v8 = vpop.f32.mrb[13].mxu0 }
 0x110   :  { %v2240_v9 = vadd.f32 %v2239_v8, %v2238_v6  ;;  %v2303_v10 = vpop.f32.mrb[13].mxu1  ;;  %v2241_v11 = vpop.f32.mrb[14].mxu0 }
 0x111   :  { %v2304_v12 = vadd.f32 %v2303_v10, %v2302_v7  ;;  %v2305_v13 = vpop.f32.mrb[14].mxu1  ;;  %v2242_v14 = vpop.f32.mrb[15].mxu0 }
 0x112   :  { %v2243_v15 = vadd.f32 %v2242_v14, %v2241_v11  ;;  %v2306_v16 = vpop.f32.mrb[15].mxu1 }
 0x113   :  { %v3265_v17 = vadd.f32 %v2304_v12, %v2240_v9  ;;  %v2307_v18 = vadd.f32 %v2306_v16, %v2305_v13 }
 0x115   :  { %v3267_v19 = vadd.f32 %v2307_v18, %v2243_v15 }
 0x116   :  { %v2244_v20 = vpop.f32.mrb[16].mxu0 }
 0x117   :  { %v2308_v21 = vpop.f32.mrb[16].mxu1  ;;  %v2245_v22 = vpop.f32.mrb[17].mxu0 }
 0x118   :  { %v2246_v23 = vadd.f32 %v2245_v22, %v2244_v20  ;;  %v2309_v24 = vpop.f32.mrb[17].mxu1  ;;  %v2247_v25 = vpop.f32.mrb[18].mxu0 }
 0x119   :  { %v2310_v26 = vadd.f32 %v2309_v24, %v2308_v21  ;;  %v2311_v27 = vpop.f32.mrb[18].mxu1  ;;  %v2248_v28 = vpop.f32.mrb[19].mxu0 }
 0x11a   :  { %v2249_v29 = vadd.f32 %v2248_v28, %v2247_v25  ;;  %v2312_v30 = vpop.f32.mrb[19].mxu1 }
 0x11b   :  { %v3269_v31 = vadd.f32 %v2310_v26, %v2246_v23  ;;  %v2313_v32 = vadd.f32 %v2312_v30, %v2311_v27 }
 0x11d   :  { %v3271_v33 = vadd.f32 %v2313_v32, %v2249_v29 }
 0x11e   :  { %v2250_v34 = vpop.f32.mrb[20].mxu0 }
 0x11f   :  { %v2314_v35 = vpop.f32.mrb[20].mxu1  ;;  %v2251_v36 = vpop.f32.mrb[21].mxu0 }
 0x120   :  { %v2252_v37 = vadd.f32 %v2251_v36, %v2250_v34  ;;  %v2315_v38 = vpop.f32.mrb[21].mxu1  ;;  %v2253_v40 = vpop.f32.mrb[22].mxu0 }
 0x121   :  { %v2316_v42 = vadd.f32 %v2315_v38, %v2314_v35  ;;  %v2317_v43 = vpop.f32.mrb[22].mxu1  ;;  %v2254_v44 = vpop.f32.mrb[23].mxu0 }
 0x122   :  { %v2255_v45 = vadd.f32 %v2254_v44, %v2253_v40  ;;  %v2318_v46 = vpop.f32.mrb[23].mxu1 }
 0x123   :  { %v3273_v47 = vadd.f32 %v2316_v42, %v2252_v37  ;;  %v2319_v48 = vadd.f32 %v2318_v46, %v2317_v43 }
 0x125   :  { %v3275_v49 = vadd.f32 %v2319_v48, %v2255_v45 }
 0x126   :  { %v2256_v50 = vpop.f32.mrb[24].mxu0 }
 0x127   :  { %v2320_v51 = vpop.f32.mrb[24].mxu1  ;;  %v2257_v52 = vpop.f32.mrb[25].mxu0 }
 0x128   :  { %v2258_v54 = vadd.f32 %v2257_v52, %v2256_v50  ;;  %v2321_v56 = vpop.f32.mrb[25].mxu1  ;;  %v2259_v57 = vpop.f32.mrb[26].mxu0 }
 0x129   :  { %v2322_v58 = vadd.f32 %v2321_v56, %v2320_v51  ;;  %v2323_v59 = vpop.f32.mrb[26].mxu1  ;;  %v2260_v60 = vpop.f32.mrb[27].mxu0 }
 0x12a   :  { %v2261_v61 = vadd.f32 %v2260_v60, %v2259_v57  ;;  %v2324_v62 = vpop.f32.mrb[27].mxu1 }
 0x12b   :  { %v3277_v63 = vadd.f32 %v2322_v58, %v2258_v54  ;;  %v2325_v0 = vadd.f32 %v2324_v62, %v2323_v59 }
 0x12d   :  { %v3279_v1 = vadd.f32 %v2325_v0, %v2261_v61 }
 0x12e   :  { %v2262_v2 = vpop.f32.mrb[28].mxu0 }
 0x12f   :  { %v2326_v4 = vpop.f32.mrb[28].mxu1  ;;  %v2263_v6 = vpop.f32.mrb[29].mxu0 }
 0x130   :  { %v2264_v7 = vadd.f32 %v2263_v6, %v2262_v2  ;;  %v2327_v8 = vpop.f32.mrb[29].mxu1  ;;  %v2265_v9 = vpop.f32.mrb[30].mxu0 }
 0x131   :  { %v2328_v10 = vadd.f32 %v2327_v8, %v2326_v4  ;;  %v2329_v11 = vpop.f32.mrb[30].mxu1  ;;  %v2266_v12 = vpop.f32.mrb[31].mxu0 }
 0x132   :  { %v2267_v13 = vadd.f32 %v2266_v12, %v2265_v9  ;;  %v2330_v14 = vpop.f32.mrb[31].mxu1 }
 0x133   :  { %v3281_v15 = vadd.f32 %v2328_v10, %v2264_v7  ;;  %v2331_v16 = vadd.f32 %v2330_v14, %v2329_v11 }
 0x135   :  { %v3283_v18 = vadd.f32 %v2331_v16, %v2267_v13 }
 0x136   :  { %v2348_v20 = vpop.f32.mrb[32].mxu0 }
 0x137   :  { %v2349_v21 = vpop.f32.mrb[33].mxu0  ;;  %v2412_v22 = vpop.f32.mrb[32].mxu1 }
 0x138   :  { %v2350_v23 = vadd.f32 %v2349_v21, %v2348_v20  ;;  %v2351_v24 = vpop.f32.mrb[34].mxu0  ;;  %v2413_v25 = vpop.f32.mrb[33].mxu1 }
 0x139   :  { %v2352_v26 = vpop.f32.mrb[35].mxu0  ;;  %v2414_v27 = vadd.f32 %v2413_v25, %v2412_v22  ;;  %v2415_v28 = vpop.f32.mrb[34].mxu1 }
 0x13a   :  { %v1283_v29 = vadd.f32 %v2350_v23, %v3253_v39  ;;  %v2353_v30 = vadd.f32 %v2352_v26, %v2351_v24  ;;  %v2416_v32 = vpop.f32.mrb[35].mxu1 }
 0x13b   :  { %v2417_v34 = vadd.f32 %v2416_v32, %v2415_v28 }
 0x13c   :  { %v1286_v35 = vadd.f32 %v2353_v30, %v3255_v41  ;;  %v3287_v36 = vadd.f32 %v2414_v27, %v1283_v29 }
 0x13e   :  { %v2354_v37 = vpop.f32.mrb[36].mxu0  ;;  %v3289_v38 = vadd.f32 %v2417_v34, %v1286_v35 }
 0x13f   :  { %v2355_v40 = vpop.f32.mrb[37].mxu0  ;;  %v2418_v42 = vpop.f32.mrb[36].mxu1 }
 0x140   :  { %v2356_v43 = vadd.f32 %v2355_v40, %v2354_v37  ;;  %v2357_v44 = vpop.f32.mrb[38].mxu0  ;;  %v2419_v45 = vpop.f32.mrb[37].mxu1 }
 0x141   :  { %v2358_v46 = vpop.f32.mrb[39].mxu0  ;;  %v2420_v48 = vadd.f32 %v2419_v45, %v2418_v42  ;;  %v2421_v50 = vpop.f32.mrb[38].mxu1 }
 0x142   :  { %v1291_v39 = vadd.f32 %v2356_v43, %v3257_v53  ;;  %v2359_v51 = vadd.f32 %v2358_v46, %v2357_v44  ;;  %v2422_v52 = vpop.f32.mrb[39].mxu1 }
 0x143   :  { %v2423_v54 = vadd.f32 %v2422_v52, %v2421_v50 }
 0x144   :  { %v1294_v41 = vadd.f32 %v2359_v51, %v3259_v55  ;;  %v3293_v56 = vadd.f32 %v2420_v48, %v1291_v39 }
 0x146   :  { %v2360_v57 = vpop.f32.mrb[40].mxu0  ;;  %v3295_v58 = vadd.f32 %v2423_v54, %v1294_v41 }
 0x147   :  { %v2361_v59 = vpop.f32.mrb[41].mxu0  ;;  %v2424_v60 = vpop.f32.mrb[40].mxu1 }
 0x148   :  { %v2362_v61 = vadd.f32 %v2361_v59, %v2360_v57  ;;  %v2363_v62 = vpop.f32.mrb[42].mxu0  ;;  %v2425_v0 = vpop.f32.mrb[41].mxu1 }
 0x149   :  { %v2364_v2 = vpop.f32.mrb[43].mxu0  ;;  %v2426_v4 = vadd.f32 %v2425_v0, %v2424_v60  ;;  %v2427_v6 = vpop.f32.mrb[42].mxu1 }
 0x14a   :  { %v1299_v53 = vadd.f32 %v2362_v61, %v3261_v3  ;;  %v2365_v7 = vadd.f32 %v2364_v2, %v2363_v62  ;;  %v2428_v8 = vpop.f32.mrb[43].mxu1 }
 0x14b   :  { %v2429_v9 = vadd.f32 %v2428_v8, %v2427_v6 }
 0x14c   :  { %v1302_v55 = vadd.f32 %v2365_v7, %v3263_v5  ;;  %v3299_v10 = vadd.f32 %v2426_v4, %v1299_v53 }
 0x14e   :  { %v2366_v11 = vpop.f32.mrb[44].mxu0  ;;  %v3301_v12 = vadd.f32 %v2429_v9, %v1302_v55 }
 0x14f   :  { %v2367_v13 = vpop.f32.mrb[45].mxu0  ;;  %v2430_v14 = vpop.f32.mrb[44].mxu1 }
 0x150   :  { %v2368_v16 = vadd.f32 %v2367_v13, %v2366_v11  ;;  %v2369_v20 = vpop.f32.mrb[46].mxu0  ;;  %v2431_v21 = vpop.f32.mrb[45].mxu1 }
 0x151   :  { %v2370_v22 = vpop.f32.mrb[47].mxu0  ;;  %v2432_v23 = vadd.f32 %v2431_v21, %v2430_v14  ;;  %v2433_v24 = vpop.f32.mrb[46].mxu1 }
 0x152   :  { %v1307_v3 = vadd.f32 %v2368_v16, %v3265_v17  ;;  %v2371_v25 = vadd.f32 %v2370_v22, %v2369_v20  ;;  %v2434_v26 = vpop.f32.mrb[47].mxu1 }
 0x153   :  { %v2435_v27 = vadd.f32 %v2434_v26, %v2433_v24 }
 0x154   :  { %v1310_v5 = vadd.f32 %v2371_v25, %v3267_v19  ;;  %v3305_v28 = vadd.f32 %v2432_v23, %v1307_v3 }
 0x156   :  { %v2372_v29 = vpop.f32.mrb[48].mxu0  ;;  %v3307_v30 = vadd.f32 %v2435_v27, %v1310_v5 }
 0x157   :  { %v2373_v32 = vpop.f32.mrb[49].mxu0  ;;  %v2436_v34 = vpop.f32.mrb[48].mxu1 }
 0x158   :  { %v2374_v35 = vadd.f32 %v2373_v32, %v2372_v29  ;;  %v2375_v37 = vpop.f32.mrb[50].mxu0  ;;  %v2437_v40 = vpop.f32.mrb[49].mxu1 }
 0x159   :  { %v2376_v42 = vpop.f32.mrb[51].mxu0  ;;  %v2438_v43 = vadd.f32 %v2437_v40, %v2436_v34  ;;  %v2439_v44 = vpop.f32.mrb[50].mxu1 }
 0x15a   :  { %v1315_v17 = vadd.f32 %v2374_v35, %v3269_v31  ;;  %v2377_v45 = vadd.f32 %v2376_v42, %v2375_v37  ;;  %v2440_v46 = vpop.f32.mrb[51].mxu1 }
 0x15b   :  { %v2441_v48 = vadd.f32 %v2440_v46, %v2439_v44  ;;  %v3339_v46 = vld [vmem:[%s3462_s6] ss:$0 sm:$0xff] }
 0x15c   :  { %v1318_v19 = vadd.f32 %v2377_v45, %v3271_v33  ;;  %v3311_v50 = vadd.f32 %v2438_v43, %v1315_v17  ;;  %v3334_v45 = vld [vmem:[%s3461_s2] ss:$0 sm:$0xff] }
 0x15e   :  { %v2378_v39 = vpop.f32.mrb[52].mxu0  ;;  %v3313_v51 = vadd.f32 %v2441_v48, %v1318_v19 }
 0x15f   :  { %v2379_v52 = vpop.f32.mrb[53].mxu0  ;;  %v2442_v54 = vpop.f32.mrb[52].mxu1 }
 0x160   :  { %v2380_v41 = vadd.f32 %v2379_v52, %v2378_v39  ;;  %v2381_v57 = vpop.f32.mrb[54].mxu0  ;;  %v2443_v59 = vpop.f32.mrb[53].mxu1 }
 0x161   :  { %v2382_v60 = vpop.f32.mrb[55].mxu0  ;;  %v2444_v61 = vadd.f32 %v2443_v59, %v2442_v54  ;;  %v2445_v62 = vpop.f32.mrb[54].mxu1  ;;  %v3348_v54 = vld [vmem:[%s3463_s3] ss:$0 sm:$0xff] }
 0x162   :  { %v1323_v31 = vadd.f32 %v2380_v41, %v3273_v47  ;;  %v2383_v0 = vadd.f32 %v2382_v60, %v2381_v57  ;;  %v2446_v2 = vpop.f32.mrb[55].mxu1 }
 0x163   :  { %v2447_v4 = vadd.f32 %v2446_v2, %v2445_v62 }
 0x164   :  { %v1326_v33 = vadd.f32 %v2383_v0, %v3275_v49  ;;  %v3317_v6 = vadd.f32 %v2444_v61, %v1323_v31 }
 0x166   :  { %v2384_v53 = vpop.f32.mrb[56].mxu0  ;;  %v3319_v7 = vadd.f32 %v2447_v4, %v1326_v33  ;;  %v3361_v33 = vld [vmem:[%s3464_s7] ss:$0 sm:$0xff] }
 0x167   :  { %v2385_v8 = vpop.f32.mrb[57].mxu0  ;;  %v2448_v9 = vpop.f32.mrb[56].mxu1 }
 0x168   :  { %v2386_v55 = vadd.f32 %v2385_v8, %v2384_v53  ;;  %v2387_v11 = vpop.f32.mrb[58].mxu0  ;;  %v2449_v13 = vpop.f32.mrb[57].mxu1 }
 0x169   :  { %v2388_v14 = vpop.f32.mrb[59].mxu0  ;;  %v2450_v16 = vadd.f32 %v2449_v13, %v2448_v9  ;;  %v2451_v20 = vpop.f32.mrb[58].mxu1 }
 0x16a   :  { %v1331_v47 = vadd.f32 %v2386_v55, %v3277_v63  ;;  %v2389_v21 = vadd.f32 %v2388_v14, %v2387_v11  ;;  %v2452_v22 = vpop.f32.mrb[59].mxu1 }
 0x16b   :  { %v2453_v23 = vadd.f32 %v2452_v22, %v2451_v20 }
 0x16c   :  { %v1334_v49 = vadd.f32 %v2389_v21, %v3279_v1  ;;  %v3323_v24 = vadd.f32 %v2450_v16, %v1331_v47 }
 0x16e   :  { %v2390_v3 = vpop.f32.mrb[60].mxu0  ;;  %v3325_v25 = vadd.f32 %v2453_v23, %v1334_v49 }
 0x16f   :  { %v2391_v26 = vpop.f32.mrb[61].mxu0  ;;  %v2454_v27 = vpop.f32.mrb[60].mxu1 }
 0x170   :  { %v2392_v5 = vadd.f32 %v2391_v26, %v2390_v3  ;;  %v2393_v29 = vpop.f32.mrb[62].mxu0  ;;  %v2455_v32 = vpop.f32.mrb[61].mxu1 }
 0x171   :  { %v2394_v34 = vpop.f32.mrb[63].mxu0  ;;  %v2456_v35 = vadd.f32 %v2455_v32, %v2454_v27  ;;  %v2457_v37 = vpop.f32.mrb[62].mxu1 }
 0x172   :  { %v1339_v63 = vadd.f32 %v2392_v5, %v3281_v15  ;;  %v2395_v40 = vadd.f32 %v2394_v34, %v2393_v29  ;;  %v2458_v42 = vpop.f32.mrb[63].mxu1 }
 0x173   :  { %v2459_v43 = vadd.f32 %v2458_v42, %v2457_v37 }
 0x174   :  { %v1342_v1 = vadd.f32 %v2395_v40, %v3283_v18  ;;  %v3329_v44 = vadd.f32 %v2456_v35, %v1339_v63 }
 0x176   :  { %v2506_v17 = vpop.f32.mrb[64].mxu0  ;;  %v3341_v48 = vadd.f32 %v2459_v43, %v1342_v1 }
 0x177   :  { %v1485_v15 = vadd.f32 %v2506_v17, %v3293_v56  ;;  %v1476_v19 = vpop.f32.mrb[65].mxu0  ;;  %v2530_v39 = vpop.f32.mrb[64].mxu1 }
 0x178   :  { %v1477_v18 = vadd.f32 %v1476_v19, %v3287_v36  ;;  %v2507_v52 = vpop.f32.mrb[66].mxu0  ;;  %v1732_v41 = vpop.f32.mrb[65].mxu1  ;;  %v1804_v60 = vmul.f32 %v2530_v39, %v3339_v46 }
 0x179   :  { %v1548_v57 = vmul.f32 %v3334_v45, %v1485_v15  ;;  %v1488_v59 = vadd.f32 %v2507_v52, %v3295_v58  ;;  %v1479_v61 = vpop.f32.mrb[67].mxu0  ;;  %v2531_v62 = vpop.f32.mrb[66].mxu1  ;;  %v1802_v36 = vmul.f32 %v3339_v46, %v1732_v41 }
 0x17a   :  { %v1546_v56 = vmul.f32 %v3334_v45, %v1477_v18  ;;  %v1480_v31 = vadd.f32 %v1479_v61, %v3289_v38  ;;  %v1735_v0 = vpop.f32.mrb[67].mxu1  ;;  %v1805_v38 = vmul.f32 %v2531_v62, %v3339_v46 }
 0x17b   :  { %v1549_v2 = vmul.f32 %v3334_v45, %v1488_v59  ;;  %v1571_v4 = vadd.f32 %v3348_v54, %v1548_v57  ;;  %v1803_v13 = vmul.f32 %v3339_v46, %v1735_v0 }
 0x17c   :  { %v1547_v58 = vmul.f32 %v3334_v45, %v1480_v31  ;;  %v1569_v53 = vadd.f32 %v3348_v54, %v1546_v56 }
 0x17d   :  { %v1820_v8 = vadd.f32 %v1804_v60, %v1571_v4  ;;  %v1572_v9 = vadd.f32 %v3348_v54, %v1549_v2 }
 0x17e   :  { %v1818_v55 = vadd.f32 %v1802_v36, %v1569_v53  ;;  %v1570_v11 = vadd.f32 %v3348_v54, %v1547_v58  ;;  %v2510_v14 = vpop.f32.mrb[68].mxu0 }
 0x17f   :  { %v1843_v16 = vadd.f32 %v3361_v33, %v1820_v8  ;;  %v1821_v20 = vadd.f32 %v1805_v38, %v1572_v9  ;;  %v1501_v47 = vadd.f32 %v2510_v14, %v3305_v28  ;;  %v1492_v21 = vpop.f32.mrb[69].mxu0  ;;  %v2534_v22 = vpop.f32.mrb[68].mxu1 }
 0x180   :  { %v1841_v23 = vadd.f32 %v3361_v33, %v1818_v55  ;;  %v1819_v49 = vadd.f32 %v1803_v13, %v1570_v11  ;;  %v1493_v3 = vadd.f32 %v1492_v21, %v3299_v10  ;;  %v2511_v26 = vpop.f32.mrb[70].mxu0  ;;  %v1748_v27 = vpop.f32.mrb[69].mxu1  ;;  %v1808_v34 = vmul.f32 %v2534_v22, %v3339_v46 }
 0x181   :  { %v1844_v5 = vadd.f32 %v3361_v33, %v1821_v20  ;;  %v1552_v29 = vmul.f32 %v3334_v45, %v1501_v47  ;;  %v1504_v32 = vadd.f32 %v2511_v26, %v3307_v30  ;;  %v1495_v35 = vpop.f32.mrb[71].mxu0  ;;  %v2535_v37 = vpop.f32.mrb[70].mxu1  ;;  %v1859_v28 = vmax.f32 %v1843_v16, 0.0 }
 0x182   :  { %v1842_v63 = vadd.f32 %v3361_v33, %v1819_v49  ;;  %v1550_v40 = vmul.f32 %v3334_v45, %v1493_v3  ;;  %v1496_v42 = vadd.f32 %v1495_v35, %v3301_v12  ;;  %v1751_v10 = vpop.f32.mrb[71].mxu1  ;;  %v1806_v15 = vmul.f32 %v3339_v46, %v1748_v27 }
 0x183   :  { %v1860_v43 = vmax.f32 %v1844_v5, 0.0  ;;  %v1553_v1 = vmul.f32 %v3334_v45, %v1504_v32  ;;  %v1575_v17 = vadd.f32 %v3348_v54, %v1552_v29  ;;  %v1857_v30 = vmax.f32 %v1841_v23, 0.0 }
 0x184   :  { %v1858_v19 = vmax.f32 %v1842_v63, 0.0  ;;  %v1551_v39 = vmul.f32 %v3334_v45, %v1496_v42  ;;  %v1573_v18 = vadd.f32 %v3348_v54, %v1550_v40  ;;  %v1809_v12 = vmul.f32 %v2535_v37, %v3339_v46 }
 0x185   :  { %v2165_v52 = vpack.c.bf16 %v1860_v43, %v1859_v28  ;;  %v1824_v41 = vadd.f32 %v1808_v34, %v1575_v17  ;;  %v1576_v57 = vadd.f32 %v3348_v54, %v1553_v1  ;;  %v1807_v62 = vmul.f32 %v3339_v46, %v1751_v10 }
 0x186   :  { %v2160_v59 = vpack.c.bf16 %v1858_v19, %v1857_v30  ;;  %v1822_v60 = vadd.f32 %v1806_v15, %v1573_v18  ;;  %v1574_v61 = vadd.f32 %v3348_v54, %v1551_v39  ;;  %v2514_v56 = vpop.f32.mrb[72].mxu0 }
 0x187   :  { %2197 = vst [vmem:[%s3465_s8 + $0x8] sm:$0xff] %v2165_v52   ;;  %v1847_v31 = vadd.f32 %v3361_v33, %v1824_v41  ;;  %v1825_v36 = vadd.f32 %v1809_v12, %v1576_v57  ;;  %v1517_v0 = vadd.f32 %v2514_v56, %v3317_v6  ;;  %v1508_v2 = vpop.f32.mrb[73].mxu0  ;;  %v2538_v4 = vpop.f32.mrb[72].mxu1 }
 0x188   :  { %2161 = vst [vmem:[%s3465_s8] sm:$0xff] %v2160_v59   ;;  %v1845_v58 = vadd.f32 %v3361_v33, %v1822_v60  ;;  %v1823_v53 = vadd.f32 %v1807_v62, %v1574_v61  ;;  %v1509_v8 = vadd.f32 %v1508_v2, %v3311_v50  ;;  %v2515_v9 = vpop.f32.mrb[74].mxu0  ;;  %v1764_v38 = vpop.f32.mrb[73].mxu1  ;;  %v1812_v6 = vmul.f32 %v2538_v4, %v3339_v46 }
 0x189   :  { %v1848_v55 = vadd.f32 %v3361_v33, %v1825_v36  ;;  %v1556_v11 = vmul.f32 %v3334_v45, %v1517_v0  ;;  %v1520_v13 = vadd.f32 %v2515_v9, %v3319_v7  ;;  %v1511_v14 = vpop.f32.mrb[75].mxu0  ;;  %v2539_v16 = vpop.f32.mrb[74].mxu1  ;;  %v1863_v20 = vmax.f32 %v1847_v31, 0.0 }
 0x18a   :  { %v1846_v47 = vadd.f32 %v3361_v33, %v1823_v53  ;;  %v1554_v21 = vmul.f32 %v3334_v45, %v1509_v8  ;;  %v1512_v22 = vadd.f32 %v1511_v14, %v3313_v51  ;;  %v1767_v50 = vpop.f32.mrb[75].mxu1  ;;  %v1810_v26 = vmul.f32 %v3339_v46, %v1764_v38 }
 0x18b   :  { %v1864_v23 = vmax.f32 %v1848_v55, 0.0  ;;  %v1557_v49 = vmul.f32 %v3334_v45, %v1520_v13  ;;  %v1579_v3 = vadd.f32 %v3348_v54, %v1556_v11  ;;  %v1861_v7 = vmax.f32 %v1845_v58, 0.0 }
 0x18c   :  { %v1862_v27 = vmax.f32 %v1846_v47, 0.0  ;;  %v1555_v5 = vmul.f32 %v3334_v45, %v1512_v22  ;;  %v1577_v29 = vadd.f32 %v3348_v54, %v1554_v21  ;;  %v1813_v51 = vmul.f32 %v2539_v16, %v3339_v46 }
 0x18d   :  { %v2175_v32 = vpack.c.bf16 %v1864_v23, %v1863_v20  ;;  %v1828_v34 = vadd.f32 %v1812_v6, %v1579_v3  ;;  %v1580_v35 = vadd.f32 %v3348_v54, %v1557_v49  ;;  %v1811_v40 = vmul.f32 %v3339_v46, %v1767_v50 }
 0x18e   :  { %v2170_v37 = vpack.c.bf16 %v1862_v27, %v1861_v7  ;;  %v1826_v28 = vadd.f32 %v1810_v26, %v1577_v29  ;;  %v1578_v63 = vadd.f32 %v3348_v54, %v1555_v5  ;;  %v2518_v42 = vpop.f32.mrb[76].mxu0 }
 0x18f   :  { %2199 = vst [vmem:[%s3465_s8 + $0x18] sm:$0xff] %v2175_v32   ;;  %v1851_v10 = vadd.f32 %v3361_v33, %v1828_v34  ;;  %v1829_v43 = vadd.f32 %v1813_v51, %v1580_v35  ;;  %v1533_v1 = vadd.f32 %v2518_v42, %v3329_v44  ;;  %v1524_v17 = vpop.f32.mrb[77].mxu0  ;;  %v2542_v15 = vpop.f32.mrb[76].mxu1 }
 0x190   :  { %2198 = vst [vmem:[%s3465_s8 + $0x10] sm:$0xff] %v2170_v37   ;;  %v1849_v30 = vadd.f32 %v3361_v33, %v1826_v28  ;;  %v1827_v19 = vadd.f32 %v1811_v40, %v1578_v63  ;;  %v1525_v39 = vadd.f32 %v1524_v17, %v3323_v24  ;;  %v2519_v18 = vpop.f32.mrb[78].mxu0  ;;  %v1780_v52 = vpop.f32.mrb[77].mxu1  ;;  %v1816_v44 = vmul.f32 %v2542_v15, %v3339_v46 }
 0x191   :  { %v1852_v41 = vadd.f32 %v3361_v33, %v1829_v43  ;;  %v1560_v57 = vmul.f32 %v3334_v45, %v1533_v1  ;;  %v1536_v12 = vadd.f32 %v2519_v18, %v3341_v48  ;;  %v1527_v59 = vpop.f32.mrb[79].mxu0  ;;  %v2543_v60 = vpop.f32.mrb[78].mxu1  ;;  %v1867_v61 = vmax.f32 %v1851_v10, 0.0 }
 0x192   :  { %v1850_v62 = vadd.f32 %v3361_v33, %v1827_v19  ;;  %v1558_v56 = vmul.f32 %v3334_v45, %v1525_v39  ;;  %v1528_v31 = vadd.f32 %v1527_v59, %v3325_v25  ;;  %v1783_v24 = vpop.f32.mrb[79].mxu1  ;;  %v1814_v4 = vmul.f32 %v3339_v46, %v1780_v52 }
 0x193   :  { %v1868_v36 = vmax.f32 %v1852_v41, 0.0  ;;  %v1561_v0 = vmul.f32 %v3334_v45, %v1536_v12  ;;  %v1583_v2 = vadd.f32 %v3348_v54, %v1560_v57  ;;  %v1865_v48 = vmax.f32 %v1849_v30, 0.0 }
 0x194   :  { %v1866_v58 = vmax.f32 %v1850_v62, 0.0  ;;  %v1559_v53 = vmul.f32 %v3334_v45, %v1528_v31  ;;  %v1581_v8 = vadd.f32 %v3348_v54, %v1558_v56  ;;  %v1817_v25 = vmul.f32 %v2543_v60, %v3339_v46 }
 0x195   :  { %v2185_v9 = vpack.c.bf16 %v1868_v36, %v1867_v61  ;;  %v1832_v38 = vadd.f32 %v1816_v44, %v1583_v2  ;;  %v1584_v55 = vadd.f32 %v3348_v54, %v1561_v0  ;;  %v1815_v14 = vmul.f32 %v3339_v46, %v1783_v24 }
 0x196   :  { %v2180_v11 = vpack.c.bf16 %v1866_v58, %v1865_v48  ;;  %v1830_v13 = vadd.f32 %v1814_v4, %v1581_v8  ;;  %v1582_v6 = vadd.f32 %v3348_v54, %v1559_v53 }
 0x197   :  { %2201 = vst [vmem:[%s3465_s8 + $0x28] sm:$0xff] %v2185_v9   ;;  %v1855_v45 = vadd.f32 %v3361_v33, %v1832_v38  ;;  %v1833_v16 = vadd.f32 %v1817_v25, %v1584_v55 }
 0x198   :  { %2200 = vst [vmem:[%s3465_s8 + $0x20] sm:$0xff] %v2180_v11   ;;  %v1853_v20 = vadd.f32 %v3361_v33, %v1830_v13  ;;  %v1831_v47 = vadd.f32 %v1815_v14, %v1582_v6 }
 0x199   :  { %v1856_v21 = vadd.f32 %v3361_v33, %v1833_v16  ;;  %v1871_v22 = vmax.f32 %v1855_v45, 0.0 }
 0x19a   :  { %v1854_v54 = vadd.f32 %v3361_v33, %v1831_v47  ;;  %v1869_v50 = vmax.f32 %v1853_v20, 0.0 }
 0x19b   :  { %v1872_v46 = vmax.f32 %v1856_v21, 0.0 }
 0x19c   :  { %v1870_v23 = vmax.f32 %v1854_v54, 0.0 }
 0x19d   :  { %v2195_v49 = vpack.c.bf16 %v1872_v46, %v1871_v22 }
 0x19e   :  { %v2190_v3 = vpack.c.bf16 %v1870_v23, %v1869_v50 }
 0x19f   :  { %2203 = vst [vmem:[%s3465_s8 + $0x38] sm:$0xff] %v2195_v49  }
 0x1a0   :  { %2202 = vst [vmem:[%s3465_s8 + $0x30] sm:$0xff] %v2190_v3  }

</bundles_post_ra>
